<compile_context>
chip_gen: v7x
topology: tpu7x:2x2x1
jax: 0.10.0
libtpu: 0.0.40
codegen_flags: <defaults>
</compile_context>

<pallas_src>
import functools
import numpy as np

import jax
import jax.numpy as jnp
from jax.experimental import pallas as pl
from jax.experimental.pallas import tpu as pltpu  # noqa: F401  (TPU backend)


# ----------------------------------------------------------------------------
# Shared in-kernel helpers
# ----------------------------------------------------------------------------
def _ln(z, g, b, eps=1e-5):
    mu = jnp.mean(z, axis=-1, keepdims=True)
    zc = z - mu
    var = jnp.mean(zc * zc, axis=-1, keepdims=True)
    return zc * jax.lax.rsqrt(var + eps) * g + b


# ----------------------------------------------------------------------------
# Pallas kernels
# ----------------------------------------------------------------------------
def _matmul_kernel(a_ref, b_ref, o_ref):
    o_ref[...] = jnp.dot(a_ref[...], b_ref[...], preferred_element_type=jnp.float32)


def _matmul_bias_kernel(a_ref, b_ref, bias_ref, o_ref):
    o_ref[...] = (jnp.dot(a_ref[...], b_ref[...], preferred_element_type=jnp.float32)
                  + bias_ref[...])


def pallas_matmul(a, b, bias=None):
    """Single-tile (M,K)@(K,N) [+ bias] on the MXU; operands are VMEM-resident."""
    M, _ = a.shape
    N = b.shape[1]
    a = a.astype(jnp.float32)
    b = b.astype(jnp.float32)
    if bias is None:
        return pl.pallas_call(
            _matmul_kernel,
            out_shape=jax.ShapeDtypeStruct((M, N), jnp.float32),
        )(a, b)
    bias2 = jnp.asarray(bias, jnp.float32)
    if bias2.ndim == 1:
        bias2 = bias2.reshape(1, N)
    return pl.pallas_call(
        _matmul_bias_kernel,
        out_shape=jax.ShapeDtypeStruct((M, N), jnp.float32),
    )(a, b, bias2)


def _layernorm_kernel(x_ref, g_ref, b_ref, o_ref):
    o_ref[...] = _ln(x_ref[...], g_ref[...], b_ref[...])


def pallas_layernorm(x2d, gamma, beta):
    M, D = x2d.shape
    return pl.pallas_call(
        _layernorm_kernel,
        out_shape=jax.ShapeDtypeStruct((M, D), jnp.float32),
    )(x2d.astype(jnp.float32),
      gamma.reshape(1, D).astype(jnp.float32),
      beta.reshape(1, D).astype(jnp.float32))


def _decomp_kernel(xpad_ref, res_ref, mean_ref, *, T, ksize):
    acc = jnp.zeros(res_ref.shape, jnp.float32)
    for w in range(ksize):                      # static unroll (ksize = 25)
        acc = acc + xpad_ref[:, w:w + T, :]
    mean = acc * (1.0 / float(ksize))
    half = (ksize - 1) // 2
    x = xpad_ref[:, half:half + T, :]
    mean_ref[...] = mean
    res_ref[...] = x - mean


def pallas_series_decomp(x, ksize=25):
    """series_decomp: replicate-padded moving average (kernel=25) + residual."""
    B, T, D = x.shape
    half = (ksize - 1) // 2
    front = jnp.repeat(x[:, 0:1, :], half, axis=1)
    end = jnp.repeat(x[:, -1:, :], half, axis=1)
    xpad = jnp.concatenate([front, x, end], axis=1).astype(jnp.float32)
    res, mean = pl.pallas_call(
        functools.partial(_decomp_kernel, T=T, ksize=ksize),
        out_shape=(jax.ShapeDtypeStruct((B, T, D), jnp.float32),
                   jax.ShapeDtypeStruct((B, T, D), jnp.float32)),
    )(xpad)
    return res, mean


def _enc_stage1_kernel(xq_ref, xk_ref, xv_ref, mask_ref,
                       wq_ref, wk_ref, wv_ref, wo_ref,
                       bq_ref, bk_ref, bv_ref, bo_ref,
                       ln1g_ref, ln1b_ref, w1_ref, b1_ref,
                       h1_ref, z_ref, *, num_heads, scale):
    """QKV proj + block-diag masked MHA + out-proj + residual + LN1 + first FFN matmul."""
    xq = xq_ref[...]
    wq = wq_ref[...]
    wk = wk_ref[...]
    wv = wv_ref[...]
    wo = wo_ref[...]
    q = jnp.dot(xq, wq, preferred_element_type=jnp.float32) + bq_ref[...]
    k = jnp.dot(xk_ref[...], wk, preferred_element_type=jnp.float32) + bk_ref[...]
    v = jnp.dot(xv_ref[...], wv, preferred_element_type=jnp.float32) + bv_ref[...]
    mask = mask_ref[...]
    E = wq.shape[0]
    Dh = E // num_heads

    attn = jnp.zeros(xq.shape, jnp.float32)
    for h in range(num_heads):                  # static unroll over heads
        cs = slice(h * Dh, (h + 1) * Dh)
        qh = q[:, cs]
        kh = k[:, cs]
        vh = v[:, cs]
        # scores = qh @ kh.T  (contract last dims; block-diag mask keeps batches separate)
        s = jax.lax.dot_general(qh, kh, (((1,), (1,)), ((), ())),
                                preferred_element_type=jnp.float32) * scale + mask
        s = s - jnp.max(s, axis=-1, keepdims=True)
        p = jnp.exp(s)
        p = p / jnp.sum(p, axis=-1, keepdims=True)
        oh = jnp.dot(p, vh, preferred_element_type=jnp.float32)
        # out-proj accumulated per head (concat(heads) @ Wo == sum_h oh @ Wo[h-slice, :])
        attn = attn + jnp.dot(oh, wo[cs, :], preferred_element_type=jnp.float32)
    attn = attn + bo_ref[...]

    h1 = _ln(xq + attn, ln1g_ref[...], ln1b_ref[...])
    h1_ref[...] = h1
    z_ref[...] = jnp.dot(h1, w1_ref[...], preferred_element_type=jnp.float32) + b1_ref[...]


def _enc_stage2_kernel(h1_ref, a_ref, w2_ref, b2_ref, ln2g_ref, ln2b_ref, o_ref):
    """Second FFN matmul + residual + LN2."""
    ff = jnp.dot(a_ref[...], w2_ref[...], preferred_element_type=jnp.float32) + b2_ref[...]
    o_ref[...] = _ln(h1_ref[...] + ff, ln2g_ref[...], ln2b_ref[...])


# ----------------------------------------------------------------------------
# Host glue built on the Pallas kernels
# ----------------------------------------------------------------------------
def token_embedding(x, w_tok, pe, T):
    """TokenEmbedding: Conv1d(c_in -> d_model, k=3, circular pad, no bias) + pos. encoding.

    The positional encoding is fused into the matmul as its (B*T, d_model) bias operand.
    """
    B, _, C = x.shape
    xp = jnp.concatenate([x[:, -1:, :], x, x[:, :1, :]], axis=1)        # circular pad (time)
    cols = [xp[:, j:j + T, :] for j in range(3)]
    patches = jnp.stack(cols, axis=-1).reshape(B * T, C * 3)            # (c outer, tap inner)
    w2 = w_tok.reshape(w_tok.shape[0], C * 3).T                         # (C*3, d_model)
    pe_bias = jnp.tile(pe[:T], (B, 1)).astype(jnp.float32)
    out = pallas_matmul(patches, w2, pe_bias)
    return out.reshape(B, T, -1)


def positional_encoding(max_len, d_model):
    pe = np.zeros((max_len, d_model), dtype=np.float32)
    position = np.arange(max_len)[:, None].astype(np.float32)
    div_term = np.exp(np.arange(0, d_model, 2).astype(np.float32)
                      * -(np.log(10000.0) / d_model))
    pe[:, 0::2] = np.sin(position * div_term)
    pe[:, 1::2] = np.cos(position * div_term)
    return jnp.asarray(pe)


def _im2col_nhwc(x, k):
    B, H, W, C = x.shape
    p = (k - 1) // 2
    xp = jnp.pad(x, ((0, 0), (p, p), (p, p), (0, 0)))
    cols = [xp[:, i:i + H, j:j + W, :] for i in range(k) for j in range(k)]
    return jnp.stack(cols, axis=-1).reshape(B * H * W, C * k * k)


def _conv_stage_batched(xs, stage):
    """One 'same' conv over a LIST of NHWC tensors, batched into a single Pallas matmul."""
    k = stage['k']
    shapes = [x.shape for x in xs]
    patches = jnp.concatenate([_im2col_nhwc(x, k) for x in xs], axis=0)
    out = pallas_matmul(patches, stage['w'], stage['b'])
    res, off = [], 0
    for (B, H, W, _) in shapes:
        m = B * H * W
        res.append(out[off:off + m].reshape(B, H, W, -1))
        off += m
    return res


def run_conv_branch(xs, bp):
    """Inception_Block_V1 -> GELU -> Inception_Block_V1 (branches merged at init time)."""
    h = _conv_stage_batched(xs, bp['inc1'])
    h = [jax.nn.gelu(v, approximate=False) for v in h]
    return _conv_stage_batched(h, bp['inc2'])


def transformer_encoder_fused(xq, xk, xv, mask, p, cfg):
    """Post-LN cross-attention encoder (reconstruction); season+trend batched along rows.

    TODO(synk): original TransformerEncoder class not provided; this preserves the v1
                reconstruction (post-LN, cross-attention, GELU FFN).
    """
    M, E = xq.shape
    Hd = cfg['hidden_size']
    num_heads = cfg['num_heads']
    scale = 1.0 / float(np.sqrt(E // num_heads))

    def r1(v):
        return v.reshape(1, -1).astype(jnp.float32)

    x = xq
    for lp in p['layers']:
        h1, z = pl.pallas_call(
            functools.partial(_enc_stage1_kernel, num_heads=num_heads, scale=scale),
            out_shape=(jax.ShapeDtypeStruct((M, E), jnp.float32),
                       jax.ShapeDtypeStruct((M, Hd), jnp.float32)),
        )(x, xk, xv, mask,
          lp['Wq'].T.astype(jnp.float32), lp['Wk'].T.astype(jnp.float32),
          lp['Wv'].T.astype(jnp.float32), lp['Wo'].T.astype(jnp.float32),
          r1(lp['bq']), r1(lp['bk']), r1(lp['bv']), r1(lp['bo']),
          r1(lp['ln1_g']), r1(lp['ln1_b']),
          lp['W1'].T.astype(jnp.float32), r1(lp['b1']))
        a = jax.nn.gelu(z, approximate=False)      # exact erf-GELU kept on host
        x = pl.pallas_call(
            _enc_stage2_kernel,
            out_shape=jax.ShapeDtypeStruct((M, E), jnp.float32),
        )(h1, a, lp['W2'].T.astype(jnp.float32), r1(lp['b2']),
          r1(lp['ln2_g']), r1(lp['ln2_b']))
    return x


def times_block3(Season, Trend, params, cfg):
    B, T, N = Season.shape
    cutpos, cutnom, k = cfg['cutpos'], cfg['cutnom'], cfg['top_k']
    period_list = [cutpos + 1, cutpos + 5, cutpos + 15]

    # --- conv path: the three period views share conv weights, so their im2col patches
    #     are concatenated along M and run through ONE matmul per stage per branch.
    S_views, T_views = [], []
    for i in range(k):
        period = period_list[i]
        if T % period != 0:
            length = (T // period + 1) * period
            pad = jnp.zeros((B, length - T, N), jnp.float32)
            S = jnp.concatenate([Season, pad], axis=1)
            Tr = jnp.concatenate([Trend, pad], axis=1)
        else:
            length = T
            S, Tr = Season, Trend
        S_views.append(S.reshape(B, length // period, period, N))   # NHWC (C = d_model)
        T_views.append(Tr.reshape(B, length // period, period, N))

    S_convs = run_conv_branch(S_views, params['conv_s'])
    T_convs = run_conv_branch(T_views, params['conv_t'])
    season_res = [c.reshape(B, -1, N)[:, :T, :] for c in S_convs]
    trend_res = [c.reshape(B, -1, N)[:, :T, :] for c in T_convs]

    # period_weight = softmax(ones) -> uniform 1/k
    Season_res = sum(season_res) / float(k)
    Trend_res = sum(trend_res) / float(k)
    Season_out_res = Season_res + Season
    Trend_out_res = Trend_res + Trend

    # --- cut + cross encoders: both streams use params['enc_season'], so season and trend
    #     are batched (block-diagonal attention mask keeps the 16-token sequences separate).
    pc = period_list[cutnom]
    if T % pc != 0:
        length = (T // pc + 1) * pc
        pad = jnp.zeros((B, length - T, N), jnp.float32)
        Season_out = jnp.concatenate([Season_out_res, pad], axis=1)
        Trend_out = jnp.concatenate([Trend_out_res, pad], axis=1)
    else:
        length = T
        Season_out, Trend_out = Season_out_res, Trend_out_res

    S_len = pc * N                 # encoder sequence length
    E = length // pc               # encoder feature dim (== configs.input_size3)
    S2 = Season_out.reshape(B, length // pc, pc * N).transpose(0, 2, 1).reshape(B * S_len, E)
    T2 = Trend_out.reshape(B, length // pc, pc * N).transpose(0, 2, 1).reshape(B * S_len, E)

    xq = jnp.concatenate([S2, T2], axis=0)     # queries:  [season; trend]
    xk = jnp.concatenate([T2, S2], axis=0)     # keys:     [trend;  season]
    xv = xq                                    # values == queries (matches reference call)
    rows = 2 * B * S_len
    blk = jnp.arange(rows) // S_len
    mask = jnp.where(blk[:, None] == blk[None, :], 0.0, -1e30).astype(jnp.float32)

    enc = transformer_encoder_fused(xq, xk, xv, mask, params['enc_season'], cfg)
    enc3 = (enc.reshape(2 * B, S_len, E).transpose(0, 2, 1)
            .reshape(2 * B, -1, N)[:, :T, :])
    return enc3[:B], enc3[B:]


def model_forward(x_enc, x_mark_enc, params, cfg):
    """Model.forward for task_name == 'classification' (eval mode, dropout = identity)."""
    B, T, _ = x_enc.shape
    d_model = cfg['d_model']

    # DataEmbedding(x_enc, None): token conv embedding (+ positional encoding fused as bias)
    enc_out = token_embedding(x_enc, params['token_w'], params['pe'], T)
    # series_decomp(25)
    seasonal_init, trend_init = pallas_series_decomp(enc_out, ksize=25)
    # only TimesBlock3 affects the output (reference layer loop is not chained)
    season_out, trend_out = times_block3(seasonal_init, trend_init, params, cfg)

    # final LayerNorm on both streams in ONE pallas call; exact GELU + mask on host
    st = jnp.concatenate([season_out, trend_out], axis=0).reshape(2 * B * T, d_model)
    st = pallas_layernorm(st, params['ln_g'], params['ln_b'])
    act = jax.nn.gelu(st, approximate=False).reshape(2, B, T, d_model)
    output = (act[0] + act[1]) * x_mark_enc[:, :, None]
    output = output.reshape(B, T * d_model)
    logits = pallas_matmul(output, params['proj_W'].T, params['proj_b'])
    return logits


# ----------------------------------------------------------------------------
# Deterministic parameter init (inception branches merged algebraically)
# ----------------------------------------------------------------------------
def _merge_inception(branches):
    """mean over parallel 'same' convs == ONE conv with the averaged, center-padded kernel."""
    nk = len(branches)
    cout, cin = branches[0][0].shape[0], branches[0][0].shape[1]
    kmax = max(w.shape[-1] for (w, _) in branches)
    wm = jnp.zeros((cout, cin, kmax, kmax), jnp.float32)
    bm = jnp.zeros((cout,), jnp.float32)
    for (w, b) in branches:
        ks = w.shape[-1]
        off = (kmax - ks) // 2
        wm = wm.at[:, :, off:off + ks, off:off + ks].add(w)
        bm = bm + b
    wm = wm / float(nk)
    bm = bm / float(nk)
    # im2col (NHWC) weight layout: row index = c*kmax*kmax + i*kmax + j
    w2 = wm.transpose(1, 2, 3, 0).reshape(cin * kmax * kmax, cout)
    return dict(w=w2, b=bm, k=kmax)


def init_params(key, cfg):
    d_model, d_ff = cfg['d_model'], cfg['d_ff']
    enc_in, nk = cfg['enc_in'], cfg['num_kernels']
    E, Hd = cfg['input_size3'], cfg['hidden_size']
    keys = iter(jax.random.split(key, 128))

    def w(shape, scale=0.02):
        return scale * jax.random.normal(next(keys), shape, jnp.float32)

    def inception(cin, cout):
        return [(w((cout, cin, 2 * i + 1, 2 * i + 1)), jnp.zeros((cout,), jnp.float32))
                for i in range(nk)]

    def enc_layer():
        return dict(
            Wq=w((E, E)), bq=jnp.zeros((E,), jnp.float32),
            Wk=w((E, E)), bk=jnp.zeros((E,), jnp.float32),
            Wv=w((E, E)), bv=jnp.zeros((E,), jnp.float32),
            Wo=w((E, E)), bo=jnp.zeros((E,), jnp.float32),
            ln1_g=jnp.ones((E,), jnp.float32), ln1_b=jnp.zeros((E,), jnp.float32),
            W1=w((Hd, E)), b1=jnp.zeros((Hd,), jnp.float32),
            W2=w((E, Hd)), b2=jnp.zeros((E,), jnp.float32),
            ln2_g=jnp.ones((E,), jnp.float32), ln2_b=jnp.zeros((E,), jnp.float32),
        )

    return dict(
        token_w=w((d_model, enc_in, 3)),
        pe=positional_encoding(cfg['seq_len'], d_model),
        conv_s=dict(inc1=_merge_inception(inception(d_model, d_ff)),
                    inc2=_merge_inception(inception(d_ff, d_model))),
        conv_t=dict(inc1=_merge_inception(inception(d_model, d_ff)),
                    inc2=_merge_inception(inception(d_ff, d_model))),
        enc_season=dict(layers=[enc_layer() for _ in range(cfg['num_layers'])]),
        ln_g=jnp.ones((d_model,), jnp.float32),
        ln_b=jnp.zeros((d_model,), jnp.float32),
        proj_W=w((cfg['num_class'], d_model * cfg['seq_len'])),
        proj_b=jnp.zeros((cfg['num_class'],), jnp.float32),
    )


# ----------------------------------------------------------------------------
# Main
# ----------------------------------------------------------------------------
if __name__ == "__main__":
    cfg = dict(
        seq_len=16, pred_len=0, enc_in=4, d_model=8, d_ff=8,
        num_kernels=2, top_k=3, cutpos=1, cutnom=0, e_layers=3,
        num_class=3, num_heads=2, hidden_size=16, num_layers=1,
    )
    cfg['input_size3'] = cfg['seq_len'] // (cfg['cutpos'] + 1)   # = 8

    key = jax.random.PRNGKey(0)
    k_x, k_p = jax.random.split(key)
    x_enc = jax.random.normal(k_x, (2, cfg['seq_len'], cfg['enc_in']), jnp.float32)
    x_mark_enc = jnp.ones((2, cfg['seq_len']), jnp.float32)      # classification padding mask

    params = init_params(k_p, cfg)

    fwd = jax.jit(lambda xe, xm: model_forward(xe, xm, params, cfg))
    out = fwd(x_enc, x_mark_enc)
    jax.block_until_ready(out)
    assert out.shape == (2, cfg['num_class'])
    print("KERNEL_OK")
</pallas_src>

<mosaic_0001>
module attributes {stable_mosaic.version = 11 : i64} {
  func.func @_matmul_bias_kernel(%arg0: memref<32x12xf32, #tpu.memory_space<vmem>>, %arg1: memref<12x8xf32, #tpu.memory_space<vmem>>, %arg2: memref<32x8xf32, #tpu.memory_space<vmem>>, %arg3: memref<32x8xf32, #tpu.memory_space<vmem>>) attributes {dimension_semantics = [], scalar_prefetch = 0 : i64, scratch_operands = 0 : i64, tpu.core_type = #tpu.core_type<tc>} {
    %c0 = arith.constant 0 : index
    %c0_0 = arith.constant 0 : index
    %0 = vector.load %arg0[%c0, %c0_0] : memref<32x12xf32, #tpu.memory_space<vmem>>, vector<32x12xf32>
    %c0_1 = arith.constant 0 : index
    %c0_2 = arith.constant 0 : index
    %1 = vector.load %arg1[%c0_1, %c0_2] : memref<12x8xf32, #tpu.memory_space<vmem>>, vector<12x8xf32>
    %cst = arith.constant dense<0.000000e+00> : vector<32x8xf32>
    %2 = tpu.matmul %0, %1, %cst {dimension_numbers = #tpu.dot_dimension_numbers<[1], [0], [0], [1], [0, 0, 1, 1], [], []>} : vector<32x12xf32>, vector<12x8xf32>, vector<32x8xf32> -> vector<32x8xf32>
    %c0_3 = arith.constant 0 : index
    %c0_4 = arith.constant 0 : index
    %3 = vector.load %arg2[%c0_3, %c0_4] : memref<32x8xf32, #tpu.memory_space<vmem>>, vector<32x8xf32>
    %4 = arith.addf %2, %3 : vector<32x8xf32>
    %c0_5 = arith.constant 0 : index
    %c0_6 = arith.constant 0 : index
    %5 = vector.load %arg3[%c0_5, %c0_6] : memref<32x8xf32, #tpu.memory_space<vmem>>, vector<32x8xf32>
    tpu.vector_store %arg3[%c0_5, %c0_6], %4 {strides = array<i32>} : memref<32x8xf32, #tpu.memory_space<vmem>>, vector<32x8xf32>,
    return
  }
}

module attributes {stable_mosaic.version = 11 : i64} {
  func.func @_decomp_kernel(%arg0: memref<2x40x8xf32, #tpu.memory_space<vmem>>, %arg1: memref<2x16x8xf32, #tpu.memory_space<vmem>>, %arg2: memref<2x16x8xf32, #tpu.memory_space<vmem>>) attributes {dimension_semantics = [], scalar_prefetch = 0 : i64, scratch_operands = 0 : i64, tpu.core_type = #tpu.core_type<tc>} {
    %cst = arith.constant 0.000000e+00 : f32
    %0 = vector.broadcast %cst : f32 to vector<2x16x8xf32>
    %c0 = arith.constant 0 : index
    %c0_0 = arith.constant 0 : index
    %c0_1 = arith.constant 0 : index
    %1 = vector.load %arg0[%c0, %c0_0, %c0_1] : memref<2x40x8xf32, #tpu.memory_space<vmem>>, vector<2x16x8xf32>
    %2 = arith.addf %0, %1 : vector<2x16x8xf32>
    %c0_2 = arith.constant 0 : index
    %c1 = arith.constant 1 : index
    %c0_3 = arith.constant 0 : index
    %3 = vector.load %arg0[%c0_2, %c1, %c0_3] : memref<2x40x8xf32, #tpu.memory_space<vmem>>, vector<2x16x8xf32>
    %4 = arith.addf %2, %3 : vector<2x16x8xf32>
    %c0_4 = arith.constant 0 : index
    %c2 = arith.constant 2 : index
    %c0_5 = arith.constant 0 : index
    %5 = vector.load %arg0[%c0_4, %c2, %c0_5] : memref<2x40x8xf32, #tpu.memory_space<vmem>>, vector<2x16x8xf32>
    %6 = arith.addf %4, %5 : vector<2x16x8xf32>
    %c0_6 = arith.constant 0 : index
    %c3 = arith.constant 3 : index
    %c0_7 = arith.constant 0 : index
    %7 = vector.load %arg0[%c0_6, %c3, %c0_7] : memref<2x40x8xf32, #tpu.memory_space<vmem>>, vector<2x16x8xf32>
    %8 = arith.addf %6, %7 : vector<2x16x8xf32>
    %c0_8 = arith.constant 0 : index
    %c4 = arith.constant 4 : index
    %c0_9 = arith.constant 0 : index
    %9 = vector.load %arg0[%c0_8, %c4, %c0_9] : memref<2x40x8xf32, #tpu.memory_space<vmem>>, vector<2x16x8xf32>
    %10 = arith.addf %8, %9 : vector<2x16x8xf32>
    %c0_10 = arith.constant 0 : index
    %c5 = arith.constant 5 : index
    %c0_11 = arith.constant 0 : index
    %11 = vector.load %arg0[%c0_10, %c5, %c0_11] : memref<2x40x8xf32, #tpu.memory_space<vmem>>, vector<2x16x8xf32>
    %12 = arith.addf %10, %11 : vector<2x16x8xf32>
    %c0_12 = arith.constant 0 : index
    %c6 = arith.constant 6 : index
    %c0_13 = arith.constant 0 : index
    %13 = vector.load %arg0[%c0_12, %c6, %c0_13] : memref<2x40x8xf32, #tpu.memory_space<vmem>>, vector<2x16x8xf32>
    %14 = arith.addf %12, %13 : vector<2x16x8xf32>
    %c0_14 = arith.constant 0 : index
    %c7 = arith.constant 7 : index
    %c0_15 = arith.constant 0 : index
    %15 = vector.load %arg0[%c0_14, %c7, %c0_15] : memref<2x40x8xf32, #tpu.memory_space<vmem>>, vector<2x16x8xf32>
    %16 = arith.addf %14, %15 : vector<2x16x8xf32>
    %c0_16 = arith.constant 0 : index
    %c8 = arith.constant 8 : index
    %c0_17 = arith.constant 0 : index
    %17 = vector.load %arg0[%c0_16, %c8, %c0_17] : memref<2x40x8xf32, #tpu.memory_space<vmem>>, vector<2x16x8xf32>
    %18 = arith.addf %16, %17 : vector<2x16x8xf32>
    %c0_18 = arith.constant 0 : index
    %c9 = arith.constant 9 : index
    %c0_19 = arith.constant 0 : index
    %19 = vector.load %arg0[%c0_18, %c9, %c0_19] : memref<2x40x8xf32, #tpu.memory_space<vmem>>, vector<2x16x8xf32>
    %20 = arith.addf %18, %19 : vector<2x16x8xf32>
    %c0_20 = arith.constant 0 : index
    %c10 = arith.constant 10 : index
    %c0_21 = arith.constant 0 : index
    %21 = vector.load %arg0[%c0_20, %c10, %c0_21] : memref<2x40x8xf32, #tpu.memory_space<vmem>>, vector<2x16x8xf32>
    %22 = arith.addf %20, %21 : vector<2x16x8xf32>
    %c0_22 = arith.constant 0 : index
    %c11 = arith.constant 11 : index
    %c0_23 = arith.constant 0 : index
    %23 = vector.load %arg0[%c0_22, %c11, %c0_23] : memref<2x40x8xf32, #tpu.memory_space<vmem>>, vector<2x16x8xf32>
    %24 = arith.addf %22, %23 : vector<2x16x8xf32>
    %c0_24 = arith.constant 0 : index
    %c12 = arith.constant 12 : index
    %c0_25 = arith.constant 0 : index
    %25 = vector.load %arg0[%c0_24, %c12, %c0_25] : memref<2x40x8xf32, #tpu.memory_space<vmem>>, vector<2x16x8xf32>
    %26 = arith.addf %24, %25 : vector<2x16x8xf32>
    %c0_26 = arith.constant 0 : index
    %c13 = arith.constant 13 : index
    %c0_27 = arith.constant 0 : index
    %27 = vector.load %arg0[%c0_26, %c13, %c0_27] : memref<2x40x8xf32, #tpu.memory_space<vmem>>, vector<2x16x8xf32>
    %28 = arith.addf %26, %27 : vector<2x16x8xf32>
    %c0_28 = arith.constant 0 : index
    %c14 = arith.constant 14 : index
    %c0_29 = arith.constant 0 : index
    %29 = vector.load %arg0[%c0_28, %c14, %c0_29] : memref<2x40x8xf32, #tpu.memory_space<vmem>>, vector<2x16x8xf32>
    %30 = arith.addf %28, %29 : vector<2x16x8xf32>
    %c0_30 = arith.constant 0 : index
    %c15 = arith.constant 15 : index
    %c0_31 = arith.constant 0 : index
    %31 = vector.load %arg0[%c0_30, %c15, %c0_31] : memref<2x40x8xf32, #tpu.memory_space<vmem>>, vector<2x16x8xf32>
    %32 = arith.addf %30, %31 : vector<2x16x8xf32>
    %c0_32 = arith.constant 0 : index
    %c16 = arith.constant 16 : index
    %c0_33 = arith.constant 0 : index
    %33 = vector.load %arg0[%c0_32, %c16, %c0_33] : memref<2x40x8xf32, #tpu.memory_space<vmem>>, vector<2x16x8xf32>
    %34 = arith.addf %32, %33 : vector<2x16x8xf32>
    %c0_34 = arith.constant 0 : index
    %c17 = arith.constant 17 : index
    %c0_35 = arith.constant 0 : index
    %35 = vector.load %arg0[%c0_34, %c17, %c0_35] : memref<2x40x8xf32, #tpu.memory_space<vmem>>, vector<2x16x8xf32>
    %36 = arith.addf %34, %35 : vector<2x16x8xf32>
    %c0_36 = arith.constant 0 : index
    %c18 = arith.constant 18 : index
    %c0_37 = arith.constant 0 : index
    %37 = vector.load %arg0[%c0_36, %c18, %c0_37] : memref<2x40x8xf32, #tpu.memory_space<vmem>>, vector<2x16x8xf32>
    %38 = arith.addf %36, %37 : vector<2x16x8xf32>
    %c0_38 = arith.constant 0 : index
    %c19 = arith.constant 19 : index
    %c0_39 = arith.constant 0 : index
    %39 = vector.load %arg0[%c0_38, %c19, %c0_39] : memref<2x40x8xf32, #tpu.memory_space<vmem>>, vector<2x16x8xf32>
    %40 = arith.addf %38, %39 : vector<2x16x8xf32>
    %c0_40 = arith.constant 0 : index
    %c20 = arith.constant 20 : index
    %c0_41 = arith.constant 0 : index
    %41 = vector.load %arg0[%c0_40, %c20, %c0_41] : memref<2x40x8xf32, #tpu.memory_space<vmem>>, vector<2x16x8xf32>
    %42 = arith.addf %40, %41 : vector<2x16x8xf32>
    %c0_42 = arith.constant 0 : index
    %c21 = arith.constant 21 : index
    %c0_43 = arith.constant 0 : index
    %43 = vector.load %arg0[%c0_42, %c21, %c0_43] : memref<2x40x8xf32, #tpu.memory_space<vmem>>, vector<2x16x8xf32>
    %44 = arith.addf %42, %43 : vector<2x16x8xf32>
    %c0_44 = arith.constant 0 : index
    %c22 = arith.constant 22 : index
    %c0_45 = arith.constant 0 : index
    %45 = vector.load %arg0[%c0_44, %c22, %c0_45] : memref<2x40x8xf32, #tpu.memory_space<vmem>>, vector<2x16x8xf32>
    %46 = arith.addf %44, %45 : vector<2x16x8xf32>
    %c0_46 = arith.constant 0 : index
    %c23 = arith.constant 23 : index
    %c0_47 = arith.constant 0 : index
    %47 = vector.load %arg0[%c0_46, %c23, %c0_47] : memref<2x40x8xf32, #tpu.memory_space<vmem>>, vector<2x16x8xf32>
    %48 = arith.addf %46, %47 : vector<2x16x8xf32>
    %c0_48 = arith.constant 0 : index
    %c24 = arith.constant 24 : index
    %c0_49 = arith.constant 0 : index
    %49 = vector.load %arg0[%c0_48, %c24, %c0_49] : memref<2x40x8xf32, #tpu.memory_space<vmem>>, vector<2x16x8xf32>
    %50 = arith.addf %48, %49 : vector<2x16x8xf32>
    %cst_50 = arith.constant 4.000000e-02 : f32
    %51 = vector.broadcast %cst_50 : f32 to vector<2x16x8xf32>
    %52 = arith.mulf %50, %51 : vector<2x16x8xf32>
    %c0_51 = arith.constant 0 : index
    %c12_52 = arith.constant 12 : index
    %c0_53 = arith.constant 0 : index
    %53 = vector.load %arg0[%c0_51, %c12_52, %c0_53] : memref<2x40x8xf32, #tpu.memory_space<vmem>>, vector<2x16x8xf32>
    %c0_54 = arith.constant 0 : index
    %c0_55 = arith.constant 0 : index
    %c0_56 = arith.constant 0 : index
    %54 = vector.load %arg2[%c0_54, %c0_55, %c0_56] : memref<2x16x8xf32, #tpu.memory_space<vmem>>, vector<2x16x8xf32>
    tpu.vector_store %arg2[%c0_54, %c0_55, %c0_56], %52 {strides = array<i32>} : memref<2x16x8xf32, #tpu.memory_space<vmem>>, vector<2x16x8xf32>,
    %55 = arith.subf %53, %52 : vector<2x16x8xf32>
    %c0_57 = arith.constant 0 : index
    %c0_58 = arith.constant 0 : index
    %c0_59 = arith.constant 0 : index
    %56 = vector.load %arg1[%c0_57, %c0_58, %c0_59] : memref<2x16x8xf32, #tpu.memory_space<vmem>>, vector<2x16x8xf32>
    tpu.vector_store %arg1[%c0_57, %c0_58, %c0_59], %55 {strides = array<i32>} : memref<2x16x8xf32, #tpu.memory_space<vmem>>, vector<2x16x8xf32>,
    return
  }
}

module attributes {stable_mosaic.version = 11 : i64} {
  func.func @_matmul_bias_kernel(%arg0: memref<100x72xf32, #tpu.memory_space<vmem>>, %arg1: memref<72x8xf32, #tpu.memory_space<vmem>>, %arg2: memref<1x8xf32, #tpu.memory_space<vmem>>, %arg3: memref<100x8xf32, #tpu.memory_space<vmem>>) attributes {dimension_semantics = [], scalar_prefetch = 0 : i64, scratch_operands = 0 : i64, tpu.core_type = #tpu.core_type<tc>} {
    %c0 = arith.constant 0 : index
    %c0_0 = arith.constant 0 : index
    %0 = vector.load %arg0[%c0, %c0_0] : memref<100x72xf32, #tpu.memory_space<vmem>>, vector<100x72xf32>
    %c0_1 = arith.constant 0 : index
    %c0_2 = arith.constant 0 : index
    %1 = vector.load %arg1[%c0_1, %c0_2] : memref<72x8xf32, #tpu.memory_space<vmem>>, vector<72x8xf32>
    %cst = arith.constant dense<0.000000e+00> : vector<100x8xf32>
    %2 = tpu.matmul %0, %1, %cst {dimension_numbers = #tpu.dot_dimension_numbers<[1], [0], [0], [1], [0, 0, 1, 1], [], []>} : vector<100x72xf32>, vector<72x8xf32>, vector<100x8xf32> -> vector<100x8xf32>
    %c0_3 = arith.constant 0 : index
    %c0_4 = arith.constant 0 : index
    %3 = vector.load %arg2[%c0_3, %c0_4] : memref<1x8xf32, #tpu.memory_space<vmem>>, vector<1x8xf32>
    %4 = vector.broadcast %3 : vector<1x8xf32> to vector<100x8xf32>
    %5 = arith.addf %2, %4 : vector<100x8xf32>
    %c0_5 = arith.constant 0 : index
    %c0_6 = arith.constant 0 : index
    %6 = vector.load %arg3[%c0_5, %c0_6] : memref<100x8xf32, #tpu.memory_space<vmem>>, vector<100x8xf32>
    tpu.vector_store %arg3[%c0_5, %c0_6], %5 {strides = array<i32>} : memref<100x8xf32, #tpu.memory_space<vmem>>, vector<100x8xf32>,
    return
  }
}

module attributes {stable_mosaic.version = 11 : i64} {
  func.func @_enc_stage1_kernel(%arg0: memref<64x8xf32, #tpu.memory_space<vmem>>, %arg1: memref<64x8xf32, #tpu.memory_space<vmem>>, %arg2: memref<64x8xf32, #tpu.memory_space<vmem>>, %arg3: memref<64x64xf32, #tpu.memory_space<vmem>>, %arg4: memref<8x8xf32, #tpu.memory_space<vmem>>, %arg5: memref<8x8xf32, #tpu.memory_space<vmem>>, %arg6: memref<8x8xf32, #tpu.memory_space<vmem>>, %arg7: memref<8x8xf32, #tpu.memory_space<vmem>>, %arg8: memref<1x8xf32, #tpu.memory_space<vmem>>, %arg9: memref<1x8xf32, #tpu.memory_space<vmem>>, %arg10: memref<1x8xf32, #tpu.memory_space<vmem>>, %arg11: memref<1x8xf32, #tpu.memory_space<vmem>>, %arg12: memref<1x8xf32, #tpu.memory_space<vmem>>, %arg13: memref<1x8xf32, #tpu.memory_space<vmem>>, %arg14: memref<8x16xf32, #tpu.memory_space<vmem>>, %arg15: memref<1x16xf32, #tpu.memory_space<vmem>>, %arg16: memref<64x8xf32, #tpu.memory_space<vmem>>, %arg17: memref<64x16xf32, #tpu.memory_space<vmem>>) attributes {dimension_semantics = [], scalar_prefetch = 0 : i64, scratch_operands = 0 : i64, tpu.core_type = #tpu.core_type<tc>} {
    %c0 = arith.constant 0 : index
    %c0_0 = arith.constant 0 : index
    %0 = vector.load %arg0[%c0, %c0_0] : memref<64x8xf32, #tpu.memory_space<vmem>>, vector<64x8xf32>
    %c0_1 = arith.constant 0 : index
    %c0_2 = arith.constant 0 : index
    %1 = vector.load %arg4[%c0_1, %c0_2] : memref<8x8xf32, #tpu.memory_space<vmem>>, vector<8x8xf32>
    %c0_3 = arith.constant 0 : index
    %c0_4 = arith.constant 0 : index
    %2 = vector.load %arg5[%c0_3, %c0_4] : memref<8x8xf32, #tpu.memory_space<vmem>>, vector<8x8xf32>
    %c0_5 = arith.constant 0 : index
    %c0_6 = arith.constant 0 : index
    %3 = vector.load %arg6[%c0_5, %c0_6] : memref<8x8xf32, #tpu.memory_space<vmem>>, vector<8x8xf32>
    %c0_7 = arith.constant 0 : index
    %c0_8 = arith.constant 0 : index
    %4 = vector.load %arg7[%c0_7, %c0_8] : memref<8x8xf32, #tpu.memory_space<vmem>>, vector<8x8xf32>
    %cst = arith.constant dense<0.000000e+00> : vector<64x8xf32>
    %5 = tpu.matmul %0, %1, %cst {dimension_numbers = #tpu.dot_dimension_numbers<[1], [0], [0], [1], [0, 0, 1, 1], [], []>} : vector<64x8xf32>, vector<8x8xf32>, vector<64x8xf32> -> vector<64x8xf32>
    %c0_9 = arith.constant 0 : index
    %c0_10 = arith.constant 0 : index
    %6 = vector.load %arg8[%c0_9, %c0_10] : memref<1x8xf32, #tpu.memory_space<vmem>>, vector<1x8xf32>
    %7 = vector.broadcast %6 : vector<1x8xf32> to vector<64x8xf32>
    %8 = arith.addf %5, %7 : vector<64x8xf32>
    %c0_11 = arith.constant 0 : index
    %c0_12 = arith.constant 0 : index
    %9 = vector.load %arg1[%c0_11, %c0_12] : memref<64x8xf32, #tpu.memory_space<vmem>>, vector<64x8xf32>
    %cst_13 = arith.constant dense<0.000000e+00> : vector<64x8xf32>
    %10 = tpu.matmul %9, %2, %cst_13 {dimension_numbers = #tpu.dot_dimension_numbers<[1], [0], [0], [1], [0, 0, 1, 1], [], []>} : vector<64x8xf32>, vector<8x8xf32>, vector<64x8xf32> -> vector<64x8xf32>
    %c0_14 = arith.constant 0 : index
    %c0_15 = arith.constant 0 : index
    %11 = vector.load %arg9[%c0_14, %c0_15] : memref<1x8xf32, #tpu.memory_space<vmem>>, vector<1x8xf32>
    %12 = vector.broadcast %11 : vector<1x8xf32> to vector<64x8xf32>
    %13 = arith.addf %10, %12 : vector<64x8xf32>
    %c0_16 = arith.constant 0 : index
    %c0_17 = arith.constant 0 : index
    %14 = vector.load %arg2[%c0_16, %c0_17] : memref<64x8xf32, #tpu.memory_space<vmem>>, vector<64x8xf32>
    %cst_18 = arith.constant dense<0.000000e+00> : vector<64x8xf32>
    %15 = tpu.matmul %14, %3, %cst_18 {dimension_numbers = #tpu.dot_dimension_numbers<[1], [0], [0], [1], [0, 0, 1, 1], [], []>} : vector<64x8xf32>, vector<8x8xf32>, vector<64x8xf32> -> vector<64x8xf32>
    %c0_19 = arith.constant 0 : index
    %c0_20 = arith.constant 0 : index
    %16 = vector.load %arg10[%c0_19, %c0_20] : memref<1x8xf32, #tpu.memory_space<vmem>>, vector<1x8xf32>
    %17 = vector.broadcast %16 : vector<1x8xf32> to vector<64x8xf32>
    %18 = arith.addf %15, %17 : vector<64x8xf32>
    %c0_21 = arith.constant 0 : index
    %c0_22 = arith.constant 0 : index
    %19 = vector.load %arg3[%c0_21, %c0_22] : memref<64x64xf32, #tpu.memory_space<vmem>>, vector<64x64xf32>
    %cst_23 = arith.constant 0.000000e+00 : f32
    %20 = vector.broadcast %cst_23 : f32 to vector<64x8xf32>
    %21 = vector.extract_strided_slice %8 {offsets = [0, 0], sizes = [64, 4], strides = [1, 1]} : vector<64x8xf32> to vector<64x4xf32>
    %22 = vector.extract_strided_slice %13 {offsets = [0, 0], sizes = [64, 4], strides = [1, 1]} : vector<64x8xf32> to vector<64x4xf32>
    %23 = vector.extract_strided_slice %18 {offsets = [0, 0], sizes = [64, 4], strides = [1, 1]} : vector<64x8xf32> to vector<64x4xf32>
    %cst_24 = arith.constant dense<0.000000e+00> : vector<64x64xf32>
    %24 = tpu.matmul %21, %22, %cst_24 {dimension_numbers = #tpu.dot_dimension_numbers<[1], [1], [0], [0], [0, 0, 1, 0], [], []>} : vector<64x4xf32>, vector<64x4xf32>, vector<64x64xf32> -> vector<64x64xf32>
    %cst_25 = arith.constant 5.000000e-01 : f32
    %25 = vector.broadcast %cst_25 : f32 to vector<64x64xf32>
    %26 = arith.mulf %24, %25 : vector<64x64xf32>
    %27 = arith.addf %26, %19 : vector<64x64xf32>
    %cst_26 = arith.constant dense<0xFF800000> : vector<64xf32>
    %28 = vector.multi_reduction <maximumf>, %27, %cst_26 [1] : vector<64x64xf32> to vector<64xf32>
    %29 = vector.shape_cast %28 : vector<64xf32> to vector<64x1xf32>
    %30 = vector.broadcast %29 : vector<64x1xf32> to vector<64x64xf32>
    %31 = arith.subf %27, %30 : vector<64x64xf32>
    %32 = math.exp %31 : vector<64x64xf32>
    %cst_27 = arith.constant dense<0.000000e+00> : vector<64xf32>
    %33 = vector.multi_reduction <add>, %32, %cst_27 [1] : vector<64x64xf32> to vector<64xf32>
    %34 = vector.shape_cast %33 : vector<64xf32> to vector<64x1xf32>
    %35 = vector.broadcast %34 : vector<64x1xf32> to vector<64x64xf32>
    %36 = arith.divf %32, %35 : vector<64x64xf32>
    %cst_28 = arith.constant dense<0.000000e+00> : vector<64x4xf32>
    %37 = tpu.matmul %36, %23, %cst_28 {dimension_numbers = #tpu.dot_dimension_numbers<[1], [0], [0], [1], [0, 0, 1, 1], [], []>} : vector<64x64xf32>, vector<64x4xf32>, vector<64x4xf32> -> vector<64x4xf32>
    %38 = vector.extract_strided_slice %4 {offsets = [0, 0], sizes = [4, 8], strides = [1, 1]} : vector<8x8xf32> to vector<4x8xf32>
    %cst_29 = arith.constant dense<0.000000e+00> : vector<64x8xf32>
    %39 = tpu.matmul %37, %38, %cst_29 {dimension_numbers = #tpu.dot_dimension_numbers<[1], [0], [0], [1], [0, 0, 1, 1], [], []>} : vector<64x4xf32>, vector<4x8xf32>, vector<64x8xf32> -> vector<64x8xf32>
    %40 = arith.addf %20, %39 : vector<64x8xf32>
    %41 = vector.extract_strided_slice %8 {offsets = [0, 4], sizes = [64, 4], strides = [1, 1]} : vector<64x8xf32> to vector<64x4xf32>
    %42 = vector.extract_strided_slice %13 {offsets = [0, 4], sizes = [64, 4], strides = [1, 1]} : vector<64x8xf32> to vector<64x4xf32>
    %43 = vector.extract_strided_slice %18 {offsets = [0, 4], sizes = [64, 4], strides = [1, 1]} : vector<64x8xf32> to vector<64x4xf32>
    %cst_30 = arith.constant dense<0.000000e+00> : vector<64x64xf32>
    %44 = tpu.matmul %41, %42, %cst_30 {dimension_numbers = #tpu.dot_dimension_numbers<[1], [1], [0], [0], [0, 0, 1, 0], [], []>} : vector<64x4xf32>, vector<64x4xf32>, vector<64x64xf32> -> vector<64x64xf32>
    %cst_31 = arith.constant 5.000000e-01 : f32
    %45 = vector.broadcast %cst_31 : f32 to vector<64x64xf32>
    %46 = arith.mulf %44, %45 : vector<64x64xf32>
    %47 = arith.addf %46, %19 : vector<64x64xf32>
    %cst_32 = arith.constant dense<0xFF800000> : vector<64xf32>
    %48 = vector.multi_reduction <maximumf>, %47, %cst_32 [1] : vector<64x64xf32> to vector<64xf32>
    %49 = vector.shape_cast %48 : vector<64xf32> to vector<64x1xf32>
    %50 = vector.broadcast %49 : vector<64x1xf32> to vector<64x64xf32>
    %51 = arith.subf %47, %50 : vector<64x64xf32>
    %52 = math.exp %51 : vector<64x64xf32>
    %cst_33 = arith.constant dense<0.000000e+00> : vector<64xf32>
    %53 = vector.multi_reduction <add>, %52, %cst_33 [1] : vector<64x64xf32> to vector<64xf32>
    %54 = vector.shape_cast %53 : vector<64xf32> to vector<64x1xf32>
    %55 = vector.broadcast %54 : vector<64x1xf32> to vector<64x64xf32>
    %56 = arith.divf %52, %55 : vector<64x64xf32>
    %cst_34 = arith.constant dense<0.000000e+00> : vector<64x4xf32>
    %57 = tpu.matmul %56, %43, %cst_34 {dimension_numbers = #tpu.dot_dimension_numbers<[1], [0], [0], [1], [0, 0, 1, 1], [], []>} : vector<64x64xf32>, vector<64x4xf32>, vector<64x4xf32> -> vector<64x4xf32>
    %58 = vector.extract_strided_slice %4 {offsets = [4, 0], sizes = [4, 8], strides = [1, 1]} : vector<8x8xf32> to vector<4x8xf32>
    %cst_35 = arith.constant dense<0.000000e+00> : vector<64x8xf32>
    %59 = tpu.matmul %57, %58, %cst_35 {dimension_numbers = #tpu.dot_dimension_numbers<[1], [0], [0], [1], [0, 0, 1, 1], [], []>} : vector<64x4xf32>, vector<4x8xf32>, vector<64x8xf32> -> vector<64x8xf32>
    %60 = arith.addf %40, %59 : vector<64x8xf32>
    %c0_36 = arith.constant 0 : index
    %c0_37 = arith.constant 0 : index
    %61 = vector.load %arg11[%c0_36, %c0_37] : memref<1x8xf32, #tpu.memory_space<vmem>>, vector<1x8xf32>
    %62 = vector.broadcast %61 : vector<1x8xf32> to vector<64x8xf32>
    %63 = arith.addf %60, %62 : vector<64x8xf32>
    %64 = arith.addf %0, %63 : vector<64x8xf32>
    %c0_38 = arith.constant 0 : index
    %c0_39 = arith.constant 0 : index
    %65 = vector.load %arg12[%c0_38, %c0_39] : memref<1x8xf32, #tpu.memory_space<vmem>>, vector<1x8xf32>
    %c0_40 = arith.constant 0 : index
    %c0_41 = arith.constant 0 : index
    %66 = vector.load %arg13[%c0_40, %c0_41] : memref<1x8xf32, #tpu.memory_space<vmem>>, vector<1x8xf32>
    %cst_42 = arith.constant dense<0.000000e+00> : vector<64xf32>
    %67 = vector.multi_reduction <add>, %64, %cst_42 [1] : vector<64x8xf32> to vector<64xf32>
    %68 = vector.shape_cast %67 : vector<64xf32> to vector<64x1xf32>
    %cst_43 = arith.constant 8.000000e+00 : f32
    %69 = vector.broadcast %cst_43 : f32 to vector<64x1xf32>
    %70 = arith.divf %68, %69 : vector<64x1xf32>
    %71 = vector.broadcast %70 : vector<64x1xf32> to vector<64x8xf32>
    %72 = arith.subf %64, %71 : vector<64x8xf32>
    %73 = arith.mulf %72, %72 : vector<64x8xf32>
    %cst_44 = arith.constant dense<0.000000e+00> : vector<64xf32>
    %74 = vector.multi_reduction <add>, %73, %cst_44 [1] : vector<64x8xf32> to vector<64xf32>
    %75 = vector.shape_cast %74 : vector<64xf32> to vector<64x1xf32>
    %cst_45 = arith.constant 8.000000e+00 : f32
    %76 = vector.broadcast %cst_45 : f32 to vector<64x1xf32>
    %77 = arith.divf %75, %76 : vector<64x1xf32>
    %cst_46 = arith.constant 9.99999974E-6 : f32
    %78 = vector.broadcast %cst_46 : f32 to vector<64x1xf32>
    %79 = arith.addf %77, %78 : vector<64x1xf32>
    %80 = math.rsqrt %79 : vector<64x1xf32>
    %81 = vector.broadcast %80 : vector<64x1xf32> to vector<64x8xf32>
    %82 = arith.mulf %72, %81 : vector<64x8xf32>
    %83 = vector.broadcast %65 : vector<1x8xf32> to vector<64x8xf32>
    %84 = arith.mulf %82, %83 : vector<64x8xf32>
    %85 = vector.broadcast %66 : vector<1x8xf32> to vector<64x8xf32>
    %86 = arith.addf %84, %85 : vector<64x8xf32>
    %c0_47 = arith.constant 0 : index
    %c0_48 = arith.constant 0 : index
    %87 = vector.load %arg16[%c0_47, %c0_48] : memref<64x8xf32, #tpu.memory_space<vmem>>, vector<64x8xf32>
    tpu.vector_store %arg16[%c0_47, %c0_48], %86 {strides = array<i32>} : memref<64x8xf32, #tpu.memory_space<vmem>>, vector<64x8xf32>,
    %c0_49 = arith.constant 0 : index
    %c0_50 = arith.constant 0 : index
    %88 = vector.load %arg14[%c0_49, %c0_50] : memref<8x16xf32, #tpu.memory_space<vmem>>, vector<8x16xf32>
    %cst_51 = arith.constant dense<0.000000e+00> : vector<64x16xf32>
    %89 = tpu.matmul %86, %88, %cst_51 {dimension_numbers = #tpu.dot_dimension_numbers<[1], [0], [0], [1], [0, 0, 1, 1], [], []>} : vector<64x8xf32>, vector<8x16xf32>, vector<64x16xf32> -> vector<64x16xf32>
    %c0_52 = arith.constant 0 : index
    %c0_53 = arith.constant 0 : index
    %90 = vector.load %arg15[%c0_52, %c0_53] : memref<1x16xf32, #tpu.memory_space<vmem>>, vector<1x16xf32>
    %91 = vector.broadcast %90 : vector<1x16xf32> to vector<64x16xf32>
    %92 = arith.addf %89, %91 : vector<64x16xf32>
    %c0_54 = arith.constant 0 : index
    %c0_55 = arith.constant 0 : index
    %93 = vector.load %arg17[%c0_54, %c0_55] : memref<64x16xf32, #tpu.memory_space<vmem>>, vector<64x16xf32>
    tpu.vector_store %arg17[%c0_54, %c0_55], %92 {strides = array<i32>} : memref<64x16xf32, #tpu.memory_space<vmem>>, vector<64x16xf32>,
    return
  }
}

module attributes {stable_mosaic.version = 11 : i64} {
  func.func @_enc_stage2_kernel(%arg0: memref<64x8xf32, #tpu.memory_space<vmem>>, %arg1: memref<64x16xf32, #tpu.memory_space<vmem>>, %arg2: memref<16x8xf32, #tpu.memory_space<vmem>>, %arg3: memref<1x8xf32, #tpu.memory_space<vmem>>, %arg4: memref<1x8xf32, #tpu.memory_space<vmem>>, %arg5: memref<1x8xf32, #tpu.memory_space<vmem>>, %arg6: memref<64x8xf32, #tpu.memory_space<vmem>>) attributes {dimension_semantics = [], scalar_prefetch = 0 : i64, scratch_operands = 0 : i64, tpu.core_type = #tpu.core_type<tc>} {
    %c0 = arith.constant 0 : index
    %c0_0 = arith.constant 0 : index
    %0 = vector.load %arg1[%c0, %c0_0] : memref<64x16xf32, #tpu.memory_space<vmem>>, vector<64x16xf32>
    %c0_1 = arith.constant 0 : index
    %c0_2 = arith.constant 0 : index
    %1 = vector.load %arg2[%c0_1, %c0_2] : memref<16x8xf32, #tpu.memory_space<vmem>>, vector<16x8xf32>
    %cst = arith.constant dense<0.000000e+00> : vector<64x8xf32>
    %2 = tpu.matmul %0, %1, %cst {dimension_numbers = #tpu.dot_dimension_numbers<[1], [0], [0], [1], [0, 0, 1, 1], [], []>} : vector<64x16xf32>, vector<16x8xf32>, vector<64x8xf32> -> vector<64x8xf32>
    %c0_3 = arith.constant 0 : index
    %c0_4 = arith.constant 0 : index
    %3 = vector.load %arg3[%c0_3, %c0_4] : memref<1x8xf32, #tpu.memory_space<vmem>>, vector<1x8xf32>
    %4 = vector.broadcast %3 : vector<1x8xf32> to vector<64x8xf32>
    %5 = arith.addf %2, %4 : vector<64x8xf32>
    %c0_5 = arith.constant 0 : index
    %c0_6 = arith.constant 0 : index
    %6 = vector.load %arg0[%c0_5, %c0_6] : memref<64x8xf32, #tpu.memory_space<vmem>>, vector<64x8xf32>
    %7 = arith.addf %6, %5 : vector<64x8xf32>
    %c0_7 = arith.constant 0 : index
    %c0_8 = arith.constant 0 : index
    %8 = vector.load %arg4[%c0_7, %c0_8] : memref<1x8xf32, #tpu.memory_space<vmem>>, vector<1x8xf32>
    %c0_9 = arith.constant 0 : index
    %c0_10 = arith.constant 0 : index
    %9 = vector.load %arg5[%c0_9, %c0_10] : memref<1x8xf32, #tpu.memory_space<vmem>>, vector<1x8xf32>
    %cst_11 = arith.constant dense<0.000000e+00> : vector<64xf32>
    %10 = vector.multi_reduction <add>, %7, %cst_11 [1] : vector<64x8xf32> to vector<64xf32>
    %11 = vector.shape_cast %10 : vector<64xf32> to vector<64x1xf32>
    %cst_12 = arith.constant 8.000000e+00 : f32
    %12 = vector.broadcast %cst_12 : f32 to vector<64x1xf32>
    %13 = arith.divf %11, %12 : vector<64x1xf32>
    %14 = vector.broadcast %13 : vector<64x1xf32> to vector<64x8xf32>
    %15 = arith.subf %7, %14 : vector<64x8xf32>
    %16 = arith.mulf %15, %15 : vector<64x8xf32>
    %cst_13 = arith.constant dense<0.000000e+00> : vector<64xf32>
    %17 = vector.multi_reduction <add>, %16, %cst_13 [1] : vector<64x8xf32> to vector<64xf32>
    %18 = vector.shape_cast %17 : vector<64xf32> to vector<64x1xf32>
    %cst_14 = arith.constant 8.000000e+00 : f32
    %19 = vector.broadcast %cst_14 : f32 to vector<64x1xf32>
    %20 = arith.divf %18, %19 : vector<64x1xf32>
    %cst_15 = arith.constant 9.99999974E-6 : f32
    %21 = vector.broadcast %cst_15 : f32 to vector<64x1xf32>
    %22 = arith.addf %20, %21 : vector<64x1xf32>
    %23 = math.rsqrt %22 : vector<64x1xf32>
    %24 = vector.broadcast %23 : vector<64x1xf32> to vector<64x8xf32>
    %25 = arith.mulf %15, %24 : vector<64x8xf32>
    %26 = vector.broadcast %8 : vector<1x8xf32> to vector<64x8xf32>
    %27 = arith.mulf %25, %26 : vector<64x8xf32>
    %28 = vector.broadcast %9 : vector<1x8xf32> to vector<64x8xf32>
    %29 = arith.addf %27, %28 : vector<64x8xf32>
    %c0_16 = arith.constant 0 : index
    %c0_17 = arith.constant 0 : index
    %30 = vector.load %arg6[%c0_16, %c0_17] : memref<64x8xf32, #tpu.memory_space<vmem>>, vector<64x8xf32>
    tpu.vector_store %arg6[%c0_16, %c0_17], %29 {strides = array<i32>} : memref<64x8xf32, #tpu.memory_space<vmem>>, vector<64x8xf32>,
    return
  }
}

module attributes {stable_mosaic.version = 11 : i64} {
  func.func @_layernorm_kernel(%arg0: memref<64x8xf32, #tpu.memory_space<vmem>>, %arg1: memref<1x8xf32, #tpu.memory_space<vmem>>, %arg2: memref<1x8xf32, #tpu.memory_space<vmem>>, %arg3: memref<64x8xf32, #tpu.memory_space<vmem>>) attributes {dimension_semantics = [], scalar_prefetch = 0 : i64, scratch_operands = 0 : i64, tpu.core_type = #tpu.core_type<tc>} {
    %c0 = arith.constant 0 : index
    %c0_0 = arith.constant 0 : index
    %0 = vector.load %arg0[%c0, %c0_0] : memref<64x8xf32, #tpu.memory_space<vmem>>, vector<64x8xf32>
    %c0_1 = arith.constant 0 : index
    %c0_2 = arith.constant 0 : index
    %1 = vector.load %arg1[%c0_1, %c0_2] : memref<1x8xf32, #tpu.memory_space<vmem>>, vector<1x8xf32>
    %c0_3 = arith.constant 0 : index
    %c0_4 = arith.constant 0 : index
    %2 = vector.load %arg2[%c0_3, %c0_4] : memref<1x8xf32, #tpu.memory_space<vmem>>, vector<1x8xf32>
    %cst = arith.constant dense<0.000000e+00> : vector<64xf32>
    %3 = vector.multi_reduction <add>, %0, %cst [1] : vector<64x8xf32> to vector<64xf32>
    %4 = vector.shape_cast %3 : vector<64xf32> to vector<64x1xf32>
    %cst_5 = arith.constant 8.000000e+00 : f32
    %5 = vector.broadcast %cst_5 : f32 to vector<64x1xf32>
    %6 = arith.divf %4, %5 : vector<64x1xf32>
    %7 = vector.broadcast %6 : vector<64x1xf32> to vector<64x8xf32>
    %8 = arith.subf %0, %7 : vector<64x8xf32>
    %9 = arith.mulf %8, %8 : vector<64x8xf32>
    %cst_6 = arith.constant dense<0.000000e+00> : vector<64xf32>
    %10 = vector.multi_reduction <add>, %9, %cst_6 [1] : vector<64x8xf32> to vector<64xf32>
    %11 = vector.shape_cast %10 : vector<64xf32> to vector<64x1xf32>
    %cst_7 = arith.constant 8.000000e+00 : f32
    %12 = vector.broadcast %cst_7 : f32 to vector<64x1xf32>
    %13 = arith.divf %11, %12 : vector<64x1xf32>
    %cst_8 = arith.constant 9.99999974E-6 : f32
    %14 = vector.broadcast %cst_8 : f32 to vector<64x1xf32>
    %15 = arith.addf %13, %14 : vector<64x1xf32>
    %16 = math.rsqrt %15 : vector<64x1xf32>
    %17 = vector.broadcast %16 : vector<64x1xf32> to vector<64x8xf32>
    %18 = arith.mulf %8, %17 : vector<64x8xf32>
    %19 = vector.broadcast %1 : vector<1x8xf32> to vector<64x8xf32>
    %20 = arith.mulf %18, %19 : vector<64x8xf32>
    %21 = vector.broadcast %2 : vector<1x8xf32> to vector<64x8xf32>
    %22 = arith.addf %20, %21 : vector<64x8xf32>
    %c0_9 = arith.constant 0 : index
    %c0_10 = arith.constant 0 : index
    %23 = vector.load %arg3[%c0_9, %c0_10] : memref<64x8xf32, #tpu.memory_space<vmem>>, vector<64x8xf32>
    tpu.vector_store %arg3[%c0_9, %c0_10], %22 {strides = array<i32>} : memref<64x8xf32, #tpu.memory_space<vmem>>, vector<64x8xf32>,
    return
  }
}

module attributes {stable_mosaic.version = 11 : i64} {
  func.func @_matmul_bias_kernel(%arg0: memref<2x128xf32, #tpu.memory_space<vmem>>, %arg1: memref<128x3xf32, #tpu.memory_space<vmem>>, %arg2: memref<1x3xf32, #tpu.memory_space<vmem>>, %arg3: memref<2x3xf32, #tpu.memory_space<vmem>>) attributes {dimension_semantics = [], scalar_prefetch = 0 : i64, scratch_operands = 0 : i64, tpu.core_type = #tpu.core_type<tc>} {
    %c0 = arith.constant 0 : index
    %c0_0 = arith.constant 0 : index
    %0 = vector.load %arg0[%c0, %c0_0] : memref<2x128xf32, #tpu.memory_space<vmem>>, vector<2x128xf32>
    %c0_1 = arith.constant 0 : index
    %c0_2 = arith.constant 0 : index
    %1 = vector.load %arg1[%c0_1, %c0_2] : memref<128x3xf32, #tpu.memory_space<vmem>>, vector<128x3xf32>
    %cst = arith.constant dense<0.000000e+00> : vector<2x3xf32>
    %2 = tpu.matmul %0, %1, %cst {dimension_numbers = #tpu.dot_dimension_numbers<[1], [0], [0], [1], [0, 0, 1, 1], [], []>} : vector<2x128xf32>, vector<128x3xf32>, vector<2x3xf32> -> vector<2x3xf32>
    %c0_3 = arith.constant 0 : index
    %c0_4 = arith.constant 0 : index
    %3 = vector.load %arg2[%c0_3, %c0_4] : memref<1x3xf32, #tpu.memory_space<vmem>>, vector<1x3xf32>
    %4 = vector.broadcast %3 : vector<1x3xf32> to vector<2x3xf32>
    %5 = arith.addf %2, %4 : vector<2x3xf32>
    %c0_5 = arith.constant 0 : index
    %c0_6 = arith.constant 0 : index
    %6 = vector.load %arg3[%c0_5, %c0_6] : memref<2x3xf32, #tpu.memory_space<vmem>>, vector<2x3xf32>
    tpu.vector_store %arg3[%c0_5, %c0_6], %5 {strides = array<i32>} : memref<2x3xf32, #tpu.memory_space<vmem>>, vector<2x3xf32>,
    return
  }
}

</mosaic_0001>

<bundles_post_ra>
// kernel: _lambda_.10
= control target key start
LH: loop header
LB: loop body
LE: loop exit
PB: predicated region body
PF: predicated region fallthrough
CT: control target
= control target key end

     0   :  { %vm37_vm0 = vcmask 1043456   ;;  %vm24_vm1 = vcmask 97280   ;;  %vm165_vm2 = vmmov 1   ;;  %vm126_vm4 = vcmask 64512   ;;  %s232_s1 = inlined_call_operand.vmem [shape: f32[12,8], index: 1, kind: input, shape index: {}]   ;;  %s233_s0 = inlined_call_operand.vmem [shape: f32[32,12], index: 0, kind: input, shape index: {}]   ;;  %s234_s2 = inlined_call_operand.vmem [shape: f32[32,8], index: 2, kind: input, shape index: {}]   ;;  %s235_s3 = inlined_call_operand.vmem [shape: f32[32,8], index: 3, kind: output, shape index: {}]  }
   0x1   :  { %v18_v0 = vld [vmem:[%s232_s1] sm:$0xff]  ;;  %v19_v1 = vld [vmem:[%s232_s1 + $0x8] sm:$0xf]  ;;  %vm157_vm3 = vmpackc.low %vm37_vm0, %vm165_vm2 }
   0x2   :  { %v156_v2 = vpack.c.bf16 %v19_v1, %v18_v0  ;;  %v14_v3 = vld [vmem:[%s233_s0] sm:$0xff]  ;;  %v16_v4 = vld [vmem:[%s233_s0 + $0x10] sm:$0xff]  ;;  %v15_v5 = vld [vmem:[%s233_s0 + $0x8] sm:$0xff] }
   0x3   :  { %150 = vmatprep.mubr.msk.f32.mxu0 %vm24_vm1, %v14_v3  ;;  %153 = vmatprep.mubr.msk.f32.mxu1 %vm24_vm1, %v16_v4  ;;  %v17_v6 = vld [vmem:[%s233_s0 + $0x18] sm:$0xff]  ;;  %v21_v7 = vld [vmem:[%s234_s2 + $0x8] sm:$0xff]  ;;  %v20_v9 = vld [vmem:[%s234_s2] sm:$0xff] }
   0x4   :  { %158 = vmatprep.subr.msk.bf16.mxu0 %vm157_vm3, %v156_v2  ;;  %162 = vmatprep.subr.msk.bf16.mxu1 %vm157_vm3, %v156_v2  ;;  %v23_v8 = vld [vmem:[%s234_s2 + $0x18] sm:$0xff]  ;;  %v22_v10 = vld [vmem:[%s234_s2 + $0x10] sm:$0xff] }
   0x5   :  { %161 = vmatpush3.bf16.msk.msra.mxu0 %vm157_vm3, %v156_v2  ;;  %163 = vmatpush3.bf16.msk.msra.mxu1 %vm157_vm3, %v156_v2 }
   0x8   :  { %151 = vmatmul.mubr.msk.f32.vlgmr.msra.gmra.mrb[0].mxu0 %vm24_vm1, %v15_v5  ;;  %154 = vmatmul.mubr.msk.f32.vlgmr.msra.gmra.mrb[0].mxu1 %vm24_vm1, %v17_v6 }
  0xdb   :  { %v152_v11 = vpop.f32.mrb[0].mxu0  ;;  %v155_v12 = vpop.f32.mrb[0].mxu1 }
  0xdc   :  { %v113_v13 = vadd.f32 %v152_v11, %v21_v7  ;;  %v123_v14 = vadd.f32 %v155_v12, %v23_v8  ;;  %v107_v15 = vpop.f32.mrb[1].mxu0  ;;  %v117_v16 = vpop.f32.mrb[1].mxu1 }
  0xdd   :  { %v108_v17 = vadd.f32 %v107_v15, %v20_v9  ;;  %v118_v18 = vadd.f32 %v117_v16, %v22_v10 }
  0xde   :  { %128 = vst.msk [vmem:[%s235_s3 + $0x8] sm:$0xff] %vm126_vm4, %v113_v13  ;;  %130 = vst.msk [vmem:[%s235_s3 + $0x18] sm:$0xff] %vm126_vm4, %v123_v14 }
  0xdf   :  { %127 = vst.msk [vmem:[%s235_s3] sm:$0xff] %vm126_vm4, %v108_v17  ;;  %129 = vst.msk [vmem:[%s235_s3 + $0x10] sm:$0xff] %vm126_vm4, %v118_v18 }

// kernel: _lambda_.11
= control target key start
LH: loop header
LB: loop body
LE: loop exit
PB: predicated region body
PF: predicated region fallthrough
CT: control target
= control target key end

     0   :  { %vm180_vm0 = vcmask 64512   ;;  %s470_s0 = inlined_call_operand.vmem [shape: f32[2,40,8], index: 0, kind: input, shape index: {}]   ;;  %s471_s2 = inlined_call_operand.vmem [shape: f32[2,16,8], index: 2, kind: output, shape index: {1}]   ;;  %s472_s1 = inlined_call_operand.vmem [shape: f32[2,16,8], index: 1, kind: output, shape index: {0}]  }
   0x1   :  { %v10_v0 = vld [vmem:[%s470_s0] sm:$0xff]  ;;  %v11_v1 = vld [vmem:[%s470_s0 + $0x8] sm:$0xff]  ;;  %v13_v28 = vld [vmem:[%s470_s0 + $0x30] sm:$0xff] }
   0x2   :  { %v18_v2 = vld [vmem:[%s470_s0 + $0x1] sm:$0xff]  ;;  %v19_v3 = vld [vmem:[%s470_s0 + $0x9] sm:$0xff]  ;;  %v21_v31 = vld [vmem:[%s470_s0 + $0x31] sm:$0xff] }
   0x3   :  { %v22_v4 = vadd.f32 %v18_v2, %v10_v0  ;;  %v26_v5 = vld [vmem:[%s470_s0 + $0x2] sm:$0xff]  ;;  %v27_v6 = vld [vmem:[%s470_s0 + $0xa] sm:$0xff]  ;;  %v23_v7 = vadd.f32 %v19_v3, %v11_v1  ;;  %v29_v34 = vld [vmem:[%s470_s0 + $0x32] sm:$0xff]  ;;  %v25_v37 = vadd.f32 %v21_v31, %v13_v28 }
   0x4   :  { %v34_v8 = vld [vmem:[%s470_s0 + $0x3] sm:$0xff]  ;;  %v35_v10 = vld [vmem:[%s470_s0 + $0xb] sm:$0xff]  ;;  %v37_v41 = vld [vmem:[%s470_s0 + $0x33] sm:$0xff] }
   0x5   :  { %v30_v9 = vadd.f32 %v26_v5, %v22_v4  ;;  %v31_v11 = vadd.f32 %v27_v6, %v23_v7  ;;  %v42_v12 = vld [vmem:[%s470_s0 + $0x4] sm:$0xff]  ;;  %v246_v14 = vld [vmem:[%s470_s0 + $0xc] sm:$0xff]  ;;  %v33_v44 = vadd.f32 %v29_v34, %v25_v37  ;;  %v306_v48 = vld [vmem:[%s470_s0 + $0x34] sm:$0xff] }
   0x6   :  { %v50_v16 = vld [vmem:[%s470_s0 + $0x5] sm:$0xff]  ;;  %v51_v18 = vld [vmem:[%s470_s0 + $0xd] sm:$0xff]  ;;  %v53_v55 = vld [vmem:[%s470_s0 + $0x35] sm:$0xff] }
   0x7   :  { %v38_v13 = vadd.f32 %v34_v8, %v30_v9  ;;  %v39_v15 = vadd.f32 %v35_v10, %v31_v11  ;;  %v58_v20 = vld [vmem:[%s470_s0 + $0x6] sm:$0xff]  ;;  %v59_v22 = vld [vmem:[%s470_s0 + $0xe] sm:$0xff]  ;;  %v41_v51 = vadd.f32 %v37_v41, %v33_v44  ;;  %v61_v62 = vld [vmem:[%s470_s0 + $0x36] sm:$0xff] }
   0x8   :  { %v66_v24 = vld [vmem:[%s470_s0 + $0x7] sm:$0xff]  ;;  %v267_v25 = vld [vmem:[%s470_s0 + $0xf] sm:$0xff]  ;;  %v69_v5 = vld [vmem:[%s470_s0 + $0x37] sm:$0xff] }
   0x9   :  { %v46_v17 = vadd.f32 %v42_v12, %v38_v13  ;;  %v47_v19 = vadd.f32 %v246_v14, %v39_v15  ;;  %v12_v27 = vld [vmem:[%s470_s0 + $0x28] sm:$0xff]  ;;  %v74_v36 = vld [vmem:[%s470_s0 + $0x10] sm:$0xff]  ;;  %v49_v58 = vadd.f32 %v306_v48, %v41_v51  ;;  %v75_v11 = vld [vmem:[%s470_s0 + $0x38] sm:$0xff] }
   0xa   :  { %v20_v29 = vld [vmem:[%s470_s0 + $0x29] sm:$0xff]  ;;  %v80_v43 = vld [vmem:[%s470_s0 + $0x11] sm:$0xff]  ;;  %v105_v44 = vld [vmem:[%s470_s0 + $0x3d] sm:$0xff] }
   0xb   :  { %v54_v21 = vadd.f32 %v50_v16, %v46_v17  ;;  %v55_v23 = vadd.f32 %v51_v18, %v47_v19  ;;  %v24_v32 = vadd.f32 %v20_v29, %v12_v27  ;;  %v28_v33 = vld [vmem:[%s470_s0 + $0x2a] sm:$0xff]  ;;  %v86_v50 = vld [vmem:[%s470_s0 + $0x12] sm:$0xff] }
   0xc   :  { %v36_v38 = vld [vmem:[%s470_s0 + $0x2b] sm:$0xff]  ;;  %v92_v57 = vld [vmem:[%s470_s0 + $0x13] sm:$0xff] }
   0xd   :  { %v62_v26 = vadd.f32 %v58_v20, %v54_v21  ;;  %v63_v30 = vadd.f32 %v59_v22, %v55_v23  ;;  %v32_v40 = vadd.f32 %v28_v33, %v24_v32  ;;  %v44_v45 = vld [vmem:[%s470_s0 + $0x2c] sm:$0xff]  ;;  %v330_v0 = vld [vmem:[%s470_s0 + $0x14] sm:$0xff] }
   0xe   :  { %v52_v52 = vld [vmem:[%s470_s0 + $0x2d] sm:$0xff]  ;;  %v104_v7 = vld [vmem:[%s470_s0 + $0x15] sm:$0xff] }
   0xf   :  { %v70_v35 = vadd.f32 %v66_v24, %v62_v26  ;;  %v71_v39 = vadd.f32 %v267_v25, %v63_v30  ;;  %v40_v47 = vadd.f32 %v36_v38, %v32_v40  ;;  %v60_v59 = vld [vmem:[%s470_s0 + $0x2e] sm:$0xff]  ;;  %v110_v13 = vld [vmem:[%s470_s0 + $0x16] sm:$0xff] }
  0x10   :  { %v68_v2 = vld [vmem:[%s470_s0 + $0x2f] sm:$0xff]  ;;  %v81_v19 = vld [vmem:[%s470_s0 + $0x39] sm:$0xff] }
  0x11   :  { %v76_v42 = vadd.f32 %v70_v35, %v11_v1  ;;  %v77_v46 = vadd.f32 %v74_v36, %v71_v39  ;;  %v48_v54 = vadd.f32 %v44_v45, %v40_v47  ;;  %v57_v1 = vadd.f32 %v53_v55, %v49_v58  ;;  %v116_v21 = vld [vmem:[%s470_s0 + $0x17] sm:$0xff] }
  0x12   :  { %v93_v32 = vld [vmem:[%s470_s0 + $0x3b] sm:$0xff] }
  0x13   :  { %v82_v49 = vadd.f32 %v76_v42, %v19_v3  ;;  %v83_v53 = vadd.f32 %v80_v43, %v77_v46  ;;  %v56_v61 = vadd.f32 %v52_v52, %v48_v54  ;;  %v65_v8 = vadd.f32 %v61_v62, %v57_v1  ;;  %v146_v52 = vld [vmem:[%s470_s0 + $0x1c] sm:$0xff] }
  0x15   :  { %v88_v56 = vadd.f32 %v82_v49, %v27_v6  ;;  %v89_v60 = vadd.f32 %v86_v50, %v83_v53  ;;  %v64_v4 = vadd.f32 %v60_v59, %v56_v61  ;;  %v73_v15 = vadd.f32 %v69_v5, %v65_v8  ;;  %v111_v49 = vld [vmem:[%s470_s0 + $0x3e] sm:$0xff] }
  0x16   :  { %v123_v61 = vld [vmem:[%s470_s0 + $0x40] sm:$0xff] }
  0x17   :  { %v94_v63 = vadd.f32 %v88_v56, %v35_v10  ;;  %v95_v3 = vadd.f32 %v92_v57, %v89_v60  ;;  %v72_v10 = vadd.f32 %v68_v2, %v64_v4  ;;  %v79_v23 = vadd.f32 %v75_v11, %v73_v15  ;;  %v117_v56 = vld [vmem:[%s470_s0 + $0x3f] sm:$0xff] }
  0x18   :  { %v129_v4 = vld [vmem:[%s470_s0 + $0x41] sm:$0xff] }
  0x19   :  { %v100_v6 = vadd.f32 %v94_v63, %v246_v14  ;;  %v101_v9 = vadd.f32 %v330_v0, %v95_v3  ;;  %v78_v17 = vadd.f32 %v72_v10, %v13_v28  ;;  %v122_v28 = vld [vmem:[%s470_s0 + $0x18] sm:$0xff]  ;;  %v85_v29 = vadd.f32 %v81_v19, %v79_v23 }
  0x1b   :  { %v106_v12 = vadd.f32 %v100_v6, %v51_v18  ;;  %v107_v16 = vadd.f32 %v104_v7, %v101_v9  ;;  %v84_v26 = vadd.f32 %v78_v17, %v21_v31  ;;  %v87_v18 = vld [vmem:[%s470_s0 + $0x3a] sm:$0xff] }
  0x1c   :  { %v128_v31 = vld [vmem:[%s470_s0 + $0x19] sm:$0xff]  ;;  %v91_v35 = vadd.f32 %v87_v18, %v85_v29 }
  0x1d   :  { %v112_v20 = vadd.f32 %v106_v12, %v59_v22  ;;  %v113_v24 = vadd.f32 %v110_v13, %v107_v16  ;;  %v90_v22 = vadd.f32 %v84_v26, %v29_v34  ;;  %v134_v34 = vld [vmem:[%s470_s0 + $0x1a] sm:$0xff] }
  0x1e   :  { %v97_v40 = vadd.f32 %v93_v32, %v91_v35 }
  0x1f   :  { %v118_v27 = vadd.f32 %v112_v20, %v267_v25  ;;  %v119_v30 = vadd.f32 %v116_v21, %v113_v24  ;;  %v96_v38 = vadd.f32 %v90_v22, %v37_v41  ;;  %v371_v25 = vld [vmem:[%s470_s0 + $0x3c] sm:$0xff] }
  0x20   :  { %v140_v41 = vld [vmem:[%s470_s0 + $0x1b] sm:$0xff]  ;;  %v103_v46 = vadd.f32 %v371_v25, %v97_v40 }
  0x21   :  { %v124_v33 = vadd.f32 %v118_v27, %v74_v36  ;;  %v125_v37 = vadd.f32 %v122_v28, %v119_v30  ;;  %v102_v36 = vadd.f32 %v96_v38, %v306_v48 }
  0x22   :  { %v109_v53 = vadd.f32 %v105_v44, %v103_v46 }
  0x23   :  { %v130_v39 = vadd.f32 %v124_v33, %v80_v43  ;;  %v131_v42 = vadd.f32 %v128_v31, %v125_v37  ;;  %v108_v47 = vadd.f32 %v102_v36, %v53_v55  ;;  %v152_v55 = vld [vmem:[%s470_s0 + $0x1d] sm:$0xff]  ;;  %v159_v33 = vld [vmem:[%s470_s0 + $0x46] sm:$0xff] }
  0x24   :  { %v115_v59 = vadd.f32 %v111_v49, %v109_v53 }
  0x25   :  { %v136_v45 = vadd.f32 %v130_v39, %v86_v50  ;;  %v137_v43 = vadd.f32 %v134_v34, %v131_v42  ;;  %v114_v50 = vadd.f32 %v108_v47, %v61_v62  ;;  %v158_v62 = vld [vmem:[%s470_s0 + $0x1e] sm:$0xff] }
  0x26   :  { %v121_v1 = vadd.f32 %v117_v56, %v115_v59 }
  0x27   :  { %v142_v51 = vadd.f32 %v136_v45, %v92_v57  ;;  %v143_v54 = vadd.f32 %v140_v41, %v137_v43  ;;  %v120_v57 = vadd.f32 %v114_v50, %v69_v5  ;;  %v164_v5 = vld [vmem:[%s470_s0 + $0x1f] sm:$0xff] }
  0x28   :  { %v127_v8 = vadd.f32 %v123_v61, %v121_v1 }
  0x29   :  { %v148_v58 = vadd.f32 %v142_v51, %v330_v0  ;;  %v149_v60 = vadd.f32 %v146_v52, %v143_v54  ;;  %v126_v3 = vadd.f32 %v120_v57, %v75_v11  ;;  %v170_v11 = vld [vmem:[%s470_s0 + $0x20] sm:$0xff] }
  0x2a   :  { %v133_v15 = vadd.f32 %v129_v4, %v127_v8 }
  0x2b   :  { %v154_v63 = vadd.f32 %v148_v58, %v104_v7  ;;  %v155_v2 = vadd.f32 %v152_v55, %v149_v60  ;;  %v132_v10 = vadd.f32 %v126_v3, %v81_v19  ;;  %v135_v7 = vld [vmem:[%s470_s0 + $0x42] sm:$0xff] }
  0x2c   :  { %v139_v23 = vadd.f32 %v135_v7, %v133_v15 }
  0x2d   :  { %v160_v6 = vadd.f32 %v154_v63, %v110_v13  ;;  %v161_v9 = vadd.f32 %v158_v62, %v155_v2  ;;  %v138_v17 = vadd.f32 %v132_v10, %v87_v18  ;;  %v141_v13 = vld [vmem:[%s470_s0 + $0x43] sm:$0xff] }
  0x2e   :  { %v145_v27 = vadd.f32 %v141_v13, %v139_v23  ;;  %v153_v18 = vld [vmem:[%s470_s0 + $0x45] sm:$0xff] }
  0x2f   :  { %v166_v12 = vadd.f32 %v160_v6, %v116_v21  ;;  %v167_v16 = vadd.f32 %v164_v5, %v161_v9  ;;  %v144_v24 = vadd.f32 %v138_v17, %v93_v32  ;;  %v147_v21 = vld [vmem:[%s470_s0 + $0x44] sm:$0xff] }
  0x31   :  { %v172_v20 = vadd.f32 %v166_v12, %v122_v28  ;;  %v173_v19 = vadd.f32 %v170_v11, %v167_v16  ;;  %v150_v30 = vadd.f32 %v144_v24, %v371_v25  ;;  %v151_v28 = vadd.f32 %v147_v21, %v145_v27 }
  0x33   :  { %v176_v26 = vmul.f32 0.04, %v172_v20  ;;  %v177_v29 = vmul.f32 0.04, %v173_v19  ;;  %v156_v32 = vadd.f32 %v150_v30, %v105_v44  ;;  %v157_v35 = vadd.f32 %v153_v18, %v151_v28 }
  0x35   :  { %181 = vst.msk [vmem:[%s471_s2] sm:$0xff] %vm180_vm0, %v176_v26  ;;  %v185_v22 = vsub.f32 %v246_v14, %v176_v26  ;;  %182 = vst.msk [vmem:[%s471_s2 + $0x8] sm:$0xff] %vm180_vm0, %v177_v29  ;;  %v186_v31 = vsub.f32 %v330_v0, %v177_v29  ;;  %v162_v37 = vadd.f32 %v156_v32, %v111_v49  ;;  %v165_v14 = vld [vmem:[%s470_s0 + $0x47] sm:$0xff] }
  0x36   :  { %v163_v38 = vadd.f32 %v159_v33, %v157_v35  ;;  %v171_v0 = vld [vmem:[%s470_s0 + $0x48] sm:$0xff] }
  0x37   :  { %189 = vst.msk [vmem:[%s472_s1] sm:$0xff] %vm180_vm0, %v185_v22  ;;  %190 = vst.msk [vmem:[%s472_s1 + $0x8] sm:$0xff] %vm180_vm0, %v186_v31  ;;  %v168_v39 = vadd.f32 %v162_v37, %v117_v56 }
  0x38   :  { %v169_v34 = vadd.f32 %v165_v14, %v163_v38 }
  0x39   :  { %v174_v40 = vadd.f32 %v168_v39, %v123_v61 }
  0x3a   :  { %v175_v42 = vadd.f32 %v171_v0, %v169_v34 }
  0x3b   :  { %v178_v36 = vmul.f32 0.04, %v174_v40 }
  0x3c   :  { %v179_v44 = vmul.f32 0.04, %v175_v42 }
  0x3d   :  { %183 = vst.msk [vmem:[%s471_s2 + $0x10] sm:$0xff] %vm180_vm0, %v178_v36  ;;  %v187_v45 = vsub.f32 %v306_v48, %v178_v36 }
  0x3e   :  { %184 = vst.msk [vmem:[%s471_s2 + $0x18] sm:$0xff] %vm180_vm0, %v179_v44  ;;  %v188_v41 = vsub.f32 %v371_v25, %v179_v44 }
  0x3f   :  { %191 = vst.msk [vmem:[%s472_s1 + $0x10] sm:$0xff] %vm180_vm0, %v187_v45 }
  0x40   :  { %192 = vst.msk [vmem:[%s472_s1 + $0x18] sm:$0xff] %vm180_vm0, %v188_v41 }

// kernel: _lambda_.14
= control target key start
LH: loop header
LB: loop body
LE: loop exit
PB: predicated region body
PF: predicated region fallthrough
CT: control target
= control target key end

     0   :  { %v350_v0 = vmov 0.0|0.0   ;;  %vm351_vm0 = vmmov 0   ;;  %v352_v6 = vmov 0.0   ;;  %vm43_vm1 = vcmask 588800   ;;  %s534_s1 = inlined_call_operand.vmem [shape: f32[72,8], index: 1, kind: input, shape index: {}]   ;;  %s535_s0 = inlined_call_operand.vmem [shape: f32[100,72], index: 0, kind: input, shape index: {}]   ;;  %s536_s2 = inlined_call_operand.vmem [shape: f32[1,8], index: 2, kind: input, shape index: {}]   ;;  %s537_s3 = inlined_call_operand.vmem [shape: f32[100,8], index: 3, kind: output, shape index: {}]  }
   0x1   :  { %325 = vmatprep.subr.bf16.mxu0 %v350_v0  ;;  %v27_v1 = vld [vmem:[%s534_s1] sm:$0xff]  ;;  %v28_v2 = vld [vmem:[%s534_s1 + $0x8] sm:$0xff]  ;;  %337 = vmatprep.subr.bf16.mxu1 %v350_v0  ;;  %v29_v3 = vld [vmem:[%s534_s1 + $0x10] sm:$0xff]  ;;  %vm213_vm2 = vcmask 64512   ;;  %vm226_vm3 = vcmask 60416  }
   0x2   :  { %v326_v4 = vpack.c.bf16 %v28_v2, %v27_v1  ;;  %v30_v5 = vld [vmem:[%s534_s1 + $0x18] sm:$0xff]  ;;  %286 = vmatprep.mubr.msk.f32.mxu0 %vm351_vm0, %v352_v6  ;;  %307 = vmatprep.mubr.msk.f32.mxu1 %vm351_vm0, %v352_v6  ;;  %v31_v8 = vld [vmem:[%s534_s1 + $0x20] sm:$0xff]  ;;  %v32_v9 = vld [vmem:[%s534_s1 + $0x28] sm:$0xff] }
   0x3   :  { %v329_v7 = vpack.c.bf16 %v30_v5, %v29_v3  ;;  %v332_v10 = vpack.c.bf16 %v32_v9, %v31_v8  ;;  %v33_v11 = vld [vmem:[%s534_s1 + $0x30] sm:$0xff]  ;;  %v34_v12 = vld [vmem:[%s534_s1 + $0x38] sm:$0xff]  ;;  %v35_v14 = vld [vmem:[%s534_s1 + $0x40] sm:$0xff] }
   0x4   :  { %327 = vmatpush3.bf16.msra.mxu0 %v326_v4  ;;  %342 = vmatpush3.bf16.msra.mxu1 %v326_v4  ;;  %v335_v13 = vpack.c.bf16 %v34_v12, %v33_v11  ;;  %v14_v15 = vld [vmem:[%s535_s0] sm:$0xff]  ;;  %v21_v16 = vld [vmem:[%s535_s0 + $0x38] sm:$0xff]  ;;  %v15_v17 = vld [vmem:[%s535_s0 + $0x8] sm:$0xff] }
   0x5   :  { %328 = vmatprep.subr.bf16.mxu0 %v350_v0  ;;  %338 = vmatprep.subr.bf16.mxu1 %v350_v0  ;;  %v22_v18 = vld [vmem:[%s535_s0 + $0x40] sm:$0xff]  ;;  %v16_v19 = vld [vmem:[%s535_s0 + $0x10] sm:$0xff]  ;;  %v23_v20 = vld [vmem:[%s535_s0 + $0x48] sm:$0xff] }
   0x6   :  { %v17_v21 = vld [vmem:[%s535_s0 + $0x18] sm:$0xff]  ;;  %v24_v22 = vld [vmem:[%s535_s0 + $0x50] sm:$0xff]  ;;  %v18_v23 = vld [vmem:[%s535_s0 + $0x20] sm:$0xff] }
   0x7   :  { %v25_v24 = vld [vmem:[%s535_s0 + $0x58] sm:$0xff]  ;;  %v19_v25 = vld [vmem:[%s535_s0 + $0x28] sm:$0xff]  ;;  %v26_v26 = vld [vmem:[%s535_s0 + $0x60] sm:$0xf] }
   0x8   :  { %330 = vmatpush3.bf16.msra.mxu0 %v329_v7  ;;  %343 = vmatpush3.bf16.msra.mxu1 %v329_v7  ;;  %v20_v27 = vld [vmem:[%s535_s0 + $0x30] sm:$0xff]  ;;  %v232_v28 = vld [vmem:[%s536_s2] ss:$0 sm:$0xff] }
   0x9   :  { %331 = vmatprep.subr.bf16.mxu0 %v350_v0  ;;  %339 = vmatprep.subr.bf16.mxu1 %v350_v0 }
   0xc   :  { %333 = vmatpush3.bf16.msra.mxu0 %v332_v10  ;;  %344 = vmatpush3.bf16.msra.mxu1 %v332_v10 }
   0xd   :  { %334 = vmatprep.subr.bf16.mxu0 %v350_v0  ;;  %340 = vmatprep.subr.bf16.mxu1 %v350_v0 }
  0x10   :  { %336 = vmatpush3.bf16.msra.mxu0 %v335_v13  ;;  %345 = vmatpush3.bf16.msra.mxu1 %v335_v13 }
  0x11   :  { %284 = vmatprep.subr.mxu0 %v352_v6  ;;  %341 = vmatprep.subr.mxu1 %v352_v6 }
  0x14   :  { %285 = vmatpush3.msra.mxu0 %v35_v14  ;;  %346 = vmatpush3.msra.mxu1 %v35_v14 }
  0x15   :  { %287 = vmatmul.mubr.msk.f32.vlgmr.msra.gmra.mrb[0].mxu0 %vm43_vm1, %v14_v15  ;;  %308 = vmatmul.mubr.msk.f32.vlgmr.msra.gmra.mrb[0].mxu1 %vm43_vm1, %v21_v16 }
  0x16   :  { %289 = vmatprep.mubr.msk.f32.mxu0 %vm351_vm0, %v352_v6  ;;  %310 = vmatprep.mubr.msk.f32.mxu1 %vm351_vm0, %v352_v6 }
  0x19   :  { %290 = vmatmul.mubr.msk.f32.gmra.mrb[2].mxu0 %vm43_vm1, %v15_v17  ;;  %311 = vmatmul.mubr.msk.f32.gmra.mrb[2].mxu1 %vm43_vm1, %v22_v18 }
  0x1a   :  { %292 = vmatprep.mubr.msk.f32.mxu0 %vm351_vm0, %v352_v6  ;;  %313 = vmatprep.mubr.msk.f32.mxu1 %vm351_vm0, %v352_v6 }
  0x1d   :  { %293 = vmatmul.mubr.msk.f32.gmra.mrb[4].mxu0 %vm43_vm1, %v16_v19  ;;  %314 = vmatmul.mubr.msk.f32.gmra.mrb[4].mxu1 %vm43_vm1, %v23_v20 }
  0x1e   :  { %295 = vmatprep.mubr.msk.f32.mxu0 %vm351_vm0, %v352_v6  ;;  %316 = vmatprep.mubr.msk.f32.mxu1 %vm351_vm0, %v352_v6 }
  0x21   :  { %296 = vmatmul.mubr.msk.f32.gmra.mrb[6].mxu0 %vm43_vm1, %v17_v21  ;;  %317 = vmatmul.mubr.msk.f32.gmra.mrb[6].mxu1 %vm43_vm1, %v24_v22 }
  0x22   :  { %298 = vmatprep.mubr.msk.f32.mxu0 %vm351_vm0, %v352_v6  ;;  %319 = vmatprep.mubr.msk.f32.mxu1 %vm351_vm0, %v352_v6 }
  0x25   :  { %299 = vmatmul.mubr.msk.f32.gmra.mrb[8].mxu0 %vm43_vm1, %v18_v23  ;;  %320 = vmatmul.mubr.msk.f32.gmra.mrb[8].mxu1 %vm43_vm1, %v25_v24 }
  0x26   :  { %301 = vmatprep.mubr.msk.f32.mxu0 %vm351_vm0, %v352_v6  ;;  %322 = vmatprep.mubr.msk.f32.mxu1 %vm351_vm0, %v352_v6 }
  0x29   :  { %302 = vmatmul.mubr.msk.f32.gmra.mrb[10].mxu0 %vm43_vm1, %v19_v25  ;;  %323 = vmatmul.mubr.msk.f32.gmra.mrb[10].mxu1 %vm43_vm1, %v26_v26 }
  0x2a   :  { %304 = vmatprep.mubr.msk.f32.mxu0 %vm351_vm0, %v352_v6 }
  0x2d   :  { %305 = vmatmul.mubr.msk.f32.gmra.mrb[12].mxu0 %vm43_vm1, %v20_v27 }
  0xe8   :  { %v149_v29 = vpop.f32.mrb[0].mxu0  ;;  %v184_v30 = vpop.f32.mrb[0].mxu1 }
  0xe9   :  { %v150_v31 = vadd.f32 %v232_v28, %v149_v29  ;;  %v288_v32 = vpop.f32.mrb[1].mxu0  ;;  %v185_v33 = vadd.f32 %v232_v28, %v184_v30  ;;  %v309_v34 = vpop.f32.mrb[1].mxu1 }
  0xeb   :  { %214 = vst.msk [vmem:[%s537_s3] sm:$0xff] %vm213_vm2, %v150_v31  ;;  %221 = vst.msk [vmem:[%s537_s3 + $0x38] sm:$0xff] %vm213_vm2, %v185_v33 }
  0xec   :  { %v154_v35 = vpop.f32.mrb[2].mxu0  ;;  %v189_v36 = vpop.f32.mrb[2].mxu1 }
  0xed   :  { %v155_v37 = vadd.f32 %v232_v28, %v154_v35  ;;  %v291_v38 = vpop.f32.mrb[3].mxu0  ;;  %v190_v39 = vadd.f32 %v232_v28, %v189_v36  ;;  %v312_v40 = vpop.f32.mrb[3].mxu1 }
  0xef   :  { %215 = vst.msk [vmem:[%s537_s3 + $0x8] sm:$0xff] %vm213_vm2, %v155_v37  ;;  %222 = vst.msk [vmem:[%s537_s3 + $0x40] sm:$0xff] %vm213_vm2, %v190_v39 }
  0xf0   :  { %v159_v41 = vpop.f32.mrb[4].mxu0  ;;  %v194_v42 = vpop.f32.mrb[4].mxu1 }
  0xf1   :  { %v160_v43 = vadd.f32 %v232_v28, %v159_v41  ;;  %v294_v44 = vpop.f32.mrb[5].mxu0  ;;  %v195_v45 = vadd.f32 %v232_v28, %v194_v42  ;;  %v315_v46 = vpop.f32.mrb[5].mxu1 }
  0xf3   :  { %216 = vst.msk [vmem:[%s537_s3 + $0x10] sm:$0xff] %vm213_vm2, %v160_v43  ;;  %223 = vst.msk [vmem:[%s537_s3 + $0x48] sm:$0xff] %vm213_vm2, %v195_v45 }
  0xf4   :  { %v164_v47 = vpop.f32.mrb[6].mxu0  ;;  %v199_v48 = vpop.f32.mrb[6].mxu1 }
  0xf5   :  { %v165_v49 = vadd.f32 %v232_v28, %v164_v47  ;;  %v297_v50 = vpop.f32.mrb[7].mxu0  ;;  %v200_v51 = vadd.f32 %v232_v28, %v199_v48  ;;  %v318_v52 = vpop.f32.mrb[7].mxu1 }
  0xf7   :  { %217 = vst.msk [vmem:[%s537_s3 + $0x18] sm:$0xff] %vm213_vm2, %v165_v49  ;;  %224 = vst.msk [vmem:[%s537_s3 + $0x50] sm:$0xff] %vm213_vm2, %v200_v51 }
  0xf8   :  { %v169_v53 = vpop.f32.mrb[8].mxu0  ;;  %v204_v54 = vpop.f32.mrb[8].mxu1 }
  0xf9   :  { %v170_v55 = vadd.f32 %v232_v28, %v169_v53  ;;  %v300_v56 = vpop.f32.mrb[9].mxu0  ;;  %v205_v57 = vadd.f32 %v232_v28, %v204_v54  ;;  %v321_v58 = vpop.f32.mrb[9].mxu1 }
  0xfb   :  { %218 = vst.msk [vmem:[%s537_s3 + $0x20] sm:$0xff] %vm213_vm2, %v170_v55  ;;  %225 = vst.msk [vmem:[%s537_s3 + $0x58] sm:$0xff] %vm213_vm2, %v205_v57 }
  0xfc   :  { %v174_v59 = vpop.f32.mrb[10].mxu0  ;;  %v209_v60 = vpop.f32.mrb[10].mxu1 }
  0xfd   :  { %v175_v61 = vadd.f32 %v232_v28, %v174_v59  ;;  %v303_v62 = vpop.f32.mrb[11].mxu0  ;;  %v210_v63 = vadd.f32 %v232_v28, %v209_v60  ;;  %v324_v0 = vpop.f32.mrb[11].mxu1 }
  0xff   :  { %219 = vst.msk [vmem:[%s537_s3 + $0x28] sm:$0xff] %vm213_vm2, %v175_v61 }
 0x100   :  { %227 = vst.msk [vmem:[%s537_s3 + $0x60] sm:$0xf] %vm226_vm3, %v210_v63  ;;  %v179_v1 = vpop.f32.mrb[12].mxu0 }
 0x101   :  { %v180_v2 = vadd.f32 %v232_v28, %v179_v1  ;;  %v306_v3 = vpop.f32.mrb[13].mxu0 }
 0x103   :  { %220 = vst.msk [vmem:[%s537_s3 + $0x30] sm:$0xff] %vm213_vm2, %v180_v2 }

// kernel: _lambda_.17
= control target key start
LH: loop header
LB: loop body
LE: loop exit
PB: predicated region body
PF: predicated region fallthrough
CT: control target
= control target key end

     0   :  { %vm40_vm0 = vcmask 130048   ;;  %vm188_vm1 = vcmask 64512   ;;  %s587_s2 = inlined_call_operand.vmem [shape: f32[16,8], index: 2, kind: input, shape index: {}]   ;;  %s588_s1 = inlined_call_operand.vmem [shape: f32[64,16], index: 1, kind: input, shape index: {}]   ;;  %s589_s3 = inlined_call_operand.vmem [shape: f32[1,8], index: 3, kind: input, shape index: {}, may-alias: {3,5}]   ;;  %s590_s0 = inlined_call_operand.vmem [shape: f32[64,8], index: 0, kind: input, shape index: {}]   ;;  %s591_s4 = inlined_call_operand.vmem [shape: f32[1,8], index: 4, kind: input, shape index: {}]   ;;  %s592_s5 = inlined_call_operand.vmem [shape: f32[1,8], index: 5, kind: input, shape index: {}, may-alias: {3,5}]   ;;  %s593_s6 = inlined_call_operand.vmem [shape: f32[64,8], index: 6, kind: output, shape index: {}]  }
   0x1   :  { %v31_v0 = vld [vmem:[%s587_s2] sm:$0xff]  ;;  %v32_v1 = vld [vmem:[%s587_s2 + $0x8] sm:$0xff]  ;;  %v25_v7 = vld [vmem:[%s588_s1 + $0x10] sm:$0xff] }
   0x2   :  { %v23_v2 = vld [vmem:[%s588_s1] sm:$0xff]  ;;  %v371_v3 = vpack.c.bf16 %v32_v1, %v31_v0  ;;  %v24_v5 = vld [vmem:[%s588_s1 + $0x8] sm:$0xff]  ;;  %v29_v8 = vld [vmem:[%s588_s1 + $0x30] sm:$0xff] }
   0x3   :  { %359 = vmatprep.mubr.msk.f32.mxu0 %vm40_vm0, %v23_v2  ;;  %v27_v4 = vld [vmem:[%s588_s1 + $0x20] sm:$0xff]  ;;  %v28_v6 = vld [vmem:[%s588_s1 + $0x28] sm:$0xff]  ;;  %v26_v9 = vld [vmem:[%s588_s1 + $0x18] sm:$0xff] }
   0x4   :  { %365 = vmatprep.mubr.msk.f32.mxu1 %vm40_vm0, %v27_v4  ;;  %372 = vmatprep.subr.bf16.mxu0 %v371_v3  ;;  %v30_v10 = vld [vmem:[%s588_s1 + $0x38] sm:$0xff]  ;;  %v334_v11 = vld [vmem:[%s589_s3] ss:$0 sm:$0xff]  ;;  %v175_v14 = vld [vmem:[%s590_s0 + $0x28] sm:$0xff] }
   0x5   :  { %375 = vmatprep.subr.bf16.mxu1 %v371_v3  ;;  %374 = vmatpush3.bf16.msra.mxu0 %v371_v3  ;;  %v171_v15 = vld [vmem:[%s590_s0 + $0x8] sm:$0xff]  ;;  %v170_v21 = vld [vmem:[%s590_s0] sm:$0xff]  ;;  %v173_v26 = vld [vmem:[%s590_s0 + $0x18] sm:$0xff] }
   0x6   :  { %376 = vmatpush3.bf16.msra.mxu1 %v371_v3  ;;  %v172_v34 = vld [vmem:[%s590_s0 + $0x10] sm:$0xff]  ;;  %v174_v36 = vld [vmem:[%s590_s0 + $0x20] sm:$0xff]  ;;  %v177_v41 = vld [vmem:[%s590_s0 + $0x38] sm:$0xff] }
   0x7   :  { %v176_v42 = vld [vmem:[%s590_s0 + $0x30] sm:$0xff] }
   0x8   :  { %360 = vmatmul.mubr.msk.f32.vlgmr.msra.gmra.mrb[0].mxu0 %vm40_vm0, %v24_v5 }
   0x9   :  { %366 = vmatmul.mubr.msk.f32.vlgmr.msra.gmra.mrb[0].mxu1 %vm40_vm0, %v28_v6  ;;  %362 = vmatprep.mubr.msk.f32.mxu0 %vm40_vm0, %v25_v7 }
   0xa   :  { %368 = vmatprep.mubr.msk.f32.mxu1 %vm40_vm0, %v29_v8 }
   0xc   :  { %363 = vmatmul.mubr.msk.f32.gmra.mrb[2].mxu0 %vm40_vm0, %v26_v9 }
   0xd   :  { %369 = vmatmul.mubr.msk.f32.gmra.mrb[2].mxu1 %vm40_vm0, %v30_v10 }
  0xdb   :  { %v361_v12 = vpop.f32.mrb[0].mxu0 }
  0xdc   :  { %v367_v13 = vpop.f32.mrb[0].mxu1  ;;  %v137_v16 = vadd.f32 %v361_v12, %v334_v11  ;;  %v131_v18 = vpop.f32.mrb[1].mxu0 }
  0xdd   :  { %v157_v17 = vadd.f32 %v367_v13, %v334_v11  ;;  %v151_v19 = vpop.f32.mrb[1].mxu1  ;;  %v132_v20 = vadd.f32 %v334_v11, %v131_v18 }
  0xde   :  { %v179_v23 = vadd.f32 %v171_v15, %v137_v16  ;;  %v152_v25 = vadd.f32 %v334_v11, %v151_v19 }
  0xdf   :  { %v183_v22 = vadd.f32 %v175_v14, %v157_v17  ;;  %v364_v24 = vpop.f32.mrb[2].mxu0  ;;  %v178_v32 = vadd.f32 %v170_v21, %v132_v20 }
  0xe0   :  { %v370_v27 = vpop.f32.mrb[2].mxu1  ;;  %v147_v28 = vadd.f32 %v364_v24, %v334_v11  ;;  %v192_v30 = vsel %vm188_vm1, %v179_v23, 0.0  ;;  %v141_v31 = vpop.f32.mrb[3].mxu0  ;;  %v182_v45 = vadd.f32 %v174_v36, %v152_v25 }
  0xe1   :  { %v204_v29 = vsel %vm188_vm1, %v183_v22, 0.0  ;;  %v161_v33 = vpop.f32.mrb[3].mxu1  ;;  %193 = vadd.xlane.f32.xlu0 %v192_v30  ;;  %v142_v35 = vadd.f32 %v334_v11, %v141_v31  ;;  %v167_v38 = vadd.f32 %v370_v27, %v334_v11  ;;  %v189_v44 = vsel %vm188_vm1, %v178_v32, 0.0 }
  0xe2   :  { %205 = vadd.xlane.f32.xlu1 %v204_v29  ;;  %v181_v37 = vadd.f32 %v173_v26, %v147_v28  ;;  %v162_v39 = vadd.f32 %v334_v11, %v161_v33  ;;  %v201_v49 = vsel %vm188_vm1, %v182_v45, 0.0 }
  0xe3   :  { %v180_v40 = vadd.f32 %v172_v34, %v142_v35  ;;  %v185_v47 = vadd.f32 %v177_v41, %v167_v38 }
  0xe4   :  { %v198_v43 = vsel %vm188_vm1, %v181_v37, 0.0  ;;  %v184_v48 = vadd.f32 %v176_v42, %v162_v39 }
  0xe5   :  { %190 = vadd.xlane.f32.xlu0 %v189_v44  ;;  %v195_v46 = vsel %vm188_vm1, %v180_v40, 0.0  ;;  %v210_v50 = vsel %vm188_vm1, %v185_v47, 0.0 }
  0xe6   :  { %199 = vadd.xlane.f32.xlu1 %v198_v43  ;;  %v207_v51 = vsel %vm188_vm1, %v184_v48, 0.0 }
  0xe9   :  { %202 = vadd.xlane.f32.xlu0 %v201_v49 }
  0xea   :  { %196 = vadd.xlane.f32.xlu1 %v195_v46 }
  0xed   :  { %208 = vadd.xlane.f32.xlu0 %v207_v51 }
  0xee   :  { %211 = vadd.xlane.f32.xlu1 %v210_v50 }
 0x16e   :  { %v194_v53 = vpop.xlane.xlu0 %193 }
 0x16f   :  { %v206_v52 = vpop.xlane.xlu1 %205  ;;  %v215_v55 = vmul.f32 0.125, %v194_v53  ;;  %v344_v53 = vld [vmem:[%s592_s5] ss:$0 sm:$0xff] }
 0x170   :  { %v219_v54 = vmul.f32 0.125, %v206_v52 }
 0x171   :  { %v503_v57 = vsub.f32 %v179_v23, %v215_v55 }
 0x172   :  { %v501_v56 = vsub.f32 %v183_v22, %v219_v54  ;;  %v191_v59 = vpop.xlane.xlu0 %190 }
 0x173   :  { %v200_v58 = vpop.xlane.xlu1 %199  ;;  %v214_v61 = vmul.f32 0.125, %v191_v59  ;;  %v231_v62 = vmul.f32 %v503_v57, %v503_v57 }
 0x174   :  { %v217_v60 = vmul.f32 0.125, %v200_v58  ;;  %v235_v2 = vmul.f32 %v501_v56, %v501_v56 }
 0x175   :  { %v509_v0 = vsub.f32 %v178_v32, %v214_v61  ;;  %v241_v1 = vsel %vm188_vm1, %v231_v62, 0.0 }
 0x176   :  { %v507_v63 = vsub.f32 %v181_v37, %v217_v60  ;;  %242 = vadd.xlane.f32.xlu1 %v241_v1  ;;  %v203_v4 = vpop.xlane.xlu0 %202  ;;  %v253_v11 = vsel %vm188_vm1, %v235_v2, 0.0 }
 0x177   :  { %v197_v3 = vpop.xlane.xlu1 %196  ;;  %v218_v6 = vmul.f32 0.125, %v203_v4  ;;  %v230_v7 = vmul.f32 %v509_v0, %v509_v0 }
 0x178   :  { %v216_v5 = vmul.f32 0.125, %v197_v3  ;;  %v233_v8 = vmul.f32 %v507_v63, %v507_v63 }
 0x179   :  { %v520_v10 = vsub.f32 %v182_v45, %v218_v6  ;;  %v238_v12 = vsel %vm188_vm1, %v230_v7, 0.0 }
 0x17a   :  { %v518_v9 = vsub.f32 %v180_v40, %v216_v5  ;;  %254 = vadd.xlane.f32.xlu1 %v253_v11  ;;  %239 = vadd.xlane.f32.xlu0 %v238_v12  ;;  %v209_v14 = vpop.xlane.xlu0 %208  ;;  %v247_v18 = vsel %vm188_vm1, %v233_v8, 0.0 }
 0x17b   :  { %v212_v13 = vpop.xlane.xlu1 %211  ;;  %v220_v16 = vmul.f32 0.125, %v209_v14  ;;  %v234_v17 = vmul.f32 %v520_v10, %v520_v10 }
 0x17c   :  { %v221_v15 = vmul.f32 0.125, %v212_v13  ;;  %v232_v22 = vmul.f32 %v518_v9, %v518_v9 }
 0x17d   :  { %v529_v20 = vsub.f32 %v184_v48, %v220_v16  ;;  %v250_v21 = vsel %vm188_vm1, %v234_v17, 0.0  ;;  %v343_v48 = vld [vmem:[%s591_s4] ss:$0 sm:$0xff] }
 0x17e   :  { %v527_v19 = vsub.f32 %v185_v47, %v221_v15  ;;  %248 = vadd.xlane.f32.xlu1 %v247_v18  ;;  %251 = vadd.xlane.f32.xlu0 %v250_v21  ;;  %v244_v25 = vsel %vm188_vm1, %v232_v22, 0.0 }
 0x17f   :  { %v236_v26 = vmul.f32 %v529_v20, %v529_v20 }
 0x180   :  { %v237_v23 = vmul.f32 %v527_v19, %v527_v19 }
 0x181   :  { %v256_v27 = vsel %vm188_vm1, %v236_v26, 0.0 }
 0x182   :  { %v259_v24 = vsel %vm188_vm1, %v237_v23, 0.0  ;;  %245 = vadd.xlane.f32.xlu0 %v244_v25 }
 0x183   :  { %260 = vadd.xlane.f32.xlu1 %v259_v24 }
 0x186   :  { %257 = vadd.xlane.f32.xlu0 %v256_v27 }
 0x203   :  { %v243_v28 = vpop.xlane.xlu1 %242 }
 0x204   :  { %v263_v29 = vmul.f32 0.125, %v243_v28 }
 0x206   :  { %v271_v30 = vadd.f32 1e-05, %v263_v29 }
 0x207   :  { %v255_v31 = vpop.xlane.xlu1 %254  ;;  %v240_v32 = vpop.xlane.xlu0 %239 }
 0x208   :  { %377 = vrsqrt.f32 %v271_v30  ;;  %v267_v33 = vmul.f32 0.125, %v255_v31  ;;  %v262_v34 = vmul.f32 0.125, %v240_v32 }
 0x20a   :  { %v275_v35 = vadd.f32 1e-05, %v267_v33  ;;  %v270_v36 = vadd.f32 1e-05, %v262_v34 }
 0x20b   :  { %v249_v37 = vpop.xlane.xlu1 %248  ;;  %v252_v38 = vpop.xlane.xlu0 %251 }
 0x20c   :  { %379 = vrsqrt.f32 %v275_v35  ;;  %v265_v39 = vmul.f32 0.125, %v249_v37  ;;  %v266_v40 = vmul.f32 0.125, %v252_v38 }
 0x20d   :  { %381 = vrsqrt.f32 %v270_v36 }
 0x20e   :  { %v273_v41 = vadd.f32 1e-05, %v265_v39  ;;  %v274_v42 = vadd.f32 1e-05, %v266_v40 }
 0x20f   :  { %v246_v44 = vpop.xlane.xlu0 %245 }
 0x210   :  { %v261_v43 = vpop.xlane.xlu1 %260  ;;  %383 = vrsqrt.f32 %v273_v41  ;;  %v264_v46 = vmul.f32 0.125, %v246_v44 }
 0x211   :  { %v269_v45 = vmul.f32 0.125, %v261_v43  ;;  %385 = vrsqrt.f32 %v274_v42 }
 0x212   :  { %v378_v47 = vpop.eup %377  ;;  %v272_v50 = vadd.f32 1e-05, %v264_v46 }
 0x213   :  { %v277_v49 = vadd.f32 1e-05, %v269_v45  ;;  %v287_v51 = vmul.f32 %v378_v47, %v503_v57  ;;  %v258_v52 = vpop.xlane.xlu0 %257 }
 0x214   :  { %v268_v54 = vmul.f32 0.125, %v258_v52 }
 0x215   :  { %387 = vrsqrt.f32 %v277_v49  ;;  %v301_v55 = vmul.f32 %v343_v48, %v287_v51 }
 0x216   :  { %389 = vrsqrt.f32 %v272_v50  ;;  %v380_v58 = vpop.eup %379  ;;  %v276_v59 = vadd.f32 1e-05, %v268_v54 }
 0x217   :  { %v382_v60 = vpop.eup %381  ;;  %v315_v61 = vadd.f32 %v344_v53, %v301_v55  ;;  %v291_v62 = vmul.f32 %v380_v58, %v501_v56 }
 0x218   :  { %v286_v1 = vmul.f32 %v382_v60, %v509_v0  ;;  %391 = vrsqrt.f32 %v276_v59 }
 0x219   :  { %323 = vst.msk [vmem:[%s593_s6 + $0x8] sm:$0xff] %vm188_vm1, %v315_v61  ;;  %v305_v57 = vmul.f32 %v343_v48, %v291_v62 }
 0x21a   :  { %v384_v2 = vpop.eup %383  ;;  %v300_v3 = vmul.f32 %v343_v48, %v286_v1 }
 0x21b   :  { %v386_v4 = vpop.eup %385  ;;  %v319_v5 = vadd.f32 %v344_v53, %v305_v57  ;;  %v289_v6 = vmul.f32 %v384_v2, %v507_v63 }
 0x21c   :  { %v314_v7 = vadd.f32 %v344_v53, %v300_v3  ;;  %v290_v8 = vmul.f32 %v386_v4, %v520_v10 }
 0x21d   :  { %327 = vst.msk [vmem:[%s593_s6 + $0x28] sm:$0xff] %vm188_vm1, %v319_v5  ;;  %v303_v56 = vmul.f32 %v343_v48, %v289_v6 }
 0x21e   :  { %322 = vst.msk [vmem:[%s593_s6] sm:$0xff] %vm188_vm1, %v314_v7  ;;  %v304_v11 = vmul.f32 %v343_v48, %v290_v8 }
 0x21f   :  { %v388_v0 = vpop.eup %387  ;;  %v317_v13 = vadd.f32 %v344_v53, %v303_v56 }
 0x220   :  { %v390_v12 = vpop.eup %389  ;;  %v293_v63 = vmul.f32 %v388_v0, %v527_v19  ;;  %v318_v14 = vadd.f32 %v344_v53, %v304_v11 }
 0x221   :  { %v288_v10 = vmul.f32 %v390_v12, %v518_v9  ;;  %325 = vst.msk [vmem:[%s593_s6 + $0x18] sm:$0xff] %vm188_vm1, %v317_v13 }
 0x222   :  { %v307_v15 = vmul.f32 %v343_v48, %v293_v63  ;;  %v392_v16 = vpop.eup %391  ;;  %326 = vst.msk [vmem:[%s593_s6 + $0x20] sm:$0xff] %vm188_vm1, %v318_v14 }
 0x223   :  { %v302_v17 = vmul.f32 %v343_v48, %v288_v10  ;;  %v292_v21 = vmul.f32 %v392_v16, %v529_v20 }
 0x224   :  { %v321_v18 = vadd.f32 %v344_v53, %v307_v15 }
 0x225   :  { %v316_v19 = vadd.f32 %v344_v53, %v302_v17  ;;  %v306_v9 = vmul.f32 %v343_v48, %v292_v21 }
 0x226   :  { %329 = vst.msk [vmem:[%s593_s6 + $0x38] sm:$0xff] %vm188_vm1, %v321_v18 }
 0x227   :  { %324 = vst.msk [vmem:[%s593_s6 + $0x10] sm:$0xff] %vm188_vm1, %v316_v19  ;;  %v320_v22 = vadd.f32 %v344_v53, %v306_v9 }
 0x229   :  { %328 = vst.msk [vmem:[%s593_s6 + $0x30] sm:$0xff] %vm188_vm1, %v320_v22 }

// kernel: _lambda_.16
= control target key start
LH: loop header
LB: loop body
LE: loop exit
PB: predicated region body
PF: predicated region fallthrough
CT: control target
= control target key end

     0   :  { %vm74_vm0 = vcmask 64512   ;;  %vm500_vm1 = vcmask 31744   ;;  %vm670_vm3 = vcmask 523264   ;;  %vm1348_vm4 = vcmask 1043456   ;;  %s3328_s5 = inlined_call_operand.vmem [shape: f32[8,8], index: 5, kind: input, shape index: {}]   ;;  %s3329_s1 = inlined_call_operand.vmem [shape: f32[64,8], index: 1, kind: input, shape index: {}]   ;;  %s3330_s4 = inlined_call_operand.vmem [shape: f32[8,8], index: 4, kind: input, shape index: {}]   ;;  %s3331_s0 = inlined_call_operand.vmem [shape: f32[64,8], index: 0, kind: input, shape index: {}, may-alias: {0,2}]   ;;  %s3332_s9 = inlined_call_operand.vmem [shape: f32[1,8], index: 9, kind: input, shape index: {}, may-alias: {8,9,10,11,13}]   ;;  %s3333_s8 = inlined_call_operand.vmem [shape: f32[1,8], index: 8, kind: input, shape index: {}, may-alias: {8,9,10,11,13}]   ;;  %s3334_s6 = inlined_call_operand.vmem [shape: f32[8,8], index: 6, kind: input, shape index: {}]   ;;  %s3335_s2 = inlined_call_operand.vmem [shape: f32[64,8], index: 2, kind: input, shape index: {}, may-alias: {0,2}]   ;;  %s3336_s3 = inlined_call_operand.vmem [shape: f32[64,64], index: 3, kind: input, shape index: {}]   ;;  %s3337_s10 = inlined_call_operand.vmem [shape: f32[1,8], index: 10, kind: input, shape index: {}, may-alias: {8,9,10,11,13}]   ;;  %s3338_s7 = inlined_call_operand.vmem [shape: f32[8,8], index: 7, kind: input, shape index: {}]   ;;  %s3339_s11 = inlined_call_operand.vmem [shape: f32[1,8], index: 11, kind: input, shape index: {}, may-alias: {8,9,10,11,13}]   ;;  %s3340_s14 = inlined_call_operand.vmem [shape: f32[8,16], index: 14, kind: input, shape index: {}]   ;;  %s3341_s12 = inlined_call_operand.vmem [shape: f32[1,8], index: 12, kind: input, shape index: {}]   ;;  %s3342_s13 = inlined_call_operand.vmem [shape: f32[1,8], index: 13, kind: input, shape index: {}, may-alias: {8,9,10,11,13}]   ;;  %s3343_s16 = inlined_call_operand.vmem [shape: f32[64,8], index: 16, kind: output, shape index: {0}]   ;;  %s3344_s15 = inlined_call_operand.vmem [shape: f32[1,16], index: 15, kind: input, shape index: {}]   ;;  %s3345_s17 = inlined_call_operand.vmem [shape: f32[64,16], index: 17, kind: output, shape index: {1}]  }
   0x1   :  { %3347 = sst [smem:[#allocation2_spill]] %s3328_s5  ;;  %v63_v4 = vld [vmem:[%s3330_s4] sm:$0xff]  ;;  %v56_v6 = vld [vmem:[%s3331_s0 + $0x8] sm:$0xff]  ;;  %v57_v8 = vld [vmem:[%s3331_s0 + $0x10] sm:$0xff]  ;;  %vm1890_vm5 = vcmask 130048  }
   0x2   :  { %3348 = sst [smem:[#allocation3_spill]] %s3329_s1  ;;  %s3349_s26 = sld [smem:[#allocation2_spill]]  ;;  %v55_v5 = vld [vmem:[%s3331_s0] sm:$0xff]  ;;  %2130 = vmatprep.subr.mxu0 %v63_v4  ;;  %v58_v10 = vld [vmem:[%s3331_s0 + $0x18] sm:$0xff]  ;;  %v60_v14 = vld [vmem:[%s3331_s0 + $0x28] sm:$0xff] }
   0x3   :  { %s3350_s29 = sld [smem:[#allocation3_spill]]  ;;  %2131 = vmatpush3.msra.mxu0 %v63_v4  ;;  %2132 = vmatprep.mubr.msk.f32.mxu0 %vm74_vm0, %v55_v5  ;;  %v59_v12 = vld [vmem:[%s3331_s0 + $0x20] sm:$0xff]  ;;  %v61_v16 = vld [vmem:[%s3331_s0 + $0x30] sm:$0xff]  ;;  %v62_v17 = vld [vmem:[%s3331_s0 + $0x38] sm:$0xff] }
   0x4   :  { %2133 = vmatmul.mubr.msk.f32.vlgmr.msra.gmra.mrb[0].mxu0 %vm74_vm0, %v56_v6  ;;  %v1916_v18 = vld [vmem:[%s3332_s9] ss:$0 sm:$0xff]  ;;  %vm2716_vm2 = vmpackc.low %vm500_vm1, %vm500_vm1  ;;  %v349_v63 = vld [vmem:[%s3335_s2 + $0x8] sm:$0xff] }
   0x5   :  { %2135 = vmatprep.mubr.msk.f32.mxu0 %vm74_vm0, %v57_v8  ;;  %v1907_v23 = vld [vmem:[%s3333_s8] ss:$0 sm:$0xff]  ;;  %v354_v4 = vld [vmem:[%s3335_s2 + $0x30] sm:$0xff]  ;;  %v355_v5 = vld [vmem:[%s3335_s2 + $0x38] sm:$0xff] }
   0x6   :  { %v65_v61 = vld [vmem:[%s3334_s6] sm:$0xff] }
   0x7   :  { %v348_v62 = vld [vmem:[%s3335_s2] sm:$0xff]  ;;  %2158 = vmatprep.subr.mxu0 %v65_v61 }
   0x8   :  { %v64_v0 = vld [vmem:[%s3349_s26] sm:$0xff]  ;;  %2136 = vmatmul.mubr.msk.f32.gmra.mrb[2].mxu0 %vm74_vm0, %v58_v10 }
   0x9   :  { %v204_v1 = vld [vmem:[%s3350_s29] sm:$0xff]  ;;  %v205_v2 = vld [vmem:[%s3350_s29 + $0x8] sm:$0xff]  ;;  %2144 = vmatprep.subr.mxu1 %v64_v0  ;;  %v206_v3 = vld [vmem:[%s3350_s29 + $0x10] sm:$0xff]  ;;  %2138 = vmatprep.mubr.msk.f32.mxu0 %vm74_vm0, %v59_v12 }
   0xa   :  { %2146 = vmatprep.mubr.msk.f32.mxu1 %vm74_vm0, %v204_v1  ;;  %2145 = vmatpush3.msra.mxu1 %v64_v0  ;;  %v207_v7 = vld [vmem:[%s3350_s29 + $0x18] sm:$0xff]  ;;  %v208_v9 = vld [vmem:[%s3350_s29 + $0x20] sm:$0xff]  ;;  %v209_v11 = vld [vmem:[%s3350_s29 + $0x28] sm:$0xff] }
   0xb   :  { %2147 = vmatmul.mubr.msk.f32.vlgmr.msra.gmra.mrb[0].mxu1 %vm74_vm0, %v205_v2  ;;  %v210_v13 = vld [vmem:[%s3350_s29 + $0x30] sm:$0xff]  ;;  %v211_v15 = vld [vmem:[%s3350_s29 + $0x38] sm:$0xff]  ;;  %2159 = vmatpush3.msra.mxu0 %v65_v61  ;;  %v352_v2 = vld [vmem:[%s3335_s2 + $0x20] sm:$0xff] }
   0xc   :  { %2149 = vmatprep.mubr.msk.f32.mxu1 %vm74_vm0, %v206_v3  ;;  %2139 = vmatmul.mubr.msk.f32.gmra.mrb[4].mxu0 %vm74_vm0, %v60_v14  ;;  %v350_v0 = vld [vmem:[%s3335_s2 + $0x10] sm:$0xff]  ;;  %v351_v1 = vld [vmem:[%s3335_s2 + $0x18] sm:$0xff]  ;;  %v353_v3 = vld [vmem:[%s3335_s2 + $0x28] sm:$0xff] }
   0xd   :  { %2141 = vmatprep.mubr.msk.f32.mxu0 %vm74_vm0, %v61_v16  ;;  %v2834_v8 = vld [vmem:[%s3336_s3] sm:$0xff]  ;;  %v2845_v14 = vld [vmem:[%s3336_s3 + $0x18] sm:$0xff] }
   0xf   :  { %2150 = vmatmul.mubr.msk.f32.gmra.mrb[2].mxu1 %vm74_vm0, %v207_v7 }
  0x10   :  { %2152 = vmatprep.mubr.msk.f32.mxu1 %vm74_vm0, %v208_v9  ;;  %2142 = vmatmul.mubr.msk.f32.gmra.mrb[6].mxu0 %vm74_vm0, %v62_v17  ;;  %v2850_v17 = vld [vmem:[%s3336_s3 + $0x10] sm:$0xff] }
  0x11   :  { %2160 = vmatprep.mubr.msk.f32.mxu0 %vm74_vm0, %v348_v62 }
  0x13   :  { %2153 = vmatmul.mubr.msk.f32.gmra.mrb[4].mxu1 %vm74_vm0, %v209_v11  ;;  %v2839_v11 = vld [vmem:[%s3336_s3 + $0x8] sm:$0xff] }
  0x14   :  { %2155 = vmatprep.mubr.msk.f32.mxu1 %vm74_vm0, %v210_v13  ;;  %2161 = vmatmul.mubr.msk.f32.vlgmr.msra.gmra.mrb[8].mxu0 %vm74_vm0, %v349_v63 }
  0x15   :  { %2163 = vmatprep.mubr.msk.f32.mxu0 %vm74_vm0, %v350_v0 }
  0x17   :  { %2156 = vmatmul.mubr.msk.f32.gmra.mrb[6].mxu1 %vm74_vm0, %v211_v15 }
  0x18   :  { %2164 = vmatmul.mubr.msk.f32.gmra.mrb[10].mxu0 %vm74_vm0, %v351_v1 }
  0x19   :  { %2166 = vmatprep.mubr.msk.f32.mxu0 %vm74_vm0, %v352_v2 }
  0x1c   :  { %2167 = vmatmul.mubr.msk.f32.gmra.mrb[12].mxu0 %vm74_vm0, %v353_v3 }
  0x1d   :  { %2169 = vmatprep.mubr.msk.f32.mxu0 %vm74_vm0, %v354_v4 }
  0x20   :  { %2170 = vmatmul.mubr.msk.f32.gmra.mrb[14].mxu0 %vm74_vm0, %v355_v5 }
  0xd7   :  { %v2134_v25 = vpop.f32.mrb[0].mxu0 }
  0xd8   :  { %v165_v29 = vpop.f32.mrb[1].mxu0  ;;  %v2770_v55 = vadd.f32 %v2134_v25, %v1907_v23 }
  0xd9   :  { %v2726_v32 = vadd.f32 %v1907_v23, %v165_v29 }
  0xdb   :  { %2188 = vmatprep.mubr.msk.f32.mxu1 %vm500_vm1, %v2726_v32  ;;  %v2137_v34 = vpop.f32.mrb[2].mxu0 }
  0xdc   :  { %v175_v38 = vpop.f32.mrb[3].mxu0  ;;  %v2772_v56 = vadd.f32 %v2137_v34, %v1907_v23 }
  0xdd   :  { %v2768_v54 = vadd.f32 %v1907_v23, %v175_v38 }
  0xde   :  { %v2148_v19 = vpop.f32.mrb[0].mxu1 }
  0xdf   :  { %v2707_v20 = vadd.f32 %v2148_v19, %v1916_v18  ;;  %v309_v21 = vpop.f32.mrb[1].mxu1  ;;  %v2140_v42 = vpop.f32.mrb[4].mxu0 }
  0xe0   :  { %v2709_v22 = vadd.f32 %v1916_v18, %v309_v21  ;;  %v185_v46 = vpop.f32.mrb[5].mxu0  ;;  %v2780_v58 = vadd.f32 %v2140_v42, %v1907_v23 }
  0xe1   :  { %v2778_v57 = vadd.f32 %v1907_v23, %v185_v46  ;;  %v2884_v46 = vld [vmem:[%s3336_s3 + $0x38] sm:$0xff] }
  0xe2   :  { %v2415_v26 = vpack.i.bf16 %v2707_v20, %v2709_v22  ;;  %v2326_v27 = vpack.c.bf16 %v2707_v20, %v2709_v22  ;;  %v2151_v28 = vpop.f32.mrb[2].mxu1 }
  0xe3   :  { %v2724_v30 = vadd.f32 %v2151_v28, %v1916_v18  ;;  %v319_v31 = vpop.f32.mrb[3].mxu1  ;;  %v2143_v50 = vpop.f32.mrb[6].mxu0  ;;  %v2863_v28 = vld [vmem:[%s3336_s3 + $0x28] sm:$0xff] }
  0xe4   :  { %2328 = vmatprep.subr.msk.bf16.mxu1 %vm2716_vm2, %v2326_v27  ;;  %v2730_v33 = vadd.f32 %v1916_v18, %v319_v31  ;;  %v195_v53 = vpop.f32.mrb[7].mxu0  ;;  %v2788_v60 = vadd.f32 %v2143_v50, %v1907_v23 }
  0xe5   :  { %2331 = vmatpush3.bf16.xpose.msk.msra.mxu1 %vm2716_vm2, %v2326_v27  ;;  %v2786_v59 = vadd.f32 %v1907_v23, %v195_v53 }
  0xe6   :  { %v2420_v35 = vpack.i.bf16 %v2724_v30, %v2730_v33  ;;  %v2332_v36 = vpack.c.bf16 %v2724_v30, %v2730_v33  ;;  %v2154_v37 = vpop.f32.mrb[4].mxu1 }
  0xe7   :  { %v2740_v39 = vadd.f32 %v2154_v37, %v1916_v18  ;;  %v329_v40 = vpop.f32.mrb[5].mxu1 }
  0xe8   :  { %2334 = vmatprep.subr.msk.bf16.mxu1 %vm2716_vm2, %v2332_v36  ;;  %v2744_v41 = vadd.f32 %v1916_v18, %v329_v40 }
  0xea   :  { %v2425_v43 = vpack.i.bf16 %v2740_v39, %v2744_v41  ;;  %v2338_v44 = vpack.c.bf16 %v2740_v39, %v2744_v41  ;;  %v2157_v45 = vpop.f32.mrb[6].mxu1 }
  0xeb   :  { %v2750_v47 = vadd.f32 %v2157_v45, %v1916_v18  ;;  %v339_v48 = vpop.f32.mrb[7].mxu1 }
  0xec   :  { %v2752_v49 = vadd.f32 %v1916_v18, %v339_v48 }
  0xed   :  { %2337 = vmatpush3.bf16.xpose.msk.msra.mxu1 %vm2716_vm2, %v2332_v36  ;;  %v2870_v36 = vld [vmem:[%s3336_s3 + $0x20] sm:$0xff] }
  0xee   :  { %2340 = vmatprep.subr.msk.bf16.mxu1 %vm2716_vm2, %v2338_v44  ;;  %v2430_v51 = vpack.i.bf16 %v2750_v47, %v2752_v49  ;;  %v2344_v52 = vpack.c.bf16 %v2750_v47, %v2752_v49 }
  0xf5   :  { %2343 = vmatpush3.bf16.xpose.msk.msra.mxu1 %vm2716_vm2, %v2338_v44 }
  0xf6   :  { %2346 = vmatprep.subr.msk.bf16.mxu1 %vm2716_vm2, %v2344_v52 }
  0xfd   :  { %2349 = vmatpush3.bf16.xpose.msk.msra.mxu1 %vm2716_vm2, %v2344_v52  ;;  %v2889_v52 = vld [vmem:[%s3336_s3 + $0x30] sm:$0xff] }
 0x104   :  { %2189 = vmatmul.mubr.msk.f32.vlgmr.msra.gmra.mrb[8].mxu1 %vm500_vm1, %v2770_v55 }
 0x105   :  { %2191 = vmatprep.mubr.msk.f32.mxu1 %vm500_vm1, %v2768_v54 }
 0x108   :  { %2192 = vmatmul.mubr.msk.f32.gmra.mrb[10].mxu1 %vm500_vm1, %v2772_v56 }
 0x109   :  { %2194 = vmatprep.mubr.msk.f32.mxu1 %vm500_vm1, %v2778_v57 }
 0x10c   :  { %2195 = vmatmul.mubr.msk.f32.gmra.mrb[12].mxu1 %vm500_vm1, %v2780_v58 }
 0x10d   :  { %2197 = vmatprep.mubr.msk.f32.mxu1 %vm500_vm1, %v2786_v59 }
 0x110   :  { %2198 = vmatmul.mubr.msk.f32.gmra.mrb[14].mxu1 %vm500_vm1, %v2788_v60 }
 0x1d7   :  { %v2190_v6 = vpop.f32.mrb[8].mxu1 }
 0x1d8   :  { %v615_v7 = vpop.f32.mrb[9].mxu1  ;;  %v655_v9 = vmul.f32 0.5, %v2190_v6 }
 0x1d9   :  { %v654_v10 = vmul.f32 0.5, %v615_v7 }
 0x1da   :  { %v663_v21 = vadd.f32 %v655_v9, %v2839_v11 }
 0x1db   :  { %v2193_v12 = vpop.f32.mrb[10].mxu1  ;;  %v662_v13 = vadd.f32 %v654_v10, %v2834_v8  ;;  %v2162_v10 = vpop.f32.mrb[8].mxu0 }
 0x1dc   :  { %v657_v15 = vmul.f32 0.5, %v2193_v12  ;;  %v625_v16 = vpop.f32.mrb[11].mxu1  ;;  %v674_v38 = vsel %vm670_vm3, %v663_v21, -inf  ;;  %v1925_v12 = vld [vmem:[%s3337_s10] ss:$0 sm:$0xff]  ;;  %s2543_s10 = smov 124  }
 0x1dd   :  { %v671_v18 = vsel %vm670_vm3, %v662_v13, -inf  ;;  %v656_v19 = vmul.f32 0.5, %v625_v16  ;;  %v2908_v16 = vadd.f32 %v2162_v10, %v1925_v12 }
 0x1de   :  { %672 = vmax.xlane.f32.xlu0 %v671_v18  ;;  %v2855_v23 = vadd.f32 %v657_v15, %v2845_v14  ;;  %v453_v15 = vpop.f32.mrb[9].mxu0 }
 0x1df   :  { %v2196_v25 = vpop.f32.mrb[12].mxu1  ;;  %v2858_v27 = vadd.f32 %v656_v19, %v2850_v17  ;;  %v2910_v18 = vadd.f32 %v1925_v12, %v453_v15  ;;  %v2165_v19 = vpop.f32.mrb[10].mxu0 }
 0x1e0   :  { %v659_v29 = vmul.f32 0.5, %v2196_v25  ;;  %v635_v31 = vpop.f32.mrb[13].mxu1  ;;  %v680_v34 = vsel %vm670_vm3, %v2855_v23, -inf  ;;  %v2912_v25 = vadd.f32 %v2165_v19, %v1925_v12 }
 0x1e1   :  { %v658_v37 = vmul.f32 0.5, %v635_v31  ;;  %681 = vmax.xlane.f32.xlu1 %v680_v34  ;;  %v677_v40 = vsel %vm670_vm3, %v2858_v27, -inf  ;;  %v2350_v31 = vpack.c.bf16 %v2908_v16, %v2910_v18 }
 0x1e2   :  { %675 = vmax.xlane.f32.xlu0 %v674_v38  ;;  %v2876_v42 = vadd.f32 %v659_v29, %v2863_v28 }
 0x1e3   :  { %v2199_v44 = vpop.f32.mrb[14].mxu1  ;;  %v2879_v45 = vadd.f32 %v658_v37, %v2870_v36  ;;  %2351 = vmatprep.subr.bf16.mxu0 %v2350_v31 }
 0x1e4   :  { %v661_v48 = vmul.f32 0.5, %v2199_v44  ;;  %v645_v50 = vpop.f32.mrb[15].mxu1  ;;  %v686_v62 = vsel %vm670_vm3, %v2876_v42, -inf  ;;  %2353 = vmatpush3.bf16.msra.mxu0 %v2350_v31 }
 0x1e5   :  { %v660_v53 = vmul.f32 0.5, %v645_v50  ;;  %678 = vmax.xlane.f32.xlu1 %v677_v40  ;;  %v683_v61 = vsel %vm670_vm3, %v2879_v45, -inf }
 0x1e6   :  { %684 = vmax.xlane.f32.xlu0 %v683_v61  ;;  %v2896_v63 = vadd.f32 %v661_v48, %v2884_v46 }
 0x1e7   :  { %v2899_v0 = vadd.f32 %v660_v53, %v2889_v52 }
 0x1e8   :  { %v692_v2 = vsel %vm670_vm3, %v2896_v63, -inf }
 0x1e9   :  { %687 = vmax.xlane.f32.xlu1 %v686_v62  ;;  %v689_v1 = vsel %vm670_vm3, %v2899_v0, -inf }
 0x1ea   :  { %690 = vmax.xlane.f32.xlu0 %v689_v1 }
 0x1ed   :  { %693 = vmax.xlane.f32.xlu1 %v692_v2 }
 0x26b   :  { %v673_v3 = vpop.xlane.xlu0 %672 }
 0x26c   :  { %v695_v4 = vsub.f32 %v662_v13, %v673_v3  ;;  %v463_v13 = vpop.f32.mrb[11].mxu0 }
 0x26d   :  { %v2920_v34 = vadd.f32 %v1925_v12, %v463_v13  ;;  %v2168_v37 = vpop.f32.mrb[12].mxu0 }
 0x26e   :  { %v703_v5 = vmul.f32 1.442695, %v695_v4  ;;  %v2924_v40 = vadd.f32 %v2168_v37, %v1925_v12  ;;  %v473_v44 = vpop.f32.mrb[13].mxu0  ;;  %v682_v10 = vpop.xlane.xlu1 %681 }
 0x26f   :  { %v676_v6 = vpop.xlane.xlu0 %675  ;;  %v2440_v48 = vpack.i.bf16 %v2912_v25, %v2920_v34  ;;  %v2354_v50 = vpack.c.bf16 %v2912_v25, %v2920_v34  ;;  %v2930_v53 = vadd.f32 %v1925_v12, %v473_v44  ;;  %v2171_v3 = vpop.f32.mrb[14].mxu0  ;;  %v698_v13 = vsub.f32 %v2855_v23, %v682_v10 }
 0x270   :  { %2455 = vpow2.f32 %v703_v5  ;;  %v696_v7 = vsub.f32 %v663_v21, %v676_v6  ;;  %v2435_v21 = vpack.i.bf16 %v2908_v16, %v2910_v18  ;;  %v2940_v4 = vadd.f32 %v2171_v3, %v1925_v12  ;;  %v483_v5 = vpop.f32.mrb[15].mxu0 }
 0x271   :  { %v2445_v62 = vpack.i.bf16 %v2924_v40, %v2930_v53  ;;  %v2358_v1 = vpack.c.bf16 %v2924_v40, %v2930_v53  ;;  %2355 = vmatprep.subr.bf16.mxu0 %v2354_v50  ;;  %v2942_v6 = vadd.f32 %v1925_v12, %v483_v5  ;;  %v709_v44 = vmul.f32 1.442695, %v698_v13 }
 0x272   :  { %v705_v9 = vmul.f32 1.442695, %v696_v7  ;;  %2357 = vmatpush3.bf16.msra.mxu0 %v2354_v50  ;;  %v679_v12 = vpop.xlane.xlu1 %678 }
 0x273   :  { %2359 = vmatprep.subr.bf16.mxu0 %v2358_v1  ;;  %v2450_v7 = vpack.i.bf16 %v2940_v4, %v2942_v6  ;;  %v697_v15 = vsub.f32 %v2858_v27, %v679_v12  ;;  %v685_v19 = vpop.xlane.xlu0 %684 }
 0x274   :  { %2457 = vpow2.f32 %v705_v9  ;;  %v2362_v9 = vpack.c.bf16 %v2940_v4, %v2942_v6  ;;  %v699_v37 = vsub.f32 %v2879_v45, %v685_v19 }
 0x275   :  { %v707_v31 = vmul.f32 1.442695, %v697_v15 }
 0x276   :  { %2361 = vmatpush3.bf16.msra.mxu0 %v2358_v1  ;;  %v711_v30 = vmul.f32 1.442695, %v699_v37 }
 0x277   :  { %2363 = vmatprep.subr.bf16.mxu0 %v2362_v9  ;;  %2459 = vpow2.f32 %v707_v31  ;;  %v691_v39 = vpop.xlane.xlu0 %690 }
 0x278   :  { %2461 = vpow2.f32 %v709_v44  ;;  %v701_v41 = vsub.f32 %v2899_v0, %v691_v39 }
 0x279   :  { %2463 = vpow2.f32 %v711_v30 }
 0x27a   :  { %v2914_v29 = vpop.eup %2455  ;;  %2365 = vmatpush3.bf16.msra.mxu0 %v2362_v9  ;;  %v715_v49 = vmul.f32 1.442695, %v701_v41 }
 0x27b   :  { %v719_v38 = vsel %vm670_vm3, %v2914_v29, 0.0 }
 0x27c   :  { %720 = vadd.xlane.f32.xlu0 %v719_v38  ;;  %v688_v38 = vpop.xlane.xlu1 %687 }
 0x27d   :  { %v700_v33 = vsub.f32 %v2876_v42, %v688_v38 }
 0x27e   :  { %v2932_v61 = vpop.eup %2457 }
 0x27f   :  { %v722_v2 = vsel %vm670_vm3, %v2932_v61, 0.0 }
 0x280   :  { %723 = vadd.xlane.f32.xlu1 %v722_v2  ;;  %v694_v1 = vpop.xlane.xlu1 %693 }
 0x281   :  { %v2960_v20 = vpop.eup %2459  ;;  %v702_v47 = vsub.f32 %v2896_v63, %v694_v1 }
 0x282   :  { %v2962_v22 = vpop.eup %2461 }
 0x283   :  { %v2966_v23 = vpop.eup %2463  ;;  %v728_v27 = vsel %vm670_vm3, %v2962_v22, 0.0 }
 0x284   :  { %v731_v42 = vsel %vm670_vm3, %v2966_v23, 0.0 }
 0x291   :  { %2421 = vrot.lane.b32.xlu1 %v2420_v35, %s2543_s10  ;;  %v713_v35 = vmul.f32 1.442695, %v700_v33 }
 0x292   :  { %2416 = vrot.lane.b32.xlu0 %v2415_v26, %s2543_s10  ;;  %v725_v26 = vsel %vm670_vm3, %v2960_v20, 0.0 }
 0x293   :  { %2465 = vpow2.f32 %v713_v35 }
 0x29d   :  { %v2972_v45 = vpop.eup %2465 }
 0x29e   :  { %v734_v50 = vsel %vm670_vm3, %v2972_v45, 0.0 }
 0x2b1   :  { %726 = vadd.xlane.f32.xlu0 %v725_v26 }
 0x2b5   :  { %729 = vadd.xlane.f32.xlu1 %v728_v27  ;;  %732 = vadd.xlane.f32.xlu0 %v731_v42 }
 0x2b9   :  { %735 = vadd.xlane.f32.xlu1 %v734_v50 }
 0x2ca   :  { %2431 = vrot.lane.b32.xlu1 %v2430_v51, %s2543_s10 }
 0x2cb   :  { %2426 = vrot.lane.b32.xlu0 %v2425_v43, %s2543_s10  ;;  %v717_v43 = vmul.f32 1.442695, %v702_v47 }
 0x2cd   :  { %2467 = vpow2.f32 %v717_v43 }
 0x2ce   :  { %890 = vrot.lane.b32.xlu1 %v2770_v55, %s2543_s10  ;;  %2469 = vpow2.f32 %v715_v49 }
 0x2cf   :  { %888 = vrot.lane.b32.xlu0 %v2726_v32, %s2543_s10 }
 0x2d3   :  { %892 = vrot.lane.b32.xlu0 %v2768_v54, %s2543_s10 }
 0x2d7   :  { %896 = vrot.lane.b32.xlu0 %v2778_v57, %s2543_s10  ;;  %v2996_v32 = vpop.eup %2467 }
 0x2d8   :  { %v740_v51 = vsel %vm670_vm3, %v2996_v32, 0.0  ;;  %v3000_v54 = vpop.eup %2469 }
 0x2d9   :  { %v737_v55 = vsel %vm670_vm3, %v3000_v54, 0.0 }
 0x2db   :  { %900 = vrot.lane.b32.xlu0 %v2786_v59, %s2543_s10 }
 0x2f2   :  { %741 = vadd.xlane.f32.xlu1 %v740_v51 }
 0x2f6   :  { %738 = vadd.xlane.f32.xlu1 %v737_v55 }
 0x307   :  { %894 = vrot.lane.b32.xlu1 %v2772_v56, %s2543_s10 }
 0x309   :  { %v721_v57 = vpop.xlane.xlu0 %720 }
 0x30a   :  { %2471 = vrcp.f32 %v721_v57 }
 0x30b   :  { %898 = vrot.lane.b32.xlu1 %v2780_v58, %s2543_s10 }
 0x30d   :  { %v724_v59 = vpop.xlane.xlu1 %723  ;;  %v2417_v63 = vpop.permute.xlu0 %2416 }
 0x30e   :  { %2473 = vrcp.f32 %v724_v59  ;;  %v2419_v0 = vunpack.i.h.bf16 %v2417_v63  ;;  %v2418_v2 = vunpack.i.l.bf16 %v2417_v63 }
 0x30f   :  { %902 = vrot.lane.b32.xlu1 %v2788_v60, %s2543_s10 }
 0x310   :  { %v2366_v3 = vpack.c.bf16 %v2419_v0, %v2418_v2 }
 0x311   :  { %v2422_v9 = vpop.permute.xlu1 %2421 }
 0x312   :  { %2368 = vmatprep.subr.msk.bf16.mxu0 %vm2716_vm2, %v2366_v3  ;;  %v2424_v10 = vunpack.i.h.bf16 %v2422_v9  ;;  %v2423_v12 = vunpack.i.l.bf16 %v2422_v9 }
 0x314   :  { %v2472_v5 = vpop.eup %2471  ;;  %v2372_v19 = vpack.c.bf16 %v2424_v10, %v2423_v12 }
 0x315   :  { %v744_v56 = vmul.f32 %v2472_v5, %v2914_v29 }
 0x317   :  { %2216 = vmatprep.mubr.msk.f32.mxu0 %vm670_vm3, %v744_v56 }
 0x318   :  { %v2474_v58 = vpop.eup %2473 }
 0x319   :  { %v746_v15 = vmul.f32 %v2474_v58, %v2932_v61 }
 0x31b   :  { %2217 = vmatmul.mubr.msk.f32.vlgmr.msra.gmra.mrb[16].mxu0 %vm670_vm3, %v746_v15 }
 0x31c   :  { %2371 = vmatpush3.bf16.xpose.msk.msra.mxu0 %vm2716_vm2, %v2366_v3 }
 0x31d   :  { %2374 = vmatprep.subr.msk.bf16.mxu0 %vm2716_vm2, %v2372_v19 }
 0x324   :  { %2377 = vmatpush3.bf16.xpose.msk.msra.mxu0 %vm2716_vm2, %v2372_v19 }
 0x33e   :  { %v727_v60 = vpop.xlane.xlu0 %726 }
 0x33f   :  { %2475 = vrcp.f32 %v727_v60 }
 0x342   :  { %v730_v29 = vpop.xlane.xlu1 %729  ;;  %v733_v13 = vpop.xlane.xlu0 %732 }
 0x343   :  { %2477 = vrcp.f32 %v730_v29 }
 0x344   :  { %2479 = vrcp.f32 %v733_v13 }
 0x346   :  { %v736_v31 = vpop.xlane.xlu1 %735  ;;  %v2427_v61 = vpop.permute.xlu0 %2426 }
 0x347   :  { %2481 = vrcp.f32 %v736_v31  ;;  %v2429_v37 = vunpack.i.h.bf16 %v2427_v61  ;;  %v2428_v38 = vunpack.i.l.bf16 %v2427_v61 }
 0x349   :  { %v2476_v44 = vpop.eup %2475  ;;  %v2378_v30 = vpack.c.bf16 %v2429_v37, %v2428_v38 }
 0x34a   :  { %v2432_v33 = vpop.permute.xlu1 %2431  ;;  %v748_v35 = vmul.f32 %v2476_v44, %v2960_v20  ;;  %v889_v51 = vpop.permute.xlu0 %888 }
 0x34b   :  { %v2434_v26 = vunpack.i.h.bf16 %v2432_v33  ;;  %v2433_v27 = vunpack.i.l.bf16 %v2432_v33  ;;  %2380 = vmatprep.subr.msk.bf16.mxu0 %vm2716_vm2, %v2378_v30 }
 0x34c   :  { %2219 = vmatprep.mubr.msk.f32.mxu0 %vm670_vm3, %v748_v35  ;;  %2383 = vmatpush3.bf16.xpose.msk.msra.mxu0 %vm2716_vm2, %v2378_v30 }
 0x34d   :  { %v2478_v42 = vpop.eup %2477  ;;  %v2384_v50 = vpack.c.bf16 %v2434_v26, %v2433_v27 }
 0x34e   :  { %v2480_v1 = vpop.eup %2479  ;;  %v750_v47 = vmul.f32 %v2478_v42, %v2962_v22  ;;  %v891_v43 = vpop.permute.xlu1 %890 }
 0x34f   :  { %2386 = vmatprep.subr.msk.bf16.mxu0 %vm2716_vm2, %v2384_v50  ;;  %v752_v20 = vmul.f32 %v2480_v1, %v2966_v23 }
 0x350   :  { %2220 = vmatmul.mubr.msk.f32.gmra.mrb[18].mxu0 %vm670_vm3, %v750_v47 }
 0x351   :  { %v2482_v39 = vpop.eup %2481  ;;  %2222 = vmatprep.mubr.msk.f32.mxu0 %vm670_vm3, %v752_v20 }
 0x352   :  { %v754_v41 = vmul.f32 %v2482_v39, %v2972_v45  ;;  %v893_v45 = vpop.permute.xlu0 %892 }
 0x354   :  { %2223 = vmatmul.mubr.msk.f32.gmra.mrb[20].mxu0 %vm670_vm3, %v754_v41 }
 0x355   :  { %2389 = vmatpush3.bf16.xpose.msk.msra.mxu0 %vm2716_vm2, %v2384_v50 }
 0x356   :  { %v897_v63 = vpop.permute.xlu0 %896 }
 0x37f   :  { %v742_v49 = vpop.xlane.xlu1 %741 }
 0x380   :  { %2483 = vrcp.f32 %v742_v49 }
 0x383   :  { %v739_v22 = vpop.xlane.xlu1 %738 }
 0x384   :  { %2485 = vrcp.f32 %v739_v22 }
 0x387   :  { %v895_v24 = vpop.permute.xlu1 %894 }
 0x38a   :  { %v2484_v55 = vpop.eup %2483 }
 0x38b   :  { %v758_v59 = vmul.f32 %v2484_v55, %v2996_v32  ;;  %v899_v0 = vpop.permute.xlu1 %898 }
 0x38e   :  { %v2486_v23 = vpop.eup %2485 }
 0x38f   :  { %v756_v57 = vmul.f32 %v2486_v23, %v3000_v54  ;;  %v901_v54 = vpop.permute.xlu0 %900  ;;  %v903_v32 = vpop.permute.xlu1 %902 }
 0x391   :  { %2225 = vmatprep.mubr.msk.f32.mxu0 %vm670_vm3, %v756_v57 }
 0x392   :  { %2226 = vmatmul.mubr.msk.f32.gmra.mrb[22].mxu0 %vm670_vm3, %v758_v59 }
 0x393   :  { %2244 = vmatprep.mubr.msk.f32.mxu0 %vm500_vm1, %v889_v51 }
 0x396   :  { %2245 = vmatmul.mubr.msk.f32.vlgmr.msra.gmra.mrb[24].mxu0 %vm500_vm1, %v891_v43 }
 0x397   :  { %2247 = vmatprep.mubr.msk.f32.mxu0 %vm500_vm1, %v893_v45 }
 0x39a   :  { %2248 = vmatmul.mubr.msk.f32.gmra.mrb[26].mxu0 %vm500_vm1, %v895_v24 }
 0x39b   :  { %2250 = vmatprep.mubr.msk.f32.mxu0 %vm500_vm1, %v897_v63 }
 0x39e   :  { %2251 = vmatmul.mubr.msk.f32.gmra.mrb[28].mxu0 %vm500_vm1, %v899_v0 }
 0x39f   :  { %2253 = vmatprep.mubr.msk.f32.mxu0 %vm500_vm1, %v901_v54 }
 0x3a2   :  { %2254 = vmatmul.mubr.msk.f32.gmra.mrb[30].mxu0 %vm500_vm1, %v903_v32 }
 0x3ee   :  { %v3050_v2 = vpop.f32.mrb[16].mxu0 }
 0x3ef   :  { %v3052_v3 = vpop.f32.mrb[17].mxu0 }
 0x423   :  { %v3054_v5 = vpop.f32.mrb[18].mxu0 }
 0x424   :  { %v3056_v9 = vpop.f32.mrb[19].mxu0 }
 0x427   :  { %v3058_v56 = vpop.f32.mrb[20].mxu0 }
 0x428   :  { %v3060_v10 = vpop.f32.mrb[21].mxu0 }
 0x465   :  { %v3062_v12 = vpop.f32.mrb[22].mxu0 }
 0x466   :  { %v3064_v58 = vpop.f32.mrb[23].mxu0 }
 0x469   :  { %v2246_v15 = vpop.f32.mrb[24].mxu0 }
 0x46a   :  { %v1058_v19 = vmul.f32 0.5, %v2246_v15  ;;  %v1018_v60 = vpop.f32.mrb[25].mxu0 }
 0x46b   :  { %v1057_v29 = vmul.f32 0.5, %v1018_v60 }
 0x46c   :  { %v1066_v13 = vadd.f32 %v1058_v19, %v2839_v11 }
 0x46d   :  { %v2249_v31 = vpop.f32.mrb[26].mxu0  ;;  %v1065_v61 = vadd.f32 %v1057_v29, %v2834_v8 }
 0x46e   :  { %v1060_v37 = vmul.f32 0.5, %v2249_v31  ;;  %v1028_v38 = vpop.f32.mrb[27].mxu0  ;;  %v1076_v44 = vsel %vm670_vm3, %v1066_v13, -inf }
 0x46f   :  { %v1059_v30 = vmul.f32 0.5, %v1028_v38  ;;  %1077 = vmax.xlane.f32.xlu1 %v1076_v44  ;;  %v1073_v33 = vsel %vm670_vm3, %v1065_v61, -inf }
 0x470   :  { %1074 = vmax.xlane.f32.xlu0 %v1073_v33  ;;  %v1068_v35 = vadd.f32 %v1060_v37, %v2845_v14 }
 0x471   :  { %v2252_v26 = vpop.f32.mrb[28].mxu0  ;;  %v1067_v1 = vadd.f32 %v1059_v30, %v2850_v17 }
 0x472   :  { %v1062_v27 = vmul.f32 0.5, %v2252_v26  ;;  %v1038_v42 = vpop.f32.mrb[29].mxu0  ;;  %v1082_v50 = vsel %vm670_vm3, %v1068_v35, -inf }
 0x473   :  { %v1061_v11 = vmul.f32 0.5, %v1038_v42  ;;  %v1079_v14 = vsel %vm670_vm3, %v1067_v1, -inf }
 0x474   :  { %1083 = vmax.xlane.f32.xlu0 %v1082_v50  ;;  %v1070_v8 = vadd.f32 %v1062_v27, %v2863_v28 }
 0x475   :  { %v2255_v47 = vpop.f32.mrb[30].mxu0  ;;  %v1069_v49 = vadd.f32 %v1061_v11, %v2870_v36 }
 0x476   :  { %v1064_v20 = vmul.f32 0.5, %v2255_v47  ;;  %v1048_v39 = vpop.f32.mrb[31].mxu0  ;;  %v1088_v41 = vsel %vm670_vm3, %v1070_v8, -inf }
 0x477   :  { %v1063_v43 = vmul.f32 0.5, %v1048_v39  ;;  %1089 = vmax.xlane.f32.xlu1 %v1088_v41  ;;  %v1085_v17 = vsel %vm670_vm3, %v1069_v49, -inf }
 0x478   :  { %1080 = vmax.xlane.f32.xlu0 %v1079_v14  ;;  %v1072_v22 = vadd.f32 %v1064_v20, %v2884_v46 }
 0x479   :  { %v1071_v28 = vadd.f32 %v1063_v43, %v2889_v52 }
 0x47a   :  { %v1094_v51 = vsel %vm670_vm3, %v1072_v22, -inf }
 0x47b   :  { %1095 = vmax.xlane.f32.xlu1 %v1094_v51  ;;  %v1091_v55 = vsel %vm670_vm3, %v1071_v28, -inf }
 0x47c   :  { %1086 = vmax.xlane.f32.xlu0 %v1085_v17 }
 0x480   :  { %1092 = vmax.xlane.f32.xlu0 %v1091_v55 }
 0x48c   :  { %2441 = vrot.lane.b32.xlu1 %v2440_v48, %s2543_s10 }
 0x496   :  { %2436 = vrot.lane.b32.xlu0 %v2435_v21, %s2543_s10 }
 0x4fc   :  { %v1078_v36 = vpop.xlane.xlu1 %1077 }
 0x4fd   :  { %v1098_v46 = vsub.f32 %v1066_v13, %v1078_v36  ;;  %v1075_v23 = vpop.xlane.xlu0 %1074 }
 0x4fe   :  { %v1097_v57 = vsub.f32 %v1065_v61, %v1075_v23 }
 0x4ff   :  { %v1107_v59 = vmul.f32 1.442695, %v1098_v46 }
 0x500   :  { %v1105_v52 = vmul.f32 1.442695, %v1097_v57 }
 0x501   :  { %2487 = vpow2.f32 %v1107_v59  ;;  %v1084_v45 = vpop.xlane.xlu0 %1083 }
 0x502   :  { %2489 = vpow2.f32 %v1105_v52  ;;  %v1100_v24 = vsub.f32 %v1068_v35, %v1084_v45 }
 0x504   :  { %v1111_v63 = vmul.f32 1.442695, %v1100_v24  ;;  %v1090_v0 = vpop.xlane.xlu1 %1089 }
 0x505   :  { %v1102_v54 = vsub.f32 %v1070_v8, %v1090_v0  ;;  %v1081_v25 = vpop.xlane.xlu0 %1080 }
 0x506   :  { %2491 = vpow2.f32 %v1111_v63  ;;  %v1099_v34 = vsub.f32 %v1067_v1, %v1081_v25 }
 0x507   :  { %v1115_v48 = vmul.f32 1.442695, %v1102_v54 }
 0x508   :  { %v1109_v32 = vmul.f32 1.442695, %v1099_v34  ;;  %v1096_v16 = vpop.xlane.xlu1 %1095 }
 0x509   :  { %2493 = vpow2.f32 %v1115_v48  ;;  %v1104_v18 = vsub.f32 %v1072_v22, %v1096_v16  ;;  %v1087_v21 = vpop.xlane.xlu0 %1086 }
 0x50a   :  { %2495 = vpow2.f32 %v1109_v32  ;;  %v1101_v15 = vsub.f32 %v1069_v49, %v1087_v21 }
 0x50b   :  { %v3090_v19 = vpop.eup %2487  ;;  %v1119_v60 = vmul.f32 1.442695, %v1104_v18 }
 0x50c   :  { %v2490_v29 = vpop.eup %2489  ;;  %v1113_v13 = vmul.f32 1.442695, %v1101_v15  ;;  %v1124_v31 = vsel %vm670_vm3, %v3090_v19, 0.0  ;;  %v2442_v30 = vpop.permute.xlu1 %2441 }
 0x50d   :  { %2497 = vpow2.f32 %v1119_v60  ;;  %1125 = vadd.xlane.f32.xlu1 %v1124_v31  ;;  %v1093_v61 = vpop.xlane.xlu0 %1092  ;;  %v1121_v37 = vsel %vm670_vm3, %v2490_v29, 0.0  ;;  %v2444_v11 = vunpack.i.h.bf16 %v2442_v30  ;;  %v2443_v1 = vunpack.i.l.bf16 %v2442_v30 }
 0x50e   :  { %2499 = vpow2.f32 %v1113_v13  ;;  %v1103_v38 = vsub.f32 %v1071_v28, %v1093_v61  ;;  %1122 = vadd.xlane.f32.xlu0 %v1121_v37 }
 0x50f   :  { %v2394_v43 = vpack.c.bf16 %v2444_v11, %v2443_v1 }
 0x510   :  { %v3095_v44 = vpop.eup %2491  ;;  %v1117_v33 = vmul.f32 1.442695, %v1103_v38 }
 0x511   :  { %v2437_v35 = vpop.permute.xlu0 %2436  ;;  %v1130_v26 = vsel %vm670_vm3, %v3095_v44, 0.0 }
 0x512   :  { %2501 = vpow2.f32 %v1117_v33  ;;  %v2439_v27 = vunpack.i.h.bf16 %v2437_v35  ;;  %v2438_v42 = vunpack.i.l.bf16 %v2437_v35  ;;  %1131 = vadd.xlane.f32.xlu1 %v1130_v26 }
 0x513   :  { %v3099_v50 = vpop.eup %2493 }
 0x514   :  { %v2496_v8 = vpop.eup %2495  ;;  %v2390_v47 = vpack.c.bf16 %v2439_v27, %v2438_v42  ;;  %v1136_v20 = vsel %vm670_vm3, %v3099_v50, 0.0 }
 0x515   :  { %v1127_v39 = vsel %vm670_vm3, %v2496_v8, 0.0 }
 0x516   :  { %1137 = vadd.xlane.f32.xlu1 %v1136_v20  ;;  %1128 = vadd.xlane.f32.xlu0 %v1127_v39 }
 0x517   :  { %v3104_v41 = vpop.eup %2497  ;;  %2391 = vmatprep.subr.bf16.mxu1 %v2390_v47 }
 0x518   :  { %v2500_v14 = vpop.eup %2499  ;;  %2393 = vmatpush3.bf16.msra.mxu1 %v2390_v47  ;;  %v1142_v49 = vsel %vm670_vm3, %v3104_v41, 0.0 }
 0x519   :  { %2395 = vmatprep.subr.bf16.mxu1 %v2394_v43  ;;  %v1133_v22 = vsel %vm670_vm3, %v2500_v14, 0.0 }
 0x51a   :  { %1143 = vadd.xlane.f32.xlu1 %v1142_v49  ;;  %1134 = vadd.xlane.f32.xlu0 %v1133_v22 }
 0x51c   :  { %v2502_v51 = vpop.eup %2501  ;;  %2397 = vmatpush3.bf16.msra.mxu1 %v2394_v43 }
 0x51d   :  { %v1139_v17 = vsel %vm670_vm3, %v2502_v51, 0.0 }
 0x51e   :  { %1140 = vadd.xlane.f32.xlu1 %v1139_v17 }
 0x52f   :  { %2451 = vrot.lane.b32.xlu1 %v2450_v7, %s2543_s10 }
 0x530   :  { %2446 = vrot.lane.b32.xlu0 %v2445_v62, %s2543_s10  ;;  %v66_v62 = vld [vmem:[%s3338_s7] sm:$0xff] }
 0x531   :  { %v1323_v25 = vrot.slane %v66_v62, 4 }
 0x59a   :  { %v1126_v28 = vpop.xlane.xlu1 %1125 }
 0x59b   :  { %v1123_v55 = vpop.xlane.xlu0 %1122 }
 0x59c   :  { %2503 = vrcp.f32 %v1123_v55 }
 0x59d   :  { %2505 = vrcp.f32 %v1126_v28  ;;  %v2538_v28 = vld [vmem:[%s3331_s0 + $0x10] sm:$0xff] }
 0x59f   :  { %v1132_v36 = vpop.xlane.xlu1 %1131 }
 0x5a3   :  { %v1138_v46 = vpop.xlane.xlu1 %1137  ;;  %v1129_v23 = vpop.xlane.xlu0 %1128 }
 0x5a4   :  { %2507 = vrcp.f32 %v1129_v23 }
 0x5a5   :  { %2509 = vrcp.f32 %v1132_v36  ;;  %v2539_v36 = vld [vmem:[%s3331_s0 + $0x28] sm:$0xff] }
 0x5a6   :  { %v2504_v57 = vpop.eup %2503 }
 0x5a7   :  { %v1144_v59 = vpop.xlane.xlu1 %1143  ;;  %v1135_v52 = vpop.xlane.xlu0 %1134  ;;  %v1146_v45 = vmul.f32 %v2504_v57, %v2490_v29 }
 0x5a8   :  { %2511 = vrcp.f32 %v1135_v52  ;;  %v2506_v34 = vpop.eup %2505 }
 0x5a9   :  { %2272 = vmatprep.mubr.msk.f32.mxu1 %vm670_vm3, %v1146_v45  ;;  %2513 = vrcp.f32 %v1138_v46  ;;  %v1148_v32 = vmul.f32 %v2506_v34, %v3090_v19 }
 0x5ab   :  { %v1141_v4 = vpop.xlane.xlu1 %1140  ;;  %v2447_v6 = vpop.permute.xlu0 %2446 }
 0x5ac   :  { %v2449_v7 = vunpack.i.h.bf16 %v2447_v6  ;;  %v2448_v24 = vunpack.i.l.bf16 %v2447_v6  ;;  %2515 = vrcp.f32 %v1141_v4  ;;  %v2540_v6 = vld [vmem:[%s3331_s0 + $0x20] sm:$0xff] }
 0x5ad   :  { %2517 = vrcp.f32 %v1144_v59 }
 0x5ae   :  { %v2398_v40 = vpack.c.bf16 %v2449_v7, %v2448_v24  ;;  %v2508_v48 = vpop.eup %2507  ;;  %v2541_v24 = vld [vmem:[%s3331_s0 + $0x38] sm:$0xff] }
 0x5af   :  { %v2452_v53 = vpop.permute.xlu1 %2451  ;;  %v2510_v16 = vpop.eup %2509  ;;  %v1150_v18 = vmul.f32 %v2508_v48, %v2496_v8 }
 0x5b0   :  { %v2454_v63 = vunpack.i.h.bf16 %v2452_v53  ;;  %v2453_v0 = vunpack.i.l.bf16 %v2452_v53  ;;  %2399 = vmatprep.subr.bf16.mxu1 %v2398_v40  ;;  %v1152_v15 = vmul.f32 %v2510_v16, %v3095_v44 }
 0x5b1   :  { %2401 = vmatpush3.bf16.msra.mxu1 %v2398_v40 }
 0x5b2   :  { %v2402_v54 = vpack.c.bf16 %v2454_v63, %v2453_v0  ;;  %v2512_v21 = vpop.eup %2511  ;;  %v2542_v63 = vld [vmem:[%s3331_s0 + $0x30] sm:$0xff] }
 0x5b3   :  { %v2514_v60 = vpop.eup %2513  ;;  %v1154_v29 = vmul.f32 %v2512_v21, %v2500_v14 }
 0x5b4   :  { %2403 = vmatprep.subr.bf16.mxu1 %v2402_v54  ;;  %v1156_v19 = vmul.f32 %v2514_v60, %v3099_v50 }
 0x5b5   :  { %2405 = vmatpush3.bf16.msra.mxu1 %v2402_v54 }
 0x5b6   :  { %2284 = vmatprep.subr.msk.mxu1 %vm1348_vm4, %v1323_v25  ;;  %v2516_v13 = vpop.eup %2515 }
 0x5b7   :  { %v2518_v31 = vpop.eup %2517  ;;  %v1158_v61 = vmul.f32 %v2516_v13, %v2502_v51 }
 0x5b8   :  { %2273 = vmatmul.mubr.msk.f32.vlgmr.msra.gmra.mrb[16].mxu1 %vm670_vm3, %v1148_v32  ;;  %v1160_v37 = vmul.f32 %v2518_v31, %v3104_v41  ;;  %v2537_v41 = vld [vmem:[%s3331_s0 + $0x18] sm:$0xff] }
 0x5b9   :  { %2275 = vmatprep.mubr.msk.f32.mxu1 %vm670_vm3, %v1150_v18  ;;  %2285 = vmatpush3.msk.msra.mxu1 %vm1348_vm4, %v1323_v25 }
 0x5ba   :  { %2298 = vmatprep.subr.msk.mxu1 %vm1348_vm4, %v66_v62 }
 0x5bc   :  { %2276 = vmatmul.mubr.msk.f32.gmra.mrb[18].mxu1 %vm670_vm3, %v1152_v15 }
 0x5bd   :  { %2278 = vmatprep.mubr.msk.f32.mxu1 %vm670_vm3, %v1154_v29 }
 0x5c0   :  { %2279 = vmatmul.mubr.msk.f32.gmra.mrb[20].mxu1 %vm670_vm3, %v1156_v19 }
 0x5c1   :  { %2281 = vmatprep.mubr.msk.f32.mxu1 %vm670_vm3, %v1158_v61 }
 0x5c4   :  { %2282 = vmatmul.mubr.msk.f32.gmra.mrb[22].mxu1 %vm670_vm3, %v1160_v37 }
 0x68b   :  { %v2274_v38 = vpop.f32.mrb[16].mxu1 }
 0x68c   :  { %v1283_v44 = vpop.f32.mrb[17].mxu1 }
 0x68d   :  { %2286 = vmatprep.mubr.msk.f32.mxu1 %vm500_vm1, %v1283_v44 }
 0x68e   :  { %2287 = vmatmul.mubr.msk.f32.vlgmr.msra.gmra.mrb[24].mxu1 %vm500_vm1, %v2274_v38 }
 0x68f   :  { %v2277_v30 = vpop.f32.mrb[18].mxu1  ;;  %2299 = vmatpush3.msk.msra.mxu1 %vm1348_vm4, %v66_v62 }
 0x690   :  { %v1293_v33 = vpop.f32.mrb[19].mxu1 }
 0x691   :  { %2289 = vmatprep.mubr.msk.f32.mxu1 %vm500_vm1, %v1293_v33 }
 0x692   :  { %2290 = vmatmul.mubr.msk.f32.gmra.mrb[26].mxu1 %vm500_vm1, %v2277_v30 }
 0x693   :  { %v2280_v35 = vpop.f32.mrb[20].mxu1 }
 0x694   :  { %v1303_v26 = vpop.f32.mrb[21].mxu1 }
 0x695   :  { %2292 = vmatprep.mubr.msk.f32.mxu1 %vm500_vm1, %v1303_v26 }
 0x696   :  { %2293 = vmatmul.mubr.msk.f32.gmra.mrb[28].mxu1 %vm500_vm1, %v2280_v35 }
 0x697   :  { %v2283_v27 = vpop.f32.mrb[22].mxu1 }
 0x698   :  { %v1313_v42 = vpop.f32.mrb[23].mxu1 }
 0x699   :  { %2295 = vmatprep.mubr.msk.f32.mxu1 %vm500_vm1, %v1313_v42 }
 0x69a   :  { %2296 = vmatmul.mubr.msk.f32.gmra.mrb[30].mxu1 %vm500_vm1, %v2283_v27 }
 0x69b   :  { %2300 = vmatprep.mubr.msk.f32.mxu1 %vm500_vm1, %v3052_v3 }
 0x69e   :  { %2301 = vmatmul.mubr.msk.f32.vlgmr.msra.gmra.mrb[24].mxu1 %vm500_vm1, %v3050_v2  ;;  %v2000_v2 = vld [vmem:[%s3339_s11] ss:$0 sm:$0xff] }
 0x69f   :  { %2303 = vmatprep.mubr.msk.f32.mxu1 %vm500_vm1, %v3056_v9 }
 0x6a2   :  { %2304 = vmatmul.mubr.msk.f32.gmra.mrb[26].mxu1 %vm500_vm1, %v3054_v5 }
 0x6a3   :  { %2306 = vmatprep.mubr.msk.f32.mxu1 %vm500_vm1, %v3060_v10  ;;  %v2535_v10 = vld [vmem:[%s3331_s0 + $0x8] sm:$0xff] }
 0x6a6   :  { %2307 = vmatmul.mubr.msk.f32.gmra.mrb[28].mxu1 %vm500_vm1, %v3058_v56 }
 0x6a7   :  { %2309 = vmatprep.mubr.msk.f32.mxu1 %vm500_vm1, %v3064_v58  ;;  %v2536_v58 = vld [vmem:[%s3331_s0] sm:$0xff] }
 0x6aa   :  { %2310 = vmatmul.mubr.msk.f32.gmra.mrb[30].mxu1 %vm500_vm1, %v3062_v12 }
 0x771   :  { %v2302_v3 = vpop.f32.mrb[24].mxu1 }
 0x772   :  { %v1595_v9 = vadd.f32 %v2302_v3, %v2000_v2  ;;  %v1548_v50 = vpop.f32.mrb[25].mxu1 }
 0x773   :  { %v1594_v5 = vadd.f32 %v2000_v2, %v1548_v50 }
 0x774   :  { %v1603_v11 = vadd.f32 %v2535_v10, %v1595_v9 }
 0x775   :  { %v2305_v56 = vpop.f32.mrb[26].mxu1  ;;  %v1602_v1 = vadd.f32 %v2536_v58, %v1594_v5 }
 0x776   :  { %v1597_v12 = vadd.f32 %v2305_v56, %v2000_v2  ;;  %v1558_v8 = vpop.f32.mrb[27].mxu1  ;;  %v1615_v47 = vsel %vm74_vm0, %v1603_v11, 0.0 }
 0x777   :  { %v1596_v20 = vadd.f32 %v2000_v2, %v1558_v8  ;;  %1616 = vadd.xlane.f32.xlu1 %v1615_v47  ;;  %v1612_v39 = vsel %vm74_vm0, %v1602_v1, 0.0 }
 0x778   :  { %1613 = vadd.xlane.f32.xlu0 %v1612_v39  ;;  %v1605_v43 = vadd.f32 %v2537_v41, %v1597_v12 }
 0x779   :  { %v2308_v14 = vpop.f32.mrb[28].mxu1  ;;  %v1604_v55 = vadd.f32 %v2538_v28, %v1596_v20 }
 0x77a   :  { %v1599_v49 = vadd.f32 %v2308_v14, %v2000_v2  ;;  %v1568_v22 = vpop.f32.mrb[29].mxu1  ;;  %v1621_v51 = vsel %vm74_vm0, %v1605_v43, 0.0  ;;  %v1753_v14 = vld [vmem:[%s3340_s14] sm:$0xff] }
 0x77b   :  { %v1598_v17 = vadd.f32 %v2000_v2, %v1568_v22  ;;  %v1618_v4 = vsel %vm74_vm0, %v1604_v55, 0.0  ;;  %2312 = vmatprep.subr.mxu0 %v1753_v14 }
 0x77c   :  { %1622 = vadd.xlane.f32.xlu0 %v1621_v51  ;;  %v1607_v46 = vadd.f32 %v2539_v36, %v1599_v49  ;;  %2313 = vmatpush3.msra.mxu0 %v1753_v14 }
 0x77d   :  { %v2311_v23 = vpop.f32.mrb[30].mxu1  ;;  %v1606_v7 = vadd.f32 %v2540_v6, %v1598_v17 }
 0x77e   :  { %v1601_v57 = vadd.f32 %v2311_v23, %v2000_v2  ;;  %v1578_v59 = vpop.f32.mrb[31].mxu1  ;;  %v1627_v52 = vsel %vm74_vm0, %v1607_v46, 0.0 }
 0x77f   :  { %v1600_v45 = vadd.f32 %v2000_v2, %v1578_v59  ;;  %1628 = vadd.xlane.f32.xlu1 %v1627_v52  ;;  %v1624_v62 = vsel %vm74_vm0, %v1606_v7, 0.0 }
 0x780   :  { %1619 = vadd.xlane.f32.xlu0 %v1618_v4  ;;  %v1609_v40 = vadd.f32 %v2541_v24, %v1601_v57 }
 0x781   :  { %v1608_v0 = vadd.f32 %v2542_v63, %v1600_v45  ;;  %v2001_v63 = vld [vmem:[%s3341_s12] ss:$0 sm:$0xff] }
 0x782   :  { %v1633_v53 = vsel %vm74_vm0, %v1609_v40, 0.0 }
 0x783   :  { %1634 = vadd.xlane.f32.xlu1 %v1633_v53  ;;  %v1630_v54 = vsel %vm74_vm0, %v1608_v0, 0.0 }
 0x784   :  { %1625 = vadd.xlane.f32.xlu0 %v1624_v62 }
 0x788   :  { %1631 = vadd.xlane.f32.xlu0 %v1630_v54 }
 0x804   :  { %v1617_v25 = vpop.xlane.xlu1 %1616 }
 0x805   :  { %v1638_v34 = vmul.f32 0.125, %v1617_v25  ;;  %v1614_v48 = vpop.xlane.xlu0 %1613 }
 0x806   :  { %v1637_v32 = vmul.f32 0.125, %v1614_v48  ;;  %v2002_v48 = vld [vmem:[%s3342_s13] ss:$0 sm:$0xff] }
 0x807   :  { %v3196_v16 = vsub.f32 %v1603_v11, %v1638_v34 }
 0x808   :  { %v3198_v18 = vsub.f32 %v1602_v1, %v1637_v32 }
 0x809   :  { %v1623_v21 = vpop.xlane.xlu0 %1622  ;;  %v1654_v15 = vmul.f32 %v3196_v16, %v3196_v16 }
 0x80a   :  { %v1640_v60 = vmul.f32 0.125, %v1623_v21  ;;  %v1653_v29 = vmul.f32 %v3198_v18, %v3198_v18 }
 0x80b   :  { %v1664_v13 = vsel %vm74_vm0, %v1654_v15, 0.0 }
 0x80c   :  { %v3205_v19 = vsub.f32 %v1605_v43, %v1640_v60  ;;  %v1629_v31 = vpop.xlane.xlu1 %1628  ;;  %1665 = vadd.xlane.f32.xlu1 %v1664_v13  ;;  %v1661_v61 = vsel %vm74_vm0, %v1653_v29, 0.0 }
 0x80d   :  { %v1642_v37 = vmul.f32 0.125, %v1629_v31  ;;  %v1620_v38 = vpop.xlane.xlu0 %1619  ;;  %1662 = vadd.xlane.f32.xlu0 %v1661_v61 }
 0x80e   :  { %v1639_v44 = vmul.f32 0.125, %v1620_v38  ;;  %v1656_v30 = vmul.f32 %v3205_v19, %v3205_v19 }
 0x80f   :  { %v3210_v33 = vsub.f32 %v1607_v46, %v1642_v37 }
 0x810   :  { %v3212_v35 = vsub.f32 %v1604_v55, %v1639_v44  ;;  %v1635_v26 = vpop.xlane.xlu1 %1634  ;;  %v1670_v27 = vsel %vm74_vm0, %v1656_v30, 0.0 }
 0x811   :  { %v1644_v42 = vmul.f32 0.125, %v1635_v26  ;;  %v1626_v2 = vpop.xlane.xlu0 %1625  ;;  %1671 = vadd.xlane.f32.xlu1 %v1670_v27  ;;  %v1658_v3 = vmul.f32 %v3210_v33, %v3210_v33 }
 0x812   :  { %v1641_v9 = vmul.f32 0.125, %v1626_v2  ;;  %v1655_v50 = vmul.f32 %v3212_v35, %v3212_v35 }
 0x813   :  { %v3219_v5 = vsub.f32 %v1609_v40, %v1644_v42  ;;  %v1676_v10 = vsel %vm74_vm0, %v1658_v3, 0.0 }
 0x814   :  { %v3222_v11 = vsub.f32 %v1606_v7, %v1641_v9  ;;  %v1667_v56 = vsel %vm74_vm0, %v1655_v50, 0.0 }
 0x815   :  { %1677 = vadd.xlane.f32.xlu1 %v1676_v10  ;;  %1668 = vadd.xlane.f32.xlu0 %v1667_v56  ;;  %v1632_v58 = vpop.xlane.xlu0 %1631  ;;  %v1660_v1 = vmul.f32 %v3219_v5, %v3219_v5 }
 0x816   :  { %v1643_v12 = vmul.f32 0.125, %v1632_v58  ;;  %v1657_v8 = vmul.f32 %v3222_v11, %v3222_v11 }
 0x817   :  { %v1682_v47 = vsel %vm74_vm0, %v1660_v1, 0.0 }
 0x818   :  { %v3230_v20 = vsub.f32 %v1608_v0, %v1643_v12  ;;  %v1673_v39 = vsel %vm74_vm0, %v1657_v8, 0.0 }
 0x819   :  { %1683 = vadd.xlane.f32.xlu1 %v1682_v47  ;;  %1674 = vadd.xlane.f32.xlu0 %v1673_v39  ;;  %v2003_v47 = vld [vmem:[%s3344_s15] ss:$0 sm:$0xff] }
 0x81a   :  { %v1659_v41 = vmul.f32 %v3230_v20, %v3230_v20 }
 0x81c   :  { %v1679_v43 = vsel %vm74_vm0, %v1659_v41, 0.0 }
 0x81d   :  { %1680 = vadd.xlane.f32.xlu0 %v1679_v43 }
 0x899   :  { %v1666_v49 = vpop.xlane.xlu1 %1665 }
 0x89a   :  { %v1686_v22 = vmul.f32 0.125, %v1666_v49  ;;  %v1663_v51 = vpop.xlane.xlu0 %1662 }
 0x89b   :  { %v1685_v17 = vmul.f32 0.125, %v1663_v51 }
 0x89c   :  { %v1694_v28 = vadd.f32 1e-05, %v1686_v22 }
 0x89d   :  { %v1693_v55 = vadd.f32 1e-05, %v1685_v17 }
 0x89e   :  { %2519 = vrsqrt.f32 %v1694_v28  ;;  %v1672_v36 = vpop.xlane.xlu1 %1671 }
 0x89f   :  { %2521 = vrsqrt.f32 %v1693_v55  ;;  %v1688_v46 = vmul.f32 0.125, %v1672_v36 }
 0x8a1   :  { %v1696_v23 = vadd.f32 1e-05, %v1688_v46 }
 0x8a2   :  { %v1678_v57 = vpop.xlane.xlu1 %1677  ;;  %v1669_v59 = vpop.xlane.xlu0 %1668 }
 0x8a3   :  { %2523 = vrsqrt.f32 %v1696_v23  ;;  %v1690_v52 = vmul.f32 0.125, %v1678_v57  ;;  %v1687_v45 = vmul.f32 0.125, %v1669_v59 }
 0x8a5   :  { %v1698_v4 = vadd.f32 1e-05, %v1690_v52  ;;  %v1695_v6 = vadd.f32 1e-05, %v1687_v45 }
 0x8a6   :  { %v1684_v7 = vpop.xlane.xlu1 %1683  ;;  %v1675_v24 = vpop.xlane.xlu0 %1674 }
 0x8a7   :  { %2525 = vrsqrt.f32 %v1698_v4  ;;  %v1692_v40 = vmul.f32 0.125, %v1684_v7  ;;  %v1689_v53 = vmul.f32 0.125, %v1675_v24 }
 0x8a8   :  { %v2520_v62 = vpop.eup %2519  ;;  %2527 = vrsqrt.f32 %v1695_v6 }
 0x8a9   :  { %v2522_v0 = vpop.eup %2521  ;;  %v1710_v54 = vmul.f32 %v2520_v62, %v3196_v16  ;;  %v1700_v25 = vadd.f32 1e-05, %v1692_v40  ;;  %v1697_v34 = vadd.f32 1e-05, %v1689_v53 }
 0x8aa   :  { %v1681_v32 = vpop.xlane.xlu0 %1680  ;;  %v1709_v21 = vmul.f32 %v2522_v0, %v3198_v18 }
 0x8ab   :  { %v1724_v15 = vmul.f32 %v2001_v63, %v1710_v54  ;;  %2529 = vrsqrt.f32 %v1700_v25  ;;  %v1691_v60 = vmul.f32 0.125, %v1681_v32 }
 0x8ac   :  { %2531 = vrsqrt.f32 %v1697_v34  ;;  %v1723_v29 = vmul.f32 %v2001_v63, %v1709_v21 }
 0x8ad   :  { %v2524_v13 = vpop.eup %2523  ;;  %v1738_v31 = vadd.f32 %v2002_v48, %v1724_v15  ;;  %v1699_v61 = vadd.f32 1e-05, %v1691_v60 }
 0x8ae   :  { %v1737_v37 = vadd.f32 %v2002_v48, %v1723_v29  ;;  %v1712_v16 = vmul.f32 %v2524_v13, %v3205_v19 }
 0x8af   :  { %1746 = vst.msk [vmem:[%s3343_s16 + $0x8] sm:$0xff] %vm74_vm0, %v1738_v31  ;;  %2533 = vrsqrt.f32 %v1699_v61 }
 0x8b0   :  { %1745 = vst.msk [vmem:[%s3343_s16] sm:$0xff] %vm74_vm0, %v1737_v37  ;;  %2314 = vmatprep.mubr.msk.f32.mxu0 %vm74_vm0, %v1737_v37  ;;  %v1726_v18 = vmul.f32 %v2001_v63, %v1712_v16 }
 0x8b1   :  { %v2526_v38 = vpop.eup %2525  ;;  %2315 = vmatmul.mubr.msk.f32.vlgmr.msra.gmra.mrb[32].mxu0 %vm74_vm0, %v1738_v31 }
 0x8b2   :  { %v2528_v44 = vpop.eup %2527  ;;  %v1740_v30 = vadd.f32 %v2002_v48, %v1726_v18  ;;  %v1714_v19 = vmul.f32 %v2526_v38, %v3210_v33 }
 0x8b3   :  { %v1711_v26 = vmul.f32 %v2528_v44, %v3212_v35 }
 0x8b4   :  { %1748 = vst.msk [vmem:[%s3343_s16 + $0x18] sm:$0xff] %vm74_vm0, %v1740_v30  ;;  %v1728_v27 = vmul.f32 %v2001_v63, %v1714_v19 }
 0x8b5   :  { %v2530_v42 = vpop.eup %2529  ;;  %v1725_v2 = vmul.f32 %v2001_v63, %v1711_v26 }
 0x8b6   :  { %v2532_v3 = vpop.eup %2531  ;;  %v1742_v9 = vadd.f32 %v2002_v48, %v1728_v27  ;;  %v1716_v50 = vmul.f32 %v2530_v42, %v3219_v5 }
 0x8b7   :  { %v1739_v10 = vadd.f32 %v2002_v48, %v1725_v2  ;;  %v1713_v56 = vmul.f32 %v2532_v3, %v3222_v11 }
 0x8b8   :  { %1750 = vst.msk [vmem:[%s3343_s16 + $0x28] sm:$0xff] %vm74_vm0, %v1742_v9  ;;  %v1730_v33 = vmul.f32 %v2001_v63, %v1716_v50 }
 0x8b9   :  { %v2534_v35 = vpop.eup %2533  ;;  %1747 = vst.msk [vmem:[%s3343_s16 + $0x10] sm:$0xff] %vm74_vm0, %v1739_v10  ;;  %2317 = vmatprep.mubr.msk.f32.mxu0 %vm74_vm0, %v1739_v10  ;;  %v1727_v58 = vmul.f32 %v2001_v63, %v1713_v56 }
 0x8ba   :  { %2318 = vmatmul.mubr.msk.f32.gmra.mrb[34].mxu0 %vm74_vm0, %v1740_v30  ;;  %v1715_v5 = vmul.f32 %v2534_v35, %v3230_v20  ;;  %v1744_v11 = vadd.f32 %v2002_v48, %v1730_v33 }
 0x8bb   :  { %v1741_v1 = vadd.f32 %v2002_v48, %v1727_v58 }
 0x8bc   :  { %v1729_v12 = vmul.f32 %v2001_v63, %v1715_v5  ;;  %1752 = vst.msk [vmem:[%s3343_s16 + $0x38] sm:$0xff] %vm74_vm0, %v1744_v11 }
 0x8bd   :  { %1749 = vst.msk [vmem:[%s3343_s16 + $0x20] sm:$0xff] %vm74_vm0, %v1741_v1  ;;  %2320 = vmatprep.mubr.msk.f32.mxu0 %vm74_vm0, %v1741_v1 }
 0x8be   :  { %2321 = vmatmul.mubr.msk.f32.gmra.mrb[36].mxu0 %vm74_vm0, %v1742_v9  ;;  %v1743_v8 = vadd.f32 %v2002_v48, %v1729_v12 }
 0x8c0   :  { %1751 = vst.msk [vmem:[%s3343_s16 + $0x30] sm:$0xff] %vm74_vm0, %v1743_v8  ;;  %2323 = vmatprep.mubr.msk.f32.mxu0 %vm74_vm0, %v1743_v8 }
 0x8c2   :  { %2324 = vmatmul.mubr.msk.f32.gmra.mrb[38].mxu0 %vm74_vm0, %v1744_v11 }
 0x984   :  { %v2316_v20 = vpop.f32.mrb[32].mxu0 }
 0x985   :  { %v1857_v39 = vadd.f32 %v2316_v20, %v2003_v47  ;;  %v1851_v41 = vpop.f32.mrb[33].mxu0 }
 0x986   :  { %v1852_v43 = vadd.f32 %v2003_v47, %v1851_v41 }
 0x987   :  { %1892 = vst.msk [vmem:[%s3345_s17 + $0x8] sm:$0xff] %vm1890_vm5, %v1857_v39 }
 0x988   :  { %1891 = vst.msk [vmem:[%s3345_s17] sm:$0xff] %vm1890_vm5, %v1852_v43 }
 0x98d   :  { %v2319_v14 = vpop.f32.mrb[34].mxu0 }
 0x98e   :  { %v1867_v49 = vadd.f32 %v2319_v14, %v2003_v47  ;;  %v1861_v22 = vpop.f32.mrb[35].mxu0 }
 0x98f   :  { %v1862_v51 = vadd.f32 %v2003_v47, %v1861_v22 }
 0x990   :  { %1894 = vst.msk [vmem:[%s3345_s17 + $0x18] sm:$0xff] %vm1890_vm5, %v1867_v49 }
 0x991   :  { %1893 = vst.msk [vmem:[%s3345_s17 + $0x10] sm:$0xff] %vm1890_vm5, %v1862_v51  ;;  %v2322_v17 = vpop.f32.mrb[36].mxu0 }
 0x992   :  { %v1877_v28 = vadd.f32 %v2322_v17, %v2003_v47  ;;  %v1871_v55 = vpop.f32.mrb[37].mxu0 }
 0x993   :  { %v1872_v36 = vadd.f32 %v2003_v47, %v1871_v55 }
 0x994   :  { %1896 = vst.msk [vmem:[%s3345_s17 + $0x28] sm:$0xff] %vm1890_vm5, %v1877_v28 }
 0x995   :  { %1895 = vst.msk [vmem:[%s3345_s17 + $0x20] sm:$0xff] %vm1890_vm5, %v1872_v36  ;;  %v2325_v46 = vpop.f32.mrb[38].mxu0 }
 0x996   :  { %v1887_v23 = vadd.f32 %v2325_v46, %v2003_v47  ;;  %v1881_v57 = vpop.f32.mrb[39].mxu0 }
 0x997   :  { %v1882_v59 = vadd.f32 %v2003_v47, %v1881_v57 }
 0x998   :  { %1898 = vst.msk [vmem:[%s3345_s17 + $0x38] sm:$0xff] %vm1890_vm5, %v1887_v23 }
 0x999   :  { %1897 = vst.msk [vmem:[%s3345_s17 + $0x30] sm:$0xff] %vm1890_vm5, %v1882_v59 }

// kernel: _lambda_.18
= control target key start
LH: loop header
LB: loop body
LE: loop exit
PB: predicated region body
PF: predicated region fallthrough
CT: control target
= control target key end

     0   :  { %vm24_vm0 = vcmask 64512   ;;  %s326_s0 = inlined_call_operand.vmem [shape: f32[64,8], index: 0, kind: input, shape index: {}]   ;;  %s327_s1 = inlined_call_operand.vmem [shape: f32[1,8], index: 1, kind: input, shape index: {}]   ;;  %s328_s2 = inlined_call_operand.vmem [shape: f32[1,8], index: 2, kind: input, shape index: {}]   ;;  %s329_s3 = inlined_call_operand.vmem [shape: f32[64,8], index: 3, kind: output, shape index: {}]  }
   0x1   :  { %v14_v0 = vld [vmem:[%s326_s0] sm:$0xff]  ;;  %v16_v1 = vld [vmem:[%s326_s0 + $0x10] sm:$0xff]  ;;  %v15_v2 = vld [vmem:[%s326_s0 + $0x8] sm:$0xff] }
   0x2   :  { %v25_v3 = vsel %vm24_vm0, %v14_v0, 0.0  ;;  %v31_v4 = vsel %vm24_vm0, %v16_v1, 0.0  ;;  %v17_v5 = vld [vmem:[%s326_s0 + $0x18] sm:$0xff]  ;;  %v28_v6 = vsel %vm24_vm0, %v15_v2, 0.0  ;;  %v18_v8 = vld [vmem:[%s326_s0 + $0x20] sm:$0xff]  ;;  %v19_v9 = vld [vmem:[%s326_s0 + $0x28] sm:$0xff] }
   0x3   :  { %26 = vadd.xlane.f32.xlu0 %v25_v3  ;;  %32 = vadd.xlane.f32.xlu1 %v31_v4  ;;  %v34_v7 = vsel %vm24_vm0, %v17_v5, 0.0  ;;  %v37_v10 = vsel %vm24_vm0, %v18_v8, 0.0  ;;  %v40_v11 = vsel %vm24_vm0, %v19_v9, 0.0  ;;  %v20_v12 = vld [vmem:[%s326_s0 + $0x30] sm:$0xff]  ;;  %v21_v13 = vld [vmem:[%s326_s0 + $0x38] sm:$0xff] }
   0x4   :  { %v43_v14 = vsel %vm24_vm0, %v20_v12, 0.0  ;;  %v46_v15 = vsel %vm24_vm0, %v21_v13, 0.0 }
   0x7   :  { %29 = vadd.xlane.f32.xlu0 %v28_v6  ;;  %35 = vadd.xlane.f32.xlu1 %v34_v7 }
   0xb   :  { %38 = vadd.xlane.f32.xlu0 %v37_v10  ;;  %41 = vadd.xlane.f32.xlu1 %v40_v11 }
   0xf   :  { %44 = vadd.xlane.f32.xlu0 %v43_v14  ;;  %47 = vadd.xlane.f32.xlu1 %v46_v15 }
  0x90   :  { %v27_v16 = vpop.xlane.xlu0 %26  ;;  %v33_v17 = vpop.xlane.xlu1 %32 }
  0x91   :  { %v50_v18 = vmul.f32 0.125, %v27_v16  ;;  %v52_v19 = vmul.f32 0.125, %v33_v17  ;;  %v171_v17 = vld [vmem:[%s328_s2] ss:$0 sm:$0xff] }
  0x93   :  { %v240_v20 = vsub.f32 %v14_v0, %v50_v18  ;;  %v242_v21 = vsub.f32 %v16_v1, %v52_v19 }
  0x94   :  { %v30_v22 = vpop.xlane.xlu0 %29  ;;  %v36_v23 = vpop.xlane.xlu1 %35 }
  0x95   :  { %v51_v24 = vmul.f32 0.125, %v30_v22  ;;  %v53_v25 = vmul.f32 0.125, %v36_v23  ;;  %v66_v26 = vmul.f32 %v240_v20, %v240_v20  ;;  %v68_v27 = vmul.f32 %v242_v21, %v242_v21 }
  0x97   :  { %v248_v28 = vsub.f32 %v15_v2, %v51_v24  ;;  %v250_v29 = vsub.f32 %v17_v5, %v53_v25  ;;  %v74_v30 = vsel %vm24_vm0, %v66_v26, 0.0  ;;  %v80_v33 = vsel %vm24_vm0, %v68_v27, 0.0 }
  0x98   :  { %75 = vadd.xlane.f32.xlu0 %v74_v30  ;;  %v39_v31 = vpop.xlane.xlu0 %38  ;;  %v42_v32 = vpop.xlane.xlu1 %41 }
  0x99   :  { %v54_v34 = vmul.f32 0.125, %v39_v31  ;;  %v55_v35 = vmul.f32 0.125, %v42_v32  ;;  %v67_v36 = vmul.f32 %v248_v28, %v248_v28  ;;  %v69_v37 = vmul.f32 %v250_v29, %v250_v29 }
  0x9b   :  { %v258_v38 = vsub.f32 %v18_v8, %v54_v34  ;;  %v260_v39 = vsub.f32 %v19_v9, %v55_v35  ;;  %v77_v40 = vsel %vm24_vm0, %v67_v36, 0.0  ;;  %v83_v43 = vsel %vm24_vm0, %v69_v37, 0.0 }
  0x9c   :  { %81 = vadd.xlane.f32.xlu0 %v80_v33  ;;  %78 = vadd.xlane.f32.xlu1 %v77_v40  ;;  %v45_v41 = vpop.xlane.xlu0 %44  ;;  %v48_v42 = vpop.xlane.xlu1 %47 }
  0x9d   :  { %v56_v44 = vmul.f32 0.125, %v45_v41  ;;  %v57_v45 = vmul.f32 0.125, %v48_v42  ;;  %v70_v46 = vmul.f32 %v258_v38, %v258_v38  ;;  %v71_v47 = vmul.f32 %v260_v39, %v260_v39 }
  0x9f   :  { %v268_v48 = vsub.f32 %v20_v12, %v56_v44  ;;  %v270_v49 = vsub.f32 %v21_v13, %v57_v45  ;;  %v86_v50 = vsel %vm24_vm0, %v70_v46, 0.0  ;;  %v89_v51 = vsel %vm24_vm0, %v71_v47, 0.0  ;;  %v170_v12 = vld [vmem:[%s327_s1] ss:$0 sm:$0xff] }
  0xa0   :  { %84 = vadd.xlane.f32.xlu1 %v83_v43  ;;  %87 = vadd.xlane.f32.xlu0 %v86_v50 }
  0xa1   :  { %v72_v52 = vmul.f32 %v268_v48, %v268_v48  ;;  %v73_v53 = vmul.f32 %v270_v49, %v270_v49 }
  0xa3   :  { %v92_v54 = vsel %vm24_vm0, %v72_v52, 0.0  ;;  %v95_v55 = vsel %vm24_vm0, %v73_v53, 0.0 }
  0xa4   :  { %90 = vadd.xlane.f32.xlu1 %v89_v51  ;;  %93 = vadd.xlane.f32.xlu0 %v92_v54 }
  0xa8   :  { %96 = vadd.xlane.f32.xlu1 %v95_v55 }
 0x125   :  { %v76_v56 = vpop.xlane.xlu0 %75 }
 0x126   :  { %v98_v57 = vmul.f32 0.125, %v76_v56 }
 0x128   :  { %v106_v58 = vadd.f32 1e-05, %v98_v57 }
 0x129   :  { %v79_v59 = vpop.xlane.xlu1 %78  ;;  %v82_v60 = vpop.xlane.xlu0 %81 }
 0x12a   :  { %172 = vrsqrt.f32 %v106_v58  ;;  %v99_v61 = vmul.f32 0.125, %v79_v59  ;;  %v100_v62 = vmul.f32 0.125, %v82_v60 }
 0x12c   :  { %v107_v63 = vadd.f32 1e-05, %v99_v61  ;;  %v108_v0 = vadd.f32 1e-05, %v100_v62 }
 0x12d   :  { %v85_v1 = vpop.xlane.xlu1 %84  ;;  %v88_v2 = vpop.xlane.xlu0 %87 }
 0x12e   :  { %174 = vrsqrt.f32 %v107_v63  ;;  %v101_v3 = vmul.f32 0.125, %v85_v1  ;;  %v102_v4 = vmul.f32 0.125, %v88_v2 }
 0x12f   :  { %176 = vrsqrt.f32 %v108_v0 }
 0x130   :  { %v109_v5 = vadd.f32 1e-05, %v101_v3  ;;  %v110_v6 = vadd.f32 1e-05, %v102_v4 }
 0x131   :  { %v91_v7 = vpop.xlane.xlu1 %90  ;;  %v94_v8 = vpop.xlane.xlu0 %93 }
 0x132   :  { %178 = vrsqrt.f32 %v109_v5  ;;  %v103_v9 = vmul.f32 0.125, %v91_v7  ;;  %v104_v10 = vmul.f32 0.125, %v94_v8 }
 0x133   :  { %180 = vrsqrt.f32 %v110_v6 }
 0x134   :  { %v173_v11 = vpop.eup %172  ;;  %v111_v13 = vadd.f32 1e-05, %v103_v9  ;;  %v112_v14 = vadd.f32 1e-05, %v104_v10 }
 0x135   :  { %v122_v15 = vmul.f32 %v173_v11, %v240_v20  ;;  %v97_v16 = vpop.xlane.xlu1 %96 }
 0x136   :  { %182 = vrsqrt.f32 %v111_v13  ;;  %v105_v18 = vmul.f32 0.125, %v97_v16 }
 0x137   :  { %v136_v19 = vmul.f32 %v170_v12, %v122_v15  ;;  %184 = vrsqrt.f32 %v112_v14 }
 0x138   :  { %v175_v22 = vpop.eup %174  ;;  %v113_v23 = vadd.f32 1e-05, %v105_v18 }
 0x139   :  { %v177_v24 = vpop.eup %176  ;;  %v150_v25 = vadd.f32 %v171_v17, %v136_v19  ;;  %v123_v26 = vmul.f32 %v175_v22, %v248_v28 }
 0x13a   :  { %v124_v27 = vmul.f32 %v177_v24, %v242_v21  ;;  %186 = vrsqrt.f32 %v113_v23 }
 0x13b   :  { %158 = vst.msk [vmem:[%s329_s3] sm:$0xff] %vm24_vm0, %v150_v25  ;;  %v137_v20 = vmul.f32 %v170_v12, %v123_v26 }
 0x13c   :  { %v179_v30 = vpop.eup %178  ;;  %v138_v31 = vmul.f32 %v170_v12, %v124_v27 }
 0x13d   :  { %v181_v32 = vpop.eup %180  ;;  %v151_v33 = vadd.f32 %v171_v17, %v137_v20  ;;  %v125_v34 = vmul.f32 %v179_v30, %v250_v29 }
 0x13e   :  { %v152_v35 = vadd.f32 %v171_v17, %v138_v31  ;;  %v126_v36 = vmul.f32 %v181_v32, %v258_v38 }
 0x13f   :  { %159 = vst.msk [vmem:[%s329_s3 + $0x8] sm:$0xff] %vm24_vm0, %v151_v33  ;;  %v139_v21 = vmul.f32 %v170_v12, %v125_v34 }
 0x140   :  { %v183_v28 = vpop.eup %182  ;;  %160 = vst.msk [vmem:[%s329_s3 + $0x10] sm:$0xff] %vm24_vm0, %v152_v35  ;;  %v140_v37 = vmul.f32 %v170_v12, %v126_v36 }
 0x141   :  { %v185_v40 = vpop.eup %184  ;;  %v153_v41 = vadd.f32 %v171_v17, %v139_v21  ;;  %v127_v29 = vmul.f32 %v183_v28, %v260_v39 }
 0x142   :  { %v154_v42 = vadd.f32 %v171_v17, %v140_v37  ;;  %v128_v38 = vmul.f32 %v185_v40, %v268_v48 }
 0x143   :  { %161 = vst.msk [vmem:[%s329_s3 + $0x18] sm:$0xff] %vm24_vm0, %v153_v41  ;;  %v141_v43 = vmul.f32 %v170_v12, %v127_v29 }
 0x144   :  { %v187_v44 = vpop.eup %186  ;;  %162 = vst.msk [vmem:[%s329_s3 + $0x20] sm:$0xff] %vm24_vm0, %v154_v42  ;;  %v142_v45 = vmul.f32 %v170_v12, %v128_v38 }
 0x145   :  { %v155_v46 = vadd.f32 %v171_v17, %v141_v43  ;;  %v129_v47 = vmul.f32 %v187_v44, %v270_v49 }
 0x146   :  { %v156_v39 = vadd.f32 %v171_v17, %v142_v45 }
 0x147   :  { %163 = vst.msk [vmem:[%s329_s3 + $0x28] sm:$0xff] %vm24_vm0, %v155_v46  ;;  %v143_v48 = vmul.f32 %v170_v12, %v129_v47 }
 0x148   :  { %164 = vst.msk [vmem:[%s329_s3 + $0x30] sm:$0xff] %vm24_vm0, %v156_v39 }
 0x149   :  { %v157_v50 = vadd.f32 %v171_v17, %v143_v48 }
 0x14b   :  { %165 = vst.msk [vmem:[%s329_s3 + $0x38] sm:$0xff] %vm24_vm0, %v157_v50 }

// kernel: _lambda_.19
= control target key start
LH: loop header
LB: loop body
LE: loop exit
PB: predicated region body
PF: predicated region fallthrough
CT: control target
= control target key end

     0   :  { %v230_v3 = vmov 0.0|0.0   ;;  %vm231_vm0 = vmmov 0   ;;  %v232_v6 = vmov 0.0   ;;  %s320_s0 = inlined_call_operand.vmem [shape: f32[2,128], index: 0, kind: input, shape index: {}]   ;;  %s321_s1 = inlined_call_operand.vmem [shape: f32[128,3], index: 1, kind: input, shape index: {}]   ;;  %s322_s2 = inlined_call_operand.vmem [shape: f32[1,3], index: 2, kind: input, shape index: {}]   ;;  %s323_s3 = inlined_call_operand.hbm [shape: f32[2,3], index: 3, kind: output, shape index: {}]  }
   0x1   :  { %v16_v0 = vld [vmem:[%s321_s1] sm:$0xff]  ;;  %v17_v1 = vld [vmem:[%s321_s1 + $0x8] sm:$0xff]  ;;  %v18_v2 = vld [vmem:[%s321_s1 + $0x10] sm:$0xff]  ;;  %178 = vmatprep.subr.bf16.mxu0 %v230_v3  ;;  %175 = vmatprep.mubr.msk.f32.mxu0 %vm231_vm0, %v232_v6 }
   0x2   :  { %v179_v4 = vpack.c.bf16 %v17_v1, %v16_v0  ;;  %v19_v5 = vld [vmem:[%s321_s1 + $0x18] sm:$0xff]  ;;  %v20_v8 = vld [vmem:[%s321_s1 + $0x20] sm:$0xff]  ;;  %v21_v9 = vld [vmem:[%s321_s1 + $0x28] sm:$0xff] }
   0x3   :  { %v182_v7 = vpack.c.bf16 %v19_v5, %v18_v2 }
   0x4   :  { %180 = vmatpush3.bf16.msra.mxu0 %v179_v4 }
   0x5   :  { %181 = vmatprep.subr.bf16.mxu0 %v230_v3 }
   0x6   :  { %8 = vsyncpa [#allocation3], 0  ;;  %v185_v10 = vpack.c.bf16 %v21_v9, %v20_v8  ;;  %v22_v11 = vld [vmem:[%s321_s1 + $0x30] sm:$0xff]  ;;  %v23_v12 = vld [vmem:[%s321_s1 + $0x38] sm:$0xff]  ;;  %s233_s21 = smov [#allocation2]   ;;  %vm109_vm1 = vcmask 17408  }
   0x7   :  { %v188_v13 = vpack.c.bf16 %v23_v12, %v22_v11  ;;  %v24_v14 = vld [vmem:[%s321_s1 + $0x40] sm:$0xff]  ;;  %v25_v15 = vld [vmem:[%s321_s1 + $0x48] sm:$0xff]  ;;  %v26_v17 = vld [vmem:[%s321_s1 + $0x50] sm:$0xff]  ;;  %s117_s22 = sshll.u32 %s233_s21, 4  ;;  %s118_s22 = int_to_ptr.vmem [resolvable:$true] %s117_s22 }
   0x8   :  { %183 = vmatpush3.bf16.msra.mxu0 %v182_v7  ;;  %v191_v16 = vpack.c.bf16 %v25_v15, %v24_v14  ;;  %v27_v18 = vld [vmem:[%s321_s1 + $0x58] sm:$0xff]  ;;  %v28_v20 = vld [vmem:[%s321_s1 + $0x60] sm:$0xff]  ;;  %v29_v21 = vld [vmem:[%s321_s1 + $0x68] sm:$0xff]  ;;  %p211_p1 = scmp.lt.s32.totalorder %s118_s22, %s118_s22 }
   0x9   :  { %184 = vmatprep.subr.bf16.mxu0 %v230_v3  ;;  %v194_v19 = vpack.c.bf16 %v27_v18, %v26_v17  ;;  %v197_v22 = vpack.c.bf16 %v29_v21, %v28_v20  ;;  %v30_v23 = vld [vmem:[%s321_s1 + $0x70] sm:$0xff]  ;;  %v31_v24 = vld [vmem:[%s321_s1 + $0x78] sm:$0xff]  ;;  %v15_v26 = vld [vmem:[%s320_s0] sm:$0x3]  ;;  %s206_s1 = scalar_lea.vmem %s118_s22, 32 }
   0xa   :  { %v200_v25 = vpack.c.bf16 %v31_v24, %v30_v23  ;;  %v125_v27 = vld [vmem:[%s322_s2] ss:$0 sm:$0xff]  ;;  %p207_p0 = scmp.ne.s32.totalorder %s118_s22, %s206_s1  ;;  %p212_p2 = scmp.lt.s32.totalorder %s206_s1, %s206_s1 }
   0xc   :  { %186 = vmatpush3.bf16.msra.mxu0 %v185_v10  ;;  %p213_p3 = por %p212_p2, %p211_p1 }
   0xd   :  { %187 = vmatprep.subr.bf16.mxu0 %v230_v3 }
   0xe   :  { %p214_p4 = pnand %p213_p3, %p207_p0 }
  0x10   :  { %189 = vmatpush3.bf16.msra.mxu0 %v188_v13 }
  0x11   :  { %190 = vmatprep.subr.bf16.mxu0 %v230_v3 }
  0x14   :  { %192 = vmatpush3.bf16.msra.mxu0 %v191_v16 }
  0x15   :  { %193 = vmatprep.subr.bf16.mxu0 %v230_v3 }
  0x18   :  { %195 = vmatpush3.bf16.msra.mxu0 %v194_v19 }
  0x19   :  { %196 = vmatprep.subr.bf16.mxu0 %v230_v3 }
  0x1c   :  { %198 = vmatpush3.bf16.msra.mxu0 %v197_v22 }
  0x1d   :  { %199 = vmatprep.subr.bf16.mxu0 %v230_v3 }
  0x20   :  { %201 = vmatpush3.bf16.msra.mxu0 %v200_v25 }
  0x23   :  { %176 = vmatmul.mubr.f32.vlgmr.msra.gmra.mrb[0].mxu0 %v15_v26 }
  0xf6   :  { %v105_v28 = vpop.f32.mrb[0].mxu0 }
  0xf7   :  { %v106_v29 = vadd.f32 %v125_v27, %v105_v28  ;;  %v177_v30 = vpop.f32.mrb[1].mxu0 }
  0xf9   :  { %110 = vst.msk [vmem:[#allocation2] sm:$0x3] %vm109_vm1, %v106_v29 }
  0xfa   :  { %217 = shalt.err (!%p214_p4)
}
  0xfb   :  { %s218_s24 = scalar_lea.hbm %s323_s3, 32 }
  0xfc   :  { %p219_p5 = scmp.ne.s32.totalorder %s323_s3, %s218_s24  ;;  %p222_p6 = scmp.lt.u32.totalorder %s218_s24, %s323_s3 }
  0xfe   :  { %p224_p7 = pnand %p222_p6, %p219_p5 }
 0x100   :  { %227 = shalt.err (!%p224_p7)
}
 0x101   :  { %120 = dma.vmem_to_hbm [thread:$0]  %s118_s22, 32, %s323_s3, [#allocation3]  }
 0x102   :  { %228 = dma.done.wait [#allocation3], 32  }
 0x103   :  { %229 = vsyncadd [#allocation3], 4294967264 }
 0x104   :  { %124 = vsyncpa [#allocation3], 1 }

</bundles_post_ra>
